<compile_context>
chip_gen: v7x
topology: tpu7x:2x2x1
jax: 0.10.0
libtpu: 0.0.40
codegen_flags: <defaults>
</compile_context>

<pallas_src>
import functools

import jax
import jax.numpy as jnp
from jax.experimental import pallas as pl
from jax.experimental.pallas import tpu as pltpu

C1, C2, C3, CV = 64, 128, 256, 128
N_VOTE, N_HEAD = 6, 12
LANE = 128  # lane-dense padding for the narrow (6 / 12 channel) outputs


# -------------------- Pallas kernel --------------------

def catposenet_kernel(pc_ref,
                      w1_ref, b1_ref, w2_ref, b2_ref, w3_ref, b3_ref,
                      wv1l_ref, wv1g_ref, bv1_ref, wv2_ref, bv2_ref,
                      wh_ref, bh_ref,
                      vote_ref, head_ref):
    """Bt batch elements per grid step; all matmuls on flattened (Bt*N, C) rows."""
    Bt, N, _ = pc_ref.shape
    pc = pc_ref[...]                                            # (Bt, N, 3) f32
    x = pc.reshape(Bt * N, 3)

    # ---- layer 1 (K=3): VPU broadcast-FMAs, skip the MXU ----
    w1 = w1_ref[...]                                            # (3, C1) f32
    h1 = (x[:, 0:1] * w1[0:1, :] + x[:, 1:2] * w1[1:2, :]
          + x[:, 2:3] * w1[2:3, :] + b1_ref[...])
    h1 = jnp.maximum(h1, 0.0).astype(jnp.bfloat16)              # (Bt*N, C1)

    # ---- layers 2/3: bf16 MXU matmuls, f32 accumulation ----
    h2 = jnp.maximum(
        jnp.dot(h1, w2_ref[...], preferred_element_type=jnp.float32) + b2_ref[...],
        0.0).astype(jnp.bfloat16)                               # (Bt*N, C2)
    h3 = jnp.maximum(
        jnp.dot(h2, w3_ref[...], preferred_element_type=jnp.float32) + b3_ref[...],
        0.0).astype(jnp.bfloat16)                               # (Bt*N, C3) bf16 only

    # ---- per-element global max-pool over points (on bf16; rounding & max commute) ----
    # NOTE: on v5e (no native bf16 VPU) an f32 max may be preferable if the bundle
    # dump shows pack/unpack filler.
    g_bf = jnp.max(h3.reshape(Bt, N, C3), axis=1)               # (Bt, C3) bf16

    # ---- vote head: concat([h3, g]) @ wv1 == h3 @ wv1_local + g @ wv1_global ----
    v_loc = jnp.dot(h3, wv1l_ref[...], preferred_element_type=jnp.float32)    # (Bt*N, CV)
    v_glb = jnp.dot(g_bf, wv1g_ref[...], preferred_element_type=jnp.float32)  # (Bt, CV)
    v1 = v_loc.reshape(Bt, N, CV) + v_glb[:, None, :] + bv1_ref[...]
    v1 = jnp.maximum(v1, 0.0).reshape(Bt * N, CV).astype(jnp.bfloat16)
    vote = jnp.dot(v1, wv2_ref[...], preferred_element_type=jnp.float32) + bv2_ref[...]
    # lane-dense (128-wide) bf16 store: unmasked vst, half the HBM writeback of f32
    vote_ref[...] = vote.reshape(Bt, N, LANE).astype(vote_ref.dtype)

    # ---- raw pose head; residual-T mean folded in here (lanes 6:9) ----
    head = jnp.dot(g_bf, wh_ref[...], preferred_element_type=jnp.float32) + bh_ref[...]
    pc_mean = jnp.mean(pc, axis=1)                              # (Bt, 3) f32
    lane = jax.lax.broadcasted_iota(jnp.int32, (Bt, LANE), 1)
    mean_slab = (jnp.where(lane == 6, pc_mean[:, 0:1], 0.0)
                 + jnp.where(lane == 7, pc_mean[:, 1:2], 0.0)
                 + jnp.where(lane == 8, pc_mean[:, 2:3], 0.0))
    head = head + mean_slab
    head_ref[...] = head[:, None, :].astype(head_ref.dtype)     # (Bt, 1, LANE)


# -------------------- parameters --------------------

def init_params(key):
    def dense(k, shape, scale=0.1):
        return (scale * jax.random.normal(k, shape)).astype(jnp.float32)

    ks = jax.random.split(key, 8)
    wv2 = dense(ks[4], (CV, N_VOTE))
    wh = dense(ks[5], (C3, N_HEAD))
    params = {
        # layer 1 stays f32 (runs on the VPU)
        "w1": dense(ks[0], (3, C1)),
        "b1": jnp.zeros((1, C1), jnp.float32),
        # MXU layers stored in bf16 (f32 accumulation inside the kernel)
        "w2": dense(ks[1], (C1, C2)).astype(jnp.bfloat16),
        "b2": jnp.zeros((1, C2), jnp.float32),
        "w3": dense(ks[2], (C2, C3)).astype(jnp.bfloat16),
        "b3": jnp.zeros((1, C3), jnp.float32),
        # vote head: wv1 (2*C3, CV) pre-split into local / global halves
        "wv1_local": dense(ks[3], (C3, CV)).astype(jnp.bfloat16),
        "wv1_global": dense(ks[6], (C3, CV)).astype(jnp.bfloat16),
        "bv1": jnp.zeros((1, CV), jnp.float32),
        # narrow output heads padded to a full 128-lane slab (zeros beyond the
        # real channels) so the kernel emits unmasked, lane-dense stores.
        "wv2": jnp.zeros((CV, LANE), jnp.bfloat16).at[:, :N_VOTE].set(
            wv2.astype(jnp.bfloat16)),
        "bv2": jnp.zeros((1, LANE), jnp.float32),
        "wh": jnp.zeros((C3, LANE), jnp.bfloat16).at[:, :N_HEAD].set(
            wh.astype(jnp.bfloat16)),
        "bh": jnp.zeros((1, LANE), jnp.float32),
    }
    return params


WEIGHT_ORDER = ("w1", "b1", "w2", "b2", "w3", "b3",
                "wv1_local", "wv1_global", "bv1", "wv2", "bv2", "wh", "bh")


# -------------------- wrapper (CatGSCPose forward, val path) --------------------

def _pick_block_b(B, N, target_rows=2048, max_rows=8192):
    """Batch elements per grid step.

    Aim for ~2048 MXU rows per step (amortize ~0.35us/step pipeline overhead, keep the
    256-deep MXU fed), hard-cap at 8K rows (v7x 64 MiB VMEM), and keep grid >= 2 so
    dimension_semantics=("parallel",) can split the grid across both v7x TensorCores.
    """
    rows_cap = max(1, min(target_rows, max_rows) // max(N, 1))
    bt = max(1, min(B, rows_cap))
    if B >= 2:
        bt = min(bt, B // 2)          # keep at least 2 grid steps
    bt = max(1, bt)
    while B % bt:
        bt -= 1
    return bt


@functools.partial(jax.jit, static_argnames=("block_b",))
def cat_posenet_pallas(points, params, block_b=None):
    """points: (B, N, 3) f32 -> (vote (B,N,6), green (B,3), red (B,3), T (B,3), s (B,3))."""
    B, N, _ = points.shape
    Bt = block_b if block_b is not None else _pick_block_b(B, N)

    in_specs = [pl.BlockSpec((Bt, N, 3), lambda b: (b, 0, 0))]
    weight_args = []
    for name in WEIGHT_ORDER:
        arr = params[name]
        # Whole weight resident every grid step (constant index_map -> no re-DMA).
        in_specs.append(pl.BlockSpec(arr.shape, lambda b, nd=arr.ndim: (0,) * nd))
        weight_args.append(arr)

    out_shape = (
        jax.ShapeDtypeStruct((B, N, LANE), jnp.bfloat16),  # lane-padded vote (bf16 writeback)
        jax.ShapeDtypeStruct((B, 1, LANE), jnp.float32),   # lane-padded raw pose head (tiny)
    )
    out_specs = (
        pl.BlockSpec((Bt, N, LANE), lambda b: (b, 0, 0)),
        pl.BlockSpec((Bt, 1, LANE), lambda b: (b, 0, 0)),
    )

    vote_pad, head_pad = pl.pallas_call(
        catposenet_kernel,
        grid=(B // Bt,),
        in_specs=in_specs,
        out_specs=out_specs,
        out_shape=out_shape,
        compiler_params=pltpu.CompilerParams(
            # batch axis is fully independent -> shard across v7x's two TCs
            dimension_semantics=("parallel",)),
    )(points, *weight_args)

    vote = vote_pad[:, :, :N_VOTE].astype(jnp.float32)
    head = head_pad[:, 0, :N_HEAD]

    def normalize(v, eps=1e-12):   # torch F.normalize(p=2) semantics
        n = jnp.sqrt(jnp.sum(v * v, axis=-1, keepdims=True))
        return v / jnp.maximum(n, eps)

    p_green_R = normalize(head[:, 0:3])
    p_red_R = normalize(head[:, 3:6])
    Pred_T = head[:, 6:9]          # residual-T point-cloud mean already added in-kernel
    Pred_s = head[:, 9:12]
    # TODO(synk): if the reference CatPoseNet predicts a size residual, Pred_s would be
    # head[:, 9:12] + mean_shape; the CatPoseNet source is not provided, so raw output is kept.
    return vote, p_green_R, p_red_R, Pred_T, Pred_s


def cat_gsc_pose_forward(params, points, gt_R, gt_t, gt_s, mean_shape,
                         do_loss=False, phase="val"):
    """Mirrors CatGSCPose.forward for the inference path (phase='val', do_loss=False)."""
    PC = jax.lax.stop_gradient(points)  # points.detach()
    # TODO(synk): training-time stochastic data_augment (defor_3D_*) and the do_loss
    # branch (Pose_loss / Vote_plane_loss cfg) are not part of the val path and are skipped.
    vote, p_green_R, p_red_R, Pred_T, Pred_s = cat_posenet_pallas(PC, params)

    return {
        "vote": vote,
        "PC": PC,
        "p_green_R": p_green_R,
        "p_red_R": p_red_R,
        "Pred_T": Pred_T,
        "Pred_s": Pred_s,
        "gt_R": gt_R,
        "gt_t": gt_t,
        "gt_s": gt_s,
    }


# -------------------- pure-JAX reference (for correctness check) --------------------

def cat_posenet_reference(points, params):
    f32 = lambda a: a.astype(jnp.float32)
    h1 = jax.nn.relu(points @ f32(params["w1"]) + params["b1"])
    h2 = jax.nn.relu(h1 @ f32(params["w2"]) + params["b2"])
    h3 = jax.nn.relu(h2 @ f32(params["w3"]) + params["b3"])
    g = jnp.max(h3, axis=1)
    v1 = jax.nn.relu(h3 @ f32(params["wv1_local"])
                     + (g @ f32(params["wv1_global"]))[:, None, :] + params["bv1"])
    vote = (v1 @ f32(params["wv2"]) + params["bv2"])[:, :, :N_VOTE]
    head = (g @ f32(params["wh"]) + params["bh"])[:, :N_HEAD]

    def normalize(v, eps=1e-12):
        n = jnp.sqrt(jnp.sum(v * v, axis=-1, keepdims=True))
        return v / jnp.maximum(n, eps)

    return (vote, normalize(head[:, 0:3]), normalize(head[:, 3:6]),
            head[:, 6:9] + jnp.mean(points, axis=1), head[:, 9:12])


# -------------------- demo --------------------

if __name__ == "__main__":
    key = jax.random.PRNGKey(0)
    k_pc, k_R, k_t, k_s, k_ms, k_par = jax.random.split(key, 6)

    B, N = 4, 256
    points = jax.random.normal(k_pc, (B, N, 3), dtype=jnp.float32)
    gt_R = jnp.tile(jnp.eye(3, dtype=jnp.float32)[None], (B, 1, 1)) \
        + 0.01 * jax.random.normal(k_R, (B, 3, 3), dtype=jnp.float32)
    gt_t = 0.1 * jax.random.normal(k_t, (B, 3), dtype=jnp.float32)
    gt_s = jnp.abs(jax.random.normal(k_s, (B, 3), dtype=jnp.float32))
    mean_shape = jnp.abs(jax.random.normal(k_ms, (B, 3), dtype=jnp.float32))

    params = init_params(k_par)

    out = cat_gsc_pose_forward(params, points, gt_R, gt_t, gt_s, mean_shape,
                               do_loss=False, phase="val")
    jax.block_until_ready(out)

    assert out["vote"].shape == (B, N, N_VOTE)
    assert out["p_green_R"].shape == (B, 3)
    assert out["p_red_R"].shape == (B, 3)
    assert out["Pred_T"].shape == (B, 3)
    assert out["Pred_s"].shape == (B, 3)
    assert out["PC"].shape == (B, N, 3)

    # loose numeric check vs pure-JAX f32 reference (kernel uses bf16 MXU inputs and
    # bf16 vote writeback)
    ref = cat_posenet_reference(points, params)
    got = (out["vote"], out["p_green_R"], out["p_red_R"], out["Pred_T"], out["Pred_s"])
    for a, b in zip(got, ref):
        assert bool(jnp.all(jnp.isfinite(a)))
        assert float(jnp.max(jnp.abs(a - b))) < 0.1 + 0.05 * float(jnp.max(jnp.abs(b)))

    print("KERNEL_OK")
</pallas_src>

<mosaic_0001>
module attributes {stable_mosaic.version = 11 : i64} {
  func.func @catposenet_kernel(%arg0: i32, %arg1: memref<2x256x3xf32, #tpu.memory_space<vmem>>, %arg2: memref<3x64xf32, #tpu.memory_space<vmem>>, %arg3: memref<1x64xf32, #tpu.memory_space<vmem>>, %arg4: memref<64x128xbf16, #tpu.memory_space<vmem>>, %arg5: memref<1x128xf32, #tpu.memory_space<vmem>>, %arg6: memref<128x256xbf16, #tpu.memory_space<vmem>>, %arg7: memref<1x256xf32, #tpu.memory_space<vmem>>, %arg8: memref<256x128xbf16, #tpu.memory_space<vmem>>, %arg9: memref<256x128xbf16, #tpu.memory_space<vmem>>, %arg10: memref<1x128xf32, #tpu.memory_space<vmem>>, %arg11: memref<128x128xbf16, #tpu.memory_space<vmem>>, %arg12: memref<1x128xf32, #tpu.memory_space<vmem>>, %arg13: memref<256x128xbf16, #tpu.memory_space<vmem>>, %arg14: memref<1x128xf32, #tpu.memory_space<vmem>>, %arg15: memref<2x256x128xbf16, #tpu.memory_space<vmem>>, %arg16: memref<2x1x128xf32, #tpu.memory_space<vmem>>) attributes {dimension_semantics = [#tpu.dimension_semantics<parallel>], iteration_bounds = array<i64: 2>, scalar_prefetch = 0 : i64, scratch_operands = 0 : i64, tpu.core_type = #tpu.core_type<tc>, window_params = [{transform_indices = @transform_0, window_bounds = array<i64: 2, 256, 3>}, {pipeline_mode = #tpu.pipeline_mode<synchronous>, transform_indices = @transform_1, window_bounds = array<i64: 3, 64>}, {pipeline_mode = #tpu.pipeline_mode<synchronous>, transform_indices = @transform_2, window_bounds = array<i64: 1, 64>}, {pipeline_mode = #tpu.pipeline_mode<synchronous>, transform_indices = @transform_3, window_bounds = array<i64: 64, 128>}, {pipeline_mode = #tpu.pipeline_mode<synchronous>, transform_indices = @transform_4, window_bounds = array<i64: 1, 128>}, {pipeline_mode = #tpu.pipeline_mode<synchronous>, transform_indices = @transform_5, window_bounds = array<i64: 128, 256>}, {pipeline_mode = #tpu.pipeline_mode<synchronous>, transform_indices = @transform_6, window_bounds = array<i64: 1, 256>}, {pipeline_mode = #tpu.pipeline_mode<synchronous>, transform_indices = @transform_7, window_bounds = array<i64: 256, 128>}, {pipeline_mode = #tpu.pipeline_mode<synchronous>, transform_indices = @transform_8, window_bounds = array<i64: 256, 128>}, {pipeline_mode = #tpu.pipeline_mode<synchronous>, transform_indices = @transform_9, window_bounds = array<i64: 1, 128>}, {pipeline_mode = #tpu.pipeline_mode<synchronous>, transform_indices = @transform_10, window_bounds = array<i64: 128, 128>}, {pipeline_mode = #tpu.pipeline_mode<synchronous>, transform_indices = @transform_11, window_bounds = array<i64: 1, 128>}, {pipeline_mode = #tpu.pipeline_mode<synchronous>, transform_indices = @transform_12, window_bounds = array<i64: 256, 128>}, {pipeline_mode = #tpu.pipeline_mode<synchronous>, transform_indices = @transform_13, window_bounds = array<i64: 1, 128>}, {transform_indices = @transform_14, window_bounds = array<i64: 2, 256, 128>}, {transform_indices = @transform_15, window_bounds = array<i64: 2, 1, 128>}]} {
    %c0 = arith.constant 0 : index
    %c0_0 = arith.constant 0 : index
    %c0_1 = arith.constant 0 : index
    %0 = vector.load %arg1[%c0, %c0_0, %c0_1] : memref<2x256x3xf32, #tpu.memory_space<vmem>>, vector<2x256x3xf32>
    %1 = vector.shape_cast %0 : vector<2x256x3xf32> to vector<512x3xf32>
    %c0_2 = arith.constant 0 : index
    %c0_3 = arith.constant 0 : index
    %2 = vector.load %arg2[%c0_2, %c0_3] : memref<3x64xf32, #tpu.memory_space<vmem>>, vector<3x64xf32>
    %3 = vector.extract_strided_slice %1 {offsets = [0, 0], sizes = [512, 1], strides = [1, 1]} : vector<512x3xf32> to vector<512x1xf32>
    %4 = vector.extract_strided_slice %2 {offsets = [0, 0], sizes = [1, 64], strides = [1, 1]} : vector<3x64xf32> to vector<1x64xf32>
    %5 = vector.broadcast %3 : vector<512x1xf32> to vector<512x64xf32>
    %6 = vector.broadcast %4 : vector<1x64xf32> to vector<512x64xf32>
    %7 = arith.mulf %5, %6 : vector<512x64xf32>
    %8 = vector.extract_strided_slice %1 {offsets = [0, 1], sizes = [512, 1], strides = [1, 1]} : vector<512x3xf32> to vector<512x1xf32>
    %9 = vector.extract_strided_slice %2 {offsets = [1, 0], sizes = [1, 64], strides = [1, 1]} : vector<3x64xf32> to vector<1x64xf32>
    %10 = vector.broadcast %8 : vector<512x1xf32> to vector<512x64xf32>
    %11 = vector.broadcast %9 : vector<1x64xf32> to vector<512x64xf32>
    %12 = arith.mulf %10, %11 : vector<512x64xf32>
    %13 = arith.addf %7, %12 : vector<512x64xf32>
    %14 = vector.extract_strided_slice %1 {offsets = [0, 2], sizes = [512, 1], strides = [1, 1]} : vector<512x3xf32> to vector<512x1xf32>
    %15 = vector.extract_strided_slice %2 {offsets = [2, 0], sizes = [1, 64], strides = [1, 1]} : vector<3x64xf32> to vector<1x64xf32>
    %16 = vector.broadcast %14 : vector<512x1xf32> to vector<512x64xf32>
    %17 = vector.broadcast %15 : vector<1x64xf32> to vector<512x64xf32>
    %18 = arith.mulf %16, %17 : vector<512x64xf32>
    %19 = arith.addf %13, %18 : vector<512x64xf32>
    %c0_4 = arith.constant 0 : index
    %c0_5 = arith.constant 0 : index
    %20 = vector.load %arg3[%c0_4, %c0_5] : memref<1x64xf32, #tpu.memory_space<vmem>>, vector<1x64xf32>
    %21 = vector.broadcast %20 : vector<1x64xf32> to vector<512x64xf32>
    %22 = arith.addf %19, %21 : vector<512x64xf32>
    %cst = arith.constant 0.000000e+00 : f32
    %23 = vector.broadcast %cst : f32 to vector<512x64xf32>
    %24 = arith.maximumf %22, %23 : vector<512x64xf32>
    %25 = arith.truncf %24 : vector<512x64xf32> to vector<512x64xbf16>
    %c0_6 = arith.constant 0 : index
    %c0_7 = arith.constant 0 : index
    %26 = vector.load %arg4[%c0_6, %c0_7] : memref<64x128xbf16, #tpu.memory_space<vmem>>, vector<64x128xbf16>
    %cst_8 = arith.constant dense<0.000000e+00> : vector<512x128xf32>
    %27 = tpu.matmul %25, %26, %cst_8 {dimension_numbers = #tpu.dot_dimension_numbers<[1], [0], [0], [1], [0, 0, 1, 1], [], []>} : vector<512x64xbf16>, vector<64x128xbf16>, vector<512x128xf32> -> vector<512x128xf32>
    %c0_9 = arith.constant 0 : index
    %c0_10 = arith.constant 0 : index
    %28 = vector.load %arg5[%c0_9, %c0_10] : memref<1x128xf32, #tpu.memory_space<vmem>>, vector<1x128xf32>
    %29 = vector.broadcast %28 : vector<1x128xf32> to vector<512x128xf32>
    %30 = arith.addf %27, %29 : vector<512x128xf32>
    %cst_11 = arith.constant 0.000000e+00 : f32
    %31 = vector.broadcast %cst_11 : f32 to vector<512x128xf32>
    %32 = arith.maximumf %30, %31 : vector<512x128xf32>
    %33 = arith.truncf %32 : vector<512x128xf32> to vector<512x128xbf16>
    %c0_12 = arith.constant 0 : index
    %c0_13 = arith.constant 0 : index
    %34 = vector.load %arg6[%c0_12, %c0_13] : memref<128x256xbf16, #tpu.memory_space<vmem>>, vector<128x256xbf16>
    %cst_14 = arith.constant dense<0.000000e+00> : vector<512x256xf32>
    %35 = tpu.matmul %33, %34, %cst_14 {dimension_numbers = #tpu.dot_dimension_numbers<[1], [0], [0], [1], [0, 0, 1, 1], [], []>} : vector<512x128xbf16>, vector<128x256xbf16>, vector<512x256xf32> -> vector<512x256xf32>
    %c0_15 = arith.constant 0 : index
    %c0_16 = arith.constant 0 : index
    %36 = vector.load %arg7[%c0_15, %c0_16] : memref<1x256xf32, #tpu.memory_space<vmem>>, vector<1x256xf32>
    %37 = vector.broadcast %36 : vector<1x256xf32> to vector<512x256xf32>
    %38 = arith.addf %35, %37 : vector<512x256xf32>
    %cst_17 = arith.constant 0.000000e+00 : f32
    %39 = vector.broadcast %cst_17 : f32 to vector<512x256xf32>
    %40 = arith.maximumf %38, %39 : vector<512x256xf32>
    %41 = arith.truncf %40 : vector<512x256xf32> to vector<512x256xbf16>
    %42 = vector.shape_cast %41 : vector<512x256xbf16> to vector<2x256x256xbf16>
    %cst_18 = arith.constant dense<0xFF80> : vector<2x256xbf16>
    %43 = vector.multi_reduction <maximumf>, %42, %cst_18 [1] : vector<2x256x256xbf16> to vector<2x256xbf16>
    %c0_19 = arith.constant 0 : index
    %c0_20 = arith.constant 0 : index
    %44 = vector.load %arg8[%c0_19, %c0_20] : memref<256x128xbf16, #tpu.memory_space<vmem>>, vector<256x128xbf16>
    %cst_21 = arith.constant dense<0.000000e+00> : vector<512x128xf32>
    %45 = tpu.matmul %41, %44, %cst_21 {dimension_numbers = #tpu.dot_dimension_numbers<[1], [0], [0], [1], [0, 0, 1, 1], [], []>} : vector<512x256xbf16>, vector<256x128xbf16>, vector<512x128xf32> -> vector<512x128xf32>
    %c0_22 = arith.constant 0 : index
    %c0_23 = arith.constant 0 : index
    %46 = vector.load %arg9[%c0_22, %c0_23] : memref<256x128xbf16, #tpu.memory_space<vmem>>, vector<256x128xbf16>
    %cst_24 = arith.constant dense<0.000000e+00> : vector<2x128xf32>
    %47 = tpu.matmul %43, %46, %cst_24 {dimension_numbers = #tpu.dot_dimension_numbers<[1], [0], [0], [1], [0, 0, 1, 1], [], []>} : vector<2x256xbf16>, vector<256x128xbf16>, vector<2x128xf32> -> vector<2x128xf32>
    %48 = vector.shape_cast %45 : vector<512x128xf32> to vector<2x256x128xf32>
    %49 = vector.shape_cast %47 : vector<2x128xf32> to vector<2x1x128xf32>
    %50 = vector.broadcast %49 : vector<2x1x128xf32> to vector<2x256x128xf32>
    %51 = arith.addf %48, %50 : vector<2x256x128xf32>
    %c0_25 = arith.constant 0 : index
    %c0_26 = arith.constant 0 : index
    %52 = vector.load %arg10[%c0_25, %c0_26] : memref<1x128xf32, #tpu.memory_space<vmem>>, vector<1x128xf32>
    %53 = vector.shape_cast %52 : vector<1x128xf32> to vector<1x1x128xf32>
    %54 = vector.broadcast %53 : vector<1x1x128xf32> to vector<2x256x128xf32>
    %55 = arith.addf %51, %54 : vector<2x256x128xf32>
    %cst_27 = arith.constant 0.000000e+00 : f32
    %56 = vector.broadcast %cst_27 : f32 to vector<2x256x128xf32>
    %57 = arith.maximumf %55, %56 : vector<2x256x128xf32>
    %58 = vector.shape_cast %57 : vector<2x256x128xf32> to vector<512x128xf32>
    %59 = arith.truncf %58 : vector<512x128xf32> to vector<512x128xbf16>
    %c0_28 = arith.constant 0 : index
    %c0_29 = arith.constant 0 : index
    %60 = vector.load %arg11[%c0_28, %c0_29] : memref<128x128xbf16, #tpu.memory_space<vmem>>, vector<128x128xbf16>
    %cst_30 = arith.constant dense<0.000000e+00> : vector<512x128xf32>
    %61 = tpu.matmul %59, %60, %cst_30 {dimension_numbers = #tpu.dot_dimension_numbers<[1], [0], [0], [1], [0, 0, 1, 1], [], []>} : vector<512x128xbf16>, vector<128x128xbf16>, vector<512x128xf32> -> vector<512x128xf32>
    %c0_31 = arith.constant 0 : index
    %c0_32 = arith.constant 0 : index
    %62 = vector.load %arg12[%c0_31, %c0_32] : memref<1x128xf32, #tpu.memory_space<vmem>>, vector<1x128xf32>
    %63 = vector.broadcast %62 : vector<1x128xf32> to vector<512x128xf32>
    %64 = arith.addf %61, %63 : vector<512x128xf32>
    %65 = vector.shape_cast %64 : vector<512x128xf32> to vector<2x256x128xf32>
    %66 = arith.truncf %65 : vector<2x256x128xf32> to vector<2x256x128xbf16>
    %c0_33 = arith.constant 0 : index
    %c0_34 = arith.constant 0 : index
    %c0_35 = arith.constant 0 : index
    %67 = vector.load %arg15[%c0_33, %c0_34, %c0_35] : memref<2x256x128xbf16, #tpu.memory_space<vmem>>, vector<2x256x128xbf16>
    tpu.vector_store %arg15[%c0_33, %c0_34, %c0_35], %66 {strides = array<i32>} : memref<2x256x128xbf16, #tpu.memory_space<vmem>>, vector<2x256x128xbf16>,
    %c0_36 = arith.constant 0 : index
    %c0_37 = arith.constant 0 : index
    %68 = vector.load %arg13[%c0_36, %c0_37] : memref<256x128xbf16, #tpu.memory_space<vmem>>, vector<256x128xbf16>
    %cst_38 = arith.constant dense<0.000000e+00> : vector<2x128xf32>
    %69 = tpu.matmul %43, %68, %cst_38 {dimension_numbers = #tpu.dot_dimension_numbers<[1], [0], [0], [1], [0, 0, 1, 1], [], []>} : vector<2x256xbf16>, vector<256x128xbf16>, vector<2x128xf32> -> vector<2x128xf32>
    %c0_39 = arith.constant 0 : index
    %c0_40 = arith.constant 0 : index
    %70 = vector.load %arg14[%c0_39, %c0_40] : memref<1x128xf32, #tpu.memory_space<vmem>>, vector<1x128xf32>
    %71 = vector.broadcast %70 : vector<1x128xf32> to vector<2x128xf32>
    %72 = arith.addf %69, %71 : vector<2x128xf32>
    %cst_41 = arith.constant dense<0.000000e+00> : vector<2x3xf32>
    %73 = vector.multi_reduction <add>, %0, %cst_41 [1] : vector<2x256x3xf32> to vector<2x3xf32>
    %cst_42 = arith.constant 2.560000e+02 : f32
    %74 = vector.broadcast %cst_42 : f32 to vector<2x3xf32>
    %75 = arith.divf %73, %74 : vector<2x3xf32>
    %76 = tpu.iota {dimensions = array<i32: 1>} : vector<2x128xi32>
    %c6_i32 = arith.constant 6 : i32
    %77 = vector.broadcast %c6_i32 : i32 to vector<2x128xi32>
    %78 = arith.cmpi eq, %76, %77 : vector<2x128xi32>
    %79 = vector.extract_strided_slice %75 {offsets = [0, 0], sizes = [2, 1], strides = [1, 1]} : vector<2x3xf32> to vector<2x1xf32>
    %cst_43 = arith.constant 0.000000e+00 : f32
    %80 = vector.shape_cast %79 : vector<2x1xf32> to vector<2x1xf32>
    %81 = vector.broadcast %80 : vector<2x1xf32> to vector<2x128xf32>
    %82 = vector.broadcast %cst_43 : f32 to vector<2x128xf32>
    %83 = arith.select %78, %81, %82 : vector<2x128xi1>, vector<2x128xf32>
    %c7_i32 = arith.constant 7 : i32
    %84 = vector.broadcast %c7_i32 : i32 to vector<2x128xi32>
    %85 = arith.cmpi eq, %76, %84 : vector<2x128xi32>
    %86 = vector.extract_strided_slice %75 {offsets = [0, 1], sizes = [2, 1], strides = [1, 1]} : vector<2x3xf32> to vector<2x1xf32>
    %cst_44 = arith.constant 0.000000e+00 : f32
    %87 = vector.shape_cast %86 : vector<2x1xf32> to vector<2x1xf32>
    %88 = vector.broadcast %87 : vector<2x1xf32> to vector<2x128xf32>
    %89 = vector.broadcast %cst_44 : f32 to vector<2x128xf32>
    %90 = arith.select %85, %88, %89 : vector<2x128xi1>, vector<2x128xf32>
    %91 = arith.addf %83, %90 : vector<2x128xf32>
    %c8_i32 = arith.constant 8 : i32
    %92 = vector.broadcast %c8_i32 : i32 to vector<2x128xi32>
    %93 = arith.cmpi eq, %76, %92 : vector<2x128xi32>
    %94 = vector.extract_strided_slice %75 {offsets = [0, 2], sizes = [2, 1], strides = [1, 1]} : vector<2x3xf32> to vector<2x1xf32>
    %cst_45 = arith.constant 0.000000e+00 : f32
    %95 = vector.shape_cast %94 : vector<2x1xf32> to vector<2x1xf32>
    %96 = vector.broadcast %95 : vector<2x1xf32> to vector<2x128xf32>
    %97 = vector.broadcast %cst_45 : f32 to vector<2x128xf32>
    %98 = arith.select %93, %96, %97 : vector<2x128xi1>, vector<2x128xf32>
    %99 = arith.addf %91, %98 : vector<2x128xf32>
    %100 = arith.addf %72, %99 : vector<2x128xf32>
    %101 = vector.shape_cast %100 : vector<2x128xf32> to vector<2x1x128xf32>
    %c0_46 = arith.constant 0 : index
    %c0_47 = arith.constant 0 : index
    %c0_48 = arith.constant 0 : index
    %102 = vector.load %arg16[%c0_46, %c0_47, %c0_48] : memref<2x1x128xf32, #tpu.memory_space<vmem>>, vector<2x1x128xf32>
    tpu.vector_store %arg16[%c0_46, %c0_47, %c0_48], %101 {strides = array<i32>} : memref<2x1x128xf32, #tpu.memory_space<vmem>>, vector<2x1x128xf32>,
    return
  }
  func.func @transform_0(%arg0: i32) -> (i32, i32, i32) {
    %c0_i32 = arith.constant 0 : i32
    %c0_i32_0 = arith.constant 0 : i32
    %c0_i32_1 = arith.constant 0 : i32
    return %arg0, %c0_i32, %c0_i32_0 : i32, i32, i32
  }
  func.func @transform_1(%arg0: i32) -> (i32, i32) {
    %c0_i32 = arith.constant 0 : i32
    %c0_i32_0 = arith.constant 0 : i32
    %c0_i32_1 = arith.constant 0 : i32
    return %c0_i32, %c0_i32_0 : i32, i32
  }
  func.func @transform_2(%arg0: i32) -> (i32, i32) {
    %c0_i32 = arith.constant 0 : i32
    %c0_i32_0 = arith.constant 0 : i32
    %c0_i32_1 = arith.constant 0 : i32
    return %c0_i32, %c0_i32_0 : i32, i32
  }
  func.func @transform_3(%arg0: i32) -> (i32, i32) {
    %c0_i32 = arith.constant 0 : i32
    %c0_i32_0 = arith.constant 0 : i32
    %c0_i32_1 = arith.constant 0 : i32
    return %c0_i32, %c0_i32_0 : i32, i32
  }
  func.func @transform_4(%arg0: i32) -> (i32, i32) {
    %c0_i32 = arith.constant 0 : i32
    %c0_i32_0 = arith.constant 0 : i32
    %c0_i32_1 = arith.constant 0 : i32
    return %c0_i32, %c0_i32_0 : i32, i32
  }
  func.func @transform_5(%arg0: i32) -> (i32, i32) {
    %c0_i32 = arith.constant 0 : i32
    %c0_i32_0 = arith.constant 0 : i32
    %c0_i32_1 = arith.constant 0 : i32
    return %c0_i32, %c0_i32_0 : i32, i32
  }
  func.func @transform_6(%arg0: i32) -> (i32, i32) {
    %c0_i32 = arith.constant 0 : i32
    %c0_i32_0 = arith.constant 0 : i32
    %c0_i32_1 = arith.constant 0 : i32
    return %c0_i32, %c0_i32_0 : i32, i32
  }
  func.func @transform_7(%arg0: i32) -> (i32, i32) {
    %c0_i32 = arith.constant 0 : i32
    %c0_i32_0 = arith.constant 0 : i32
    %c0_i32_1 = arith.constant 0 : i32
    return %c0_i32, %c0_i32_0 : i32, i32
  }
  func.func @transform_8(%arg0: i32) -> (i32, i32) {
    %c0_i32 = arith.constant 0 : i32
    %c0_i32_0 = arith.constant 0 : i32
    %c0_i32_1 = arith.constant 0 : i32
    return %c0_i32, %c0_i32_0 : i32, i32
  }
  func.func @transform_9(%arg0: i32) -> (i32, i32) {
    %c0_i32 = arith.constant 0 : i32
    %c0_i32_0 = arith.constant 0 : i32
    %c0_i32_1 = arith.constant 0 : i32
    return %c0_i32, %c0_i32_0 : i32, i32
  }
  func.func @transform_10(%arg0: i32) -> (i32, i32) {
    %c0_i32 = arith.constant 0 : i32
    %c0_i32_0 = arith.constant 0 : i32
    %c0_i32_1 = arith.constant 0 : i32
    return %c0_i32, %c0_i32_0 : i32, i32
  }
  func.func @transform_11(%arg0: i32) -> (i32, i32) {
    %c0_i32 = arith.constant 0 : i32
    %c0_i32_0 = arith.constant 0 : i32
    %c0_i32_1 = arith.constant 0 : i32
    return %c0_i32, %c0_i32_0 : i32, i32
  }
  func.func @transform_12(%arg0: i32) -> (i32, i32) {
    %c0_i32 = arith.constant 0 : i32
    %c0_i32_0 = arith.constant 0 : i32
    %c0_i32_1 = arith.constant 0 : i32
    return %c0_i32, %c0_i32_0 : i32, i32
  }
  func.func @transform_13(%arg0: i32) -> (i32, i32) {
    %c0_i32 = arith.constant 0 : i32
    %c0_i32_0 = arith.constant 0 : i32
    %c0_i32_1 = arith.constant 0 : i32
    return %c0_i32, %c0_i32_0 : i32, i32
  }
  func.func @transform_14(%arg0: i32) -> (i32, i32, i32) {
    %c0_i32 = arith.constant 0 : i32
    %c0_i32_0 = arith.constant 0 : i32
    %c0_i32_1 = arith.constant 0 : i32
    return %arg0, %c0_i32, %c0_i32_0 : i32, i32, i32
  }
  func.func @transform_15(%arg0: i32) -> (i32, i32, i32) {
    %c0_i32 = arith.constant 0 : i32
    %c0_i32_0 = arith.constant 0 : i32
    %c0_i32_1 = arith.constant 0 : i32
    return %arg0, %c0_i32, %c0_i32_0 : i32, i32, i32
  }
}

</mosaic_0001>

<bundles_post_ra>
// kernel: cat_posenet_pallas.1
= control target key start
LH: loop header
LB: loop body
LE: loop exit
PB: predicated region body
PF: predicated region fallthrough
CT: control target
= control target key end

     0   :  { %s6261_s18 = smov 0   ;;  %s8694_s0 = inlined_call_operand.vmem [shape: f32[4,256,3], index: 0, kind: input, shape index: {}]   ;;  %s8695_s1 = inlined_call_operand.vmem [shape: f32[3,64], index: 1, kind: input, shape index: {}]   ;;  %s8696_s2 = inlined_call_operand.vmem [shape: f32[1,64], index: 2, kind: input, shape index: {}]   ;;  %s8697_s3 = inlined_call_operand.vmem [shape: bf16[64,128], index: 3, kind: input, shape index: {}]   ;;  %s8698_s4 = inlined_call_operand.vmem [shape: f32[1,128], index: 4, kind: input, shape index: {}]   ;;  %s8699_s5 = inlined_call_operand.vmem [shape: bf16[128,256], index: 5, kind: input, shape index: {}]   ;;  %s8700_s6 = inlined_call_operand.vmem [shape: f32[1,256], index: 6, kind: input, shape index: {}]   ;;  %s8701_s7 = inlined_call_operand.vmem [shape: bf16[256,128], index: 7, kind: input, shape index: {}]   ;;  %s8702_s8 = inlined_call_operand.vmem [shape: bf16[256,128], index: 8, kind: input, shape index: {}]   ;;  %s8703_s9 = inlined_call_operand.vmem [shape: f32[1,128], index: 9, kind: input, shape index: {}]   ;;  %s8704_s10 = inlined_call_operand.vmem [shape: bf16[128,128], index: 10, kind: input, shape index: {}]   ;;  %s8705_s11 = inlined_call_operand.vmem [shape: f32[1,128], index: 11, kind: input, shape index: {}]   ;;  %s8706_s12 = inlined_call_operand.vmem [shape: bf16[256,128], index: 12, kind: input, shape index: {}]   ;;  %s8707_s13 = inlined_call_operand.vmem [shape: f32[1,128], index: 13, kind: input, shape index: {}]   ;;  %s8708_s14 = inlined_call_operand.vmem [shape: bf16[4,256,128], index: 14, kind: output, shape index: {0}]   ;;  %s8709_s15 = inlined_call_operand.vmem [shape: f32[4,1,128], index: 15, kind: output, shape index: {1}]  }
   0x1 LB: > { %s5197_s19 = sadd.s32 4294967295, %s6175_s18   ;;  %p5201_p0 = scmp.ge.s32.totalorder %s6175_s18, 1  ;;  %s6175_s18 = sphi %s6261_s18, %s26_s18  }
   0x2   : > { %p442_p1 = scmp.lt.s32.totalorder %s6175_s18, 3 }
   0x4   : > { %p443_p2 = pnand %p5201_p0, %p442_p1 }
   0x6   : > { %446 = sbr.rel (%p443_p2) target bundleno = 1814 (0x716), region = 76 }
   0xd   : > { %s5202_s20 = sshll.u32 %s5197_s19, 1  ;;  %v8712_v0 = vmov 2   ;;  %v8711_v1 = vmov 1   ;;  %v6179_v2 = vmov 0   ;;  %vm4905_vm0 = vcmask 23552   ;;  %v6025_v32 = vld [vmem:[%s8697_s3] sm:$0xff]  }
   0xe   : > { %5935 = vset.pattern.permute.xlu0 %v8712_v0  ;;  %5931 = vset.pattern.permute.xlu1 %v8711_v1  ;;  %p497_p3 = scmp.lt.s32.totalorder %s5202_s20, 3  ;;  %v6026_v33 = vld [vmem:[%s8697_s3 + $0x8] sm:$0xff]   ;;  %v6027_v34 = vld [vmem:[%s8697_s3 + $0x10] sm:$0xff]   ;;  %v6028_v36 = vld [vmem:[%s8697_s3 + $0x18] sm:$0xff]   ;;  %v8710_v51 = vlaneseq  ;;  %vm1951_vm1 = vcmask 523264   ;;  %vm3643_vm2 = vcmask 1041409  }
   0xf   : > { %2573 = vmatprep.mubr.bf16.mxu1 %v6179_v2  ;;  %5767 = vmatprep.subr.bf16.mxu0 %v6025_v32  ;;  %v580_v61 = vld [vmem:[%s8695_s1] sm:$0x7] }
  0x10   : > { %s8834_s20 = smov (!%p497_p3, %s5202_s20), 3  ;;  %5768 = vmatpush3.bf16.msra.mxu0 %v6025_v32  ;;  %v6404_v56 = vshrl.u32 %v8710_v51, 7 }
  0x11   : > { %s5390_s21 = sshll.u32 %s8834_s20, 8  ;;  %5769 = vmatprep.subr.bf16.mxu0 %v6026_v33  ;;  %s5391_s23 = sshll.u32 %s8834_s20, 7 }
  0x12   : > { %s6278_s24 = scalar_lea.vmem %s8694_s0, %s5390_s21  ;;  %v1227_v60 = vsub.s32 1, %v6404_v56  ;;  %v1615_v62 = vsub.s32 2, %v6404_v56  ;;  %v6421_v63 = vsub.s32 0, %v6404_v56  ;;  %s8584_s27 = scalar_lea.vmem %s8708_s14, %s5391_s23 }
  0x13   : > { %v517_v3 = vld [vmem:[%s6278_s24 + $0x8] sm:$0xff]  ;;  %v516_v4 = vld [vmem:[%s6278_s24] sm:$0xff]  ;;  %v519_v9 = vld [vmem:[%s6278_s24 + $0x18] sm:$0xff]  ;;  %s513_s16 = scalar_lea.vmem %s8709_s15, %s8834_s20 }
  0x14   : > { %1362 = vperm.xlu0 %5935, %v517_v3   ;;  %v4907_v5 = vsel %vm4905_vm0, %v517_v3, 0.0  ;;  %970 = vperm.xlu1 %5931, %v516_v4   ;;  %v4906_v6 = vsel %vm4905_vm0, %v516_v4, 0.0  ;;  %v520_v8 = vld [vmem:[%s6278_s24 + $0x20] sm:$0xff]  ;;  %v518_v10 = vld [vmem:[%s6278_s24 + $0x10] sm:$0xff]  ;;  %v4911_v11 = vsel %vm4905_vm0, %v519_v9, 0.0  ;;  %v523_v15 = vld [vmem:[%s6278_s24 + $0x38] sm:$0xff] }
  0x15   : > { %v4908_v7 = vadd.f32 %v4907_v5, %v4906_v6  ;;  %v4909_v12 = vsel %vm4905_vm0, %v518_v10, 0.0  ;;  %v4913_v14 = vsel %vm4905_vm0, %v520_v8, 0.0  ;;  %v521_v17 = vld [vmem:[%s6278_s24 + $0x28] sm:$0xff]  ;;  %v522_v20 = vld [vmem:[%s6278_s24 + $0x30] sm:$0xff]  ;;  %v4919_v24 = vsel %vm4905_vm0, %v523_v15, 0.0  ;;  %v6311_v28 = vld [vmem:[%s6278_s24 + $0x60] sm:$0xff]  ;;  %5770 = vmatpush3.bf16.msra.mxu0 %v6026_v33 }
  0x16   : > { %v4915_v18 = vsel %vm4905_vm0, %v521_v17, 0.0  ;;  %v6296_v21 = vld [vmem:[%s6278_s24 + $0x48] sm:$0xff]  ;;  %v4917_v22 = vsel %vm4905_vm0, %v522_v20, 0.0  ;;  %v526_v27 = vld [vmem:[%s6278_s24 + $0x50] sm:$0xff]  ;;  %v6325_v31 = vld [vmem:[%s6278_s24 + $0xa0] sm:$0xff]  ;;  %5771 = vmatprep.subr.bf16.mxu0 %v6027_v34  ;;  %v6432_v5 = vrot.slane %v580_v61, %v1227_v60 }
  0x17   : > { %v4910_v13 = vadd.f32 %v4909_v12, %v4908_v7  ;;  %v6314_v29 = vld [vmem:[%s6278_s24 + $0x88] sm:$0xff]  ;;  %v6319_v30 = vld [vmem:[%s6278_s24 + $0x90] sm:$0xff]  ;;  %v524_v35 = vld [vmem:[%s6278_s24 + $0x40] sm:$0xff]  ;;  %v6436_v7 = vrot.slane %v580_v61, %v1615_v62 }
  0x18   : > { %1374 = vperm.xlu0 %5935, %v520_v8   ;;  %974 = vperm.xlu1 %5931, %v517_v3   ;;  %v529_v37 = vld [vmem:[%s6278_s24 + $0x68] sm:$0xff]  ;;  %v530_v38 = vld [vmem:[%s6278_s24 + $0x70] sm:$0xff]  ;;  %v527_v39 = vld [vmem:[%s6278_s24 + $0x58] sm:$0xff] }
  0x19   : > { %v4912_v16 = vadd.f32 %v4911_v11, %v4910_v13  ;;  %5772 = vmatpush3.bf16.msra.mxu0 %v6027_v34  ;;  %v6354_v40 = vld [vmem:[%s6278_s24 + $0xa8] sm:$0xff]  ;;  %v6358_v41 = vld [vmem:[%s6278_s24 + $0xb0] sm:$0xff]  ;;  %v531_v46 = vld [vmem:[%s6278_s24 + $0x78] sm:$0xff] }
  0x1a   : > { %5773 = vmatprep.subr.bf16.mxu0 %v6028_v36  ;;  %v6363_v42 = vld [vmem:[%s6278_s24 + $0xd0] sm:$0xff]  ;;  %v6367_v43 = vld [vmem:[%s6278_s24 + $0xe8] sm:$0xff]  ;;  %v6389_v47 = vld [vmem:[%s6278_s24 + $0xb8] sm:$0xff] }
  0x1b   : > { %v4914_v19 = vadd.f32 %v4913_v14, %v4912_v16  ;;  %v6371_v44 = vld [vmem:[%s6278_s24 + $0xf0] sm:$0xff]  ;;  %v6394_v50 = vld [vmem:[%s6278_s24 + $0xc8] sm:$0xff]  ;;  %v532_v54 = vld [vmem:[%s6278_s24 + $0x80] sm:$0xff] }
  0x1c   : > { %1386 = vperm.xlu0 %5935, %v523_v15   ;;  %5932 = vset.pattern.permute.xlu1 %v6179_v2  ;;  %v6376_v45 = vld [vmem:[%s6278_s24 + $0x110] sm:$0xff]  ;;  %v6401_v55 = vld [vmem:[%s6278_s24 + $0xe0] sm:$0xff]  ;;  %v6413_v59 = vld [vmem:[%s6278_s24 + $0xf8] sm:$0xff] }
  0x1d   : > { %598 = vperm.xlu1 %5932, %v519_v9   ;;  %v4916_v23 = vadd.f32 %v4915_v18, %v4914_v19  ;;  %5774 = vmatpush3.bf16.msra.mxu0 %v6028_v36  ;;  %v535_v14 = vld [vmem:[%s6278_s24 + $0x98] sm:$0xff] }
  0x1e   : > { %3314 = vmatprep.subr.bf16.mxu0 %v6179_v2  ;;  %v6453_v18 = vld [vmem:[%s6278_s24 + $0x138] sm:$0xff] }
  0x1f   : > { %v4918_v25 = vadd.f32 %v4917_v22, %v4916_v23 }
  0x20   : > { %1394 = vperm.xlu0 %5935, %v6296_v21  }
  0x21   : > { %5933 = vset.pattern.permute.xlu1 %v8711_v1  ;;  %v6302_v26 = vadd.f32 %v4919_v24, %v4918_v25  ;;  %v6463_v24 = vld [vmem:[%s8696_s2] ss:$0 sm:$0xff] }
  0x22   : > { %982 = vperm.xlu1 %5933, %v519_v9  }
  0x24   : > { %5946 = vset.pattern.permute.xlu0 %v6179_v2 }
  0x25   : > { %583 = vperm.xlu0 %5946, %v516_v4  }
  0x26   : > { %5934 = vset.pattern.permute.xlu1 %v8712_v0 }
  0x27   : > { %1358 = vperm.xlu1 %5934, %v516_v4   ;;  %v6428_v4 = vld [vmem:[%s6278_s24 + $0x108] sm:$0xff] }
  0x29   : > { %588 = vperm.xlu0 %5946, %v517_v3  }
  0x2b   : > { %1366 = vperm.xlu1 %5934, %v518_v10  }
  0x2d   : > { %593 = vperm.xlu0 %5946, %v518_v10  }
  0x2f   : > { %1370 = vperm.xlu1 %5934, %v519_v9  }
  0x31   : > { %603 = vperm.xlu0 %5946, %v520_v8  }
  0x33   : > { %5936 = vset.pattern.permute.xlu1 %v6179_v2 }
  0x34   : > { %608 = vperm.xlu1 %5936, %v521_v17  }
  0x35   : > { %628 = vperm.xlu0 %5946, %v6296_v21  }
  0x38   : > { %5937 = vset.pattern.permute.xlu1 %v8711_v1 }
  0x39   : > { %633 = vperm.xlu0 %5946, %v526_v27   ;;  %986 = vperm.xlu1 %5937, %v520_v8   ;;  %v6439_v8 = vrot.slane %v580_v61, %v6421_v63 }
  0x3d   : > { %643 = vperm.xlu0 %5946, %v6311_v28   ;;  %5938 = vset.pattern.permute.xlu1 %v6179_v2 }
  0x3e   : > { %613 = vperm.xlu1 %5938, %v522_v20  }
  0x41   : > { %668 = vperm.xlu0 %5946, %v6314_v29  }
  0x42   : > { %618 = vperm.xlu1 %5938, %v523_v15  }
  0x45   : > { %673 = vperm.xlu0 %5946, %v6319_v30  }
  0x46   : > { %5939 = vset.pattern.permute.xlu1 %v8711_v1 }
  0x47   : > { %998 = vperm.xlu1 %5939, %v523_v15  }
  0x49   : > { %683 = vperm.xlu0 %5946, %v6325_v31  }
  0x4b   : > { %5940 = vset.pattern.permute.xlu1 %v8712_v0 }
  0x4c   : > { %1378 = vperm.xlu1 %5940, %v521_v17  }
  0x4d   : > { %5957 = vset.pattern.permute.xlu0 %v8711_v1 }
  0x4e   : > { %978 = vperm.xlu0 %5957, %v518_v10   ;;  %v6444_v10 = vld [vmem:[%s6278_s24 + $0x120] sm:$0xff] }
  0x50   : > { %1382 = vperm.xlu1 %5940, %v522_v20  }
  0x52   : > { %990 = vperm.xlu0 %5957, %v521_v17  }
  0x54   : > { %5941 = vset.pattern.permute.xlu1 %v6179_v2 }
  0x55   : > { %623 = vperm.xlu1 %5941, %v524_v35  }
  0x56   : > { %994 = vperm.xlu0 %5957, %v522_v20  }
  0x59   : > { %5942 = vset.pattern.permute.xlu1 %v8711_v1 }
  0x5a   : > { %1010 = vperm.xlu0 %5957, %v526_v27   ;;  %1002 = vperm.xlu1 %5942, %v524_v35  }
  0x5e   : > { %1022 = vperm.xlu0 %5957, %v529_v37   ;;  %1006 = vperm.xlu1 %5942, %v6296_v21  }
  0x62   : > { %1026 = vperm.xlu0 %5957, %v530_v38   ;;  %5943 = vset.pattern.permute.xlu1 %v6179_v2 }
  0x63   : > { %638 = vperm.xlu1 %5943, %v527_v39  }
  0x66   : > { %1042 = vperm.xlu0 %5957, %v6319_v30  }
  0x67   : > { %5944 = vset.pattern.permute.xlu1 %v8711_v1 }
  0x68   : > { %1014 = vperm.xlu1 %5944, %v527_v39  }
  0x6a   : > { %1054 = vperm.xlu0 %5957, %v6354_v40  }
  0x6c   : > { %5945 = vset.pattern.permute.xlu1 %v8712_v0 }
  0x6d   : > { %1390 = vperm.xlu1 %5945, %v524_v35  }
  0x6e   : > { %1058 = vperm.xlu0 %5957, %v6358_v41  }
  0x71   : > { %1398 = vperm.xlu1 %5945, %v526_v27  }
  0x72   : > { %1074 = vperm.xlu0 %5957, %v6363_v42  }
  0x75   : > { %1402 = vperm.xlu1 %5945, %v527_v39  }
  0x76   : > { %1086 = vperm.xlu0 %5957, %v6367_v43  }
  0x79   : > { %5947 = vset.pattern.permute.xlu1 %v6179_v2 }
  0x7a   : > { %1090 = vperm.xlu0 %5957, %v6371_v44   ;;  %648 = vperm.xlu1 %5947, %v529_v37  }
  0x7e   : > { %1106 = vperm.xlu0 %5957, %v6376_v45   ;;  %5948 = vset.pattern.permute.xlu1 %v8711_v1 }
  0x7f   : > { %1018 = vperm.xlu1 %5948, %v6311_v28  }
  0x82   : > { %5976 = vset.pattern.permute.xlu0 %v8712_v0 }
  0x83   : > { %1406 = vperm.xlu0 %5976, %v6311_v28   ;;  %5949 = vset.pattern.permute.xlu1 %v6179_v2  ;;  %v6467_v28 = vld [vmem:[%s6278_s24 + $0x148] sm:$0xff] }
  0x84   : > { %653 = vperm.xlu1 %5949, %v530_v38  }
  0x87   : > { %1418 = vperm.xlu0 %5976, %v531_v46  }
  0x88   : > { %658 = vperm.xlu1 %5949, %v531_v46  }
  0x8b   : > { %1426 = vperm.xlu0 %5976, %v6314_v29  }
  0x8c   : > { %5950 = vset.pattern.permute.xlu1 %v8711_v1 }
  0x8d   : > { %1030 = vperm.xlu1 %5950, %v531_v46  }
  0x8f   : > { %1438 = vperm.xlu0 %5976, %v6325_v31  }
  0x91   : > { %5951 = vset.pattern.permute.xlu1 %v8712_v0 }
  0x92   : > { %1410 = vperm.xlu1 %5951, %v529_v37  }
  0x93   : > { %v971_v48 = vpop.permute.xlu1 %970  ;;  %v1363_v49 = vpop.permute.xlu0 %1362  ;;  %1450 = vperm.xlu0 %5976, %v6389_v47  }
  0x94   : > { %v1229_v11 = vmul.f32 %v6432_v5, %v971_v48  ;;  %v1618_v19 = vmul.f32 %v6436_v7, %v1363_v49 }
  0x96   : > { %1414 = vperm.xlu1 %5951, %v530_v38  }
  0x97   : > { %v975_v52 = vpop.permute.xlu1 %974  ;;  %v6396_v53 = vpop.permute.xlu0 %1374  ;;  %1458 = vperm.xlu0 %5976, %v6394_v50  }
  0x98   : > { %v1230_v20 = vmul.f32 %v6432_v5, %v975_v52 }
  0x9a   : > { %5952 = vset.pattern.permute.xlu1 %v6179_v2 }
  0x9b   : > { %663 = vperm.xlu1 %5952, %v532_v54   ;;  %v6407_v57 = vpop.permute.xlu0 %1386  ;;  %1470 = vperm.xlu0 %5976, %v6401_v55  }
  0x9c   : > { %v6410_v58 = vpop.permute.xlu1 %598 }
  0x9f   : > { %5953 = vset.pattern.permute.xlu1 %v8711_v1  ;;  %v6424_v3 = vpop.permute.xlu0 %1394  ;;  %1482 = vperm.xlu0 %5976, %v6413_v59  }
  0xa0   : > { %1034 = vperm.xlu1 %5953, %v532_v54  }
  0xa1   : > { %v6434_v6 = vpop.permute.xlu1 %982 }
  0xa3   : > { %1490 = vperm.xlu0 %5976, %v6428_v4  }
  0xa4   : > { %v584_v9 = vpop.permute.xlu0 %583  ;;  %1038 = vperm.xlu1 %5953, %v6314_v29  }
  0xa5   : > { %v905_v12 = vmul.f32 %v6439_v8, %v584_v9 }
  0xa6   : > { %v1359_v13 = vpop.permute.xlu1 %1358 }
  0xa7   : > { %v1293_v15 = vadd.f32 %v1229_v11, %v905_v12  ;;  %v1617_v16 = vmul.f32 %v6436_v7, %v1359_v13  ;;  %1502 = vperm.xlu0 %5976, %v6444_v10   ;;  %v1232_v11 = vmul.f32 %v6432_v5, %v6434_v6  ;;  %v908_v13 = vmul.f32 %v6439_v8, %v6410_v58 }
  0xa8   : > { %v589_v17 = vpop.permute.xlu0 %588  ;;  %5954 = vset.pattern.permute.xlu1 %v6179_v2 }
  0xa9   : > { %v1681_v21 = vadd.f32 %v1617_v16, %v1293_v15  ;;  %v906_v22 = vmul.f32 %v6439_v8, %v589_v17  ;;  %678 = vperm.xlu1 %5954, %v535_v14  }
  0xaa   : > { %v6458_v23 = vpop.permute.xlu1 %1366 }
  0xab   : > { %v1294_v25 = vadd.f32 %v1230_v20, %v906_v22  ;;  %1514 = vperm.xlu0 %5976, %v6453_v18   ;;  %v1752_v32 = vadd.f32 %v6463_v24, %v1681_v21  ;;  %v6513_v22 = vld [vmem:[%s6278_s24 + $0x150] sm:$0xff] }
  0xac   : > { %v594_v27 = vpop.permute.xlu0 %593 }
  0xad   : > { %v1682_v29 = vadd.f32 %v1618_v19, %v1294_v25  ;;  %5955 = vset.pattern.permute.xlu1 %v8711_v1  ;;  %v1816_v36 = vmax.f32 %v1752_v32, 0.0  ;;  %v907_v17 = vmul.f32 %v6439_v8, %v594_v27  ;;  %v1621_v19 = vmul.f32 %v6436_v7, %v6396_v53 }
  0xae   : > { %1046 = vperm.xlu1 %5955, %v535_v14   ;;  %v1371_v33 = vpop.permute.xlu1 %1370  ;;  %v1619_v27 = vmul.f32 %v6436_v7, %v6458_v23  ;;  %v1624_v53 = vmul.f32 %v6436_v7, %v6407_v57 }
  0xaf   : > { %v1753_v34 = vadd.f32 %v6463_v24, %v1682_v29  ;;  %1522 = vperm.xlu0 %5976, %v6467_v28  }
  0xb0   : > { %v604_v35 = vpop.permute.xlu0 %603 }
  0xb1   : > { %v1817_v37 = vmax.f32 %v1753_v34, 0.0  ;;  %v909_v15 = vmul.f32 %v6439_v8, %v604_v35 }
  0xb2   : > { %5956 = vset.pattern.permute.xlu1 %v8712_v0 }
  0xb3   : > { %1422 = vperm.xlu1 %5956, %v532_v54   ;;  %v609_v38 = vpop.permute.xlu1 %608  ;;  %v1880_v39 = vpack.c.bf16 %v1817_v37, %v1816_v36  ;;  %5989 = vset.pattern.permute.xlu0 %v6179_v2 }
  0xb4   : > { %v6475_v46 = vpop.permute.xlu0 %628  ;;  %708 = vperm.xlu0 %5989, %v6394_v50  }
  0xb5   : > { %5775 = vmatprep.mubr.msk.bf16.mxu0 %vm1951_vm1, %v1880_v39  ;;  %v6526_v39 = vld [vmem:[%s6278_s24 + $0x160] sm:$0xff] }
  0xb7   : > { %1430 = vperm.xlu1 %5956, %v6319_v30  }
  0xb8   : > { %v987_v48 = vpop.permute.xlu1 %986  ;;  %v6480_v49 = vpop.permute.xlu0 %633  ;;  %713 = vperm.xlu0 %5989, %v6363_v42  }
  0xb9   : > { %v1233_v16 = vmul.f32 %v6432_v5, %v987_v48  ;;  %v910_v48 = vmul.f32 %v6439_v8, %v609_v38 }
  0xbb   : > { %1434 = vperm.xlu1 %5956, %v535_v14   ;;  %v1620_v14 = vmul.f32 %v6436_v7, %v1371_v33  ;;  %v1297_v20 = vadd.f32 %v1233_v16, %v909_v15 }
  0xbc   : > { %v6483_v52 = vpop.permute.xlu0 %643  ;;  %723 = vperm.xlu0 %5989, %v6401_v55  }
  0xbd   : > { %v614_v54 = vpop.permute.xlu1 %613  ;;  %v1685_v36 = vadd.f32 %v1621_v19, %v1297_v20 }
  0xbe   : > { %v911_v38 = vmul.f32 %v6439_v8, %v614_v54 }
  0xbf   : > { %5958 = vset.pattern.permute.xlu1 %v6179_v2  ;;  %v1756_v16 = vadd.f32 %v6463_v24, %v1685_v36 }
  0xc0   : > { %688 = vperm.xlu1 %5958, %v6354_v40   ;;  %v6488_v61 = vpop.permute.xlu0 %668  ;;  %748 = vperm.xlu0 %5989, %v6428_v4  }
  0xc1   : > { %v619_v30 = vpop.permute.xlu1 %618 }
  0xc2   : > { %v912_v33 = vmul.f32 %v6439_v8, %v619_v30 }
  0xc4   : > { %5959 = vset.pattern.permute.xlu1 %v8711_v1  ;;  %v6492_v62 = vpop.permute.xlu0 %673  ;;  %753 = vperm.xlu0 %5989, %v6376_v45  }
  0xc5   : > { %1050 = vperm.xlu1 %5959, %v6325_v31   ;;  %v1296_v31 = vadd.f32 %v1232_v11, %v908_v13 }
  0xc6   : > { %v999_v9 = vpop.permute.xlu1 %998 }
  0xc7   : > { %v1684_v58 = vadd.f32 %v1620_v14, %v1296_v31  ;;  %v1236_v25 = vmul.f32 %v6432_v5, %v999_v9 }
  0xc8   : > { %v6498_v12 = vpop.permute.xlu0 %683  ;;  %763 = vperm.xlu0 %5989, %v6444_v10  }
  0xc9   : > { %5960 = vset.pattern.permute.xlu1 %v6179_v2  ;;  %v1755_v35 = vadd.f32 %v6463_v24, %v1684_v58  ;;  %v1300_v9 = vadd.f32 %v1236_v25, %v912_v33  ;;  %v1820_v33 = vmax.f32 %v1756_v16, 0.0 }
  0xca   : > { %693 = vperm.xlu1 %5960, %v6358_v41  }
  0xcb   : > { %v1379_v6 = vpop.permute.xlu1 %1378  ;;  %v1819_v15 = vmax.f32 %v1755_v35, 0.0  ;;  %v1688_v19 = vadd.f32 %v1624_v53, %v1300_v9 }
  0xcc   : > { %788 = vperm.xlu0 %5989, %v6467_v28   ;;  %v1622_v30 = vmul.f32 %v6436_v7, %v1379_v6 }
  0xcd   : > { %v979_v21 = vpop.permute.xlu0 %978 }
  0xce   : > { %v1231_v29 = vmul.f32 %v6432_v5, %v979_v21  ;;  %698 = vperm.xlu1 %5960, %v6389_v47  }
  0xcf   : > { %v1383_v32 = vpop.permute.xlu1 %1382 }
  0xd0   : > { %v1295_v34 = vadd.f32 %v1231_v29, %v907_v17  ;;  %793 = vperm.xlu0 %5989, %v6513_v22   ;;  %v6538_v17 = vld [vmem:[%s6278_s24 + $0x188] sm:$0xff]  ;;  %v1623_v6 = vmul.f32 %v6436_v7, %v1383_v32  ;;  %v6549_v32 = vld [vmem:[%s6278_s24 + $0x190] sm:$0xff] }
  0xd1   : > { %v991_v37 = vpop.permute.xlu0 %990 }
  0xd2   : > { %v1683_v11 = vadd.f32 %v1619_v27, %v1295_v34  ;;  %v1234_v23 = vmul.f32 %v6432_v5, %v991_v37  ;;  %5961 = vset.pattern.permute.xlu1 %v8711_v1  ;;  %v1759_v34 = vadd.f32 %v6463_v24, %v1688_v19  ;;  %v1626_v19 = vmul.f32 %v6436_v7, %v6424_v3  ;;  %v543_v3 = vld [vmem:[%s6278_s24 + $0xd8] sm:$0xff] }
  0xd3   : > { %1062 = vperm.xlu1 %5961, %v6389_v47  }
  0xd4   : > { %v1754_v57 = vadd.f32 %v6463_v24, %v1683_v11  ;;  %v1298_v13 = vadd.f32 %v1234_v23, %v910_v48  ;;  %v624_v14 = vpop.permute.xlu1 %623  ;;  %803 = vperm.xlu0 %5989, %v6526_v39   ;;  %v1823_v9 = vmax.f32 %v1759_v34, 0.0  ;;  %v540_v23 = vld [vmem:[%s6278_s24 + $0xc0] sm:$0xff] }
  0xd5   : > { %v995_v31 = vpop.permute.xlu0 %994 }
  0xd6   : > { %v1818_v58 = vmax.f32 %v1754_v57, 0.0  ;;  %v1686_v20 = vadd.f32 %v1622_v30, %v1298_v13  ;;  %v1235_v47 = vmul.f32 %v6432_v5, %v995_v31  ;;  %v6559_v30 = vld [vmem:[%s6278_s24 + $0x128] sm:$0xff] }
  0xd7   : > { %5962 = vset.pattern.permute.xlu1 %v8712_v0 }
  0xd8   : > { %v1757_v21 = vadd.f32 %v6463_v24, %v1686_v20  ;;  %v1299_v25 = vadd.f32 %v1235_v47, %v911_v38  ;;  %1442 = vperm.xlu1 %5962, %v6354_v40   ;;  %v1881_v29 = vpack.c.bf16 %v1819_v15, %v1818_v58  ;;  %828 = vperm.xlu0 %5989, %v6538_v17   ;;  %v6571_v38 = vld [vmem:[%s6278_s24 + $0x130] sm:$0xff] }
  0xd9   : > { %v1003_v54 = vpop.permute.xlu1 %1002  ;;  %v1011_v27 = vpop.permute.xlu0 %1010  ;;  %v914_v15 = vmul.f32 %v6439_v8, %v6475_v46 }
  0xda   : > { %v1821_v53 = vmax.f32 %v1757_v21, 0.0  ;;  %v1687_v35 = vadd.f32 %v1623_v6, %v1299_v25  ;;  %5776 = vmatmul.mubr.msk.bf16.vlgmr.msra.gmra.mrb[0].mxu0 %vm1951_vm1, %v1881_v29  ;;  %v1237_v47 = vmul.f32 %v6432_v5, %v1003_v54  ;;  %v915_v6 = vmul.f32 %v6439_v8, %v6480_v49 }
  0xdb   : > { %v913_v21 = vmul.f32 %v6439_v8, %v624_v14  ;;  %v1239_v25 = vmul.f32 %v6432_v5, %v1011_v27 }
  0xdc   : > { %v1758_v36 = vadd.f32 %v6463_v24, %v1687_v35  ;;  %1446 = vperm.xlu1 %5962, %v6358_v41   ;;  %v1882_v40 = vpack.c.bf16 %v1821_v53, %v1820_v33  ;;  %833 = vperm.xlu0 %5989, %v6549_v32  }
  0xdd   : > { %v1007_v37 = vpop.permute.xlu1 %1006  ;;  %v6553_v48 = vpop.permute.xlu0 %1022  ;;  %v1301_v34 = vadd.f32 %v1237_v47, %v913_v21 }
  0xde   : > { %v1822_v11 = vmax.f32 %v1758_v36, 0.0  ;;  %5779 = vmatprep.mubr.msk.bf16.mxu0 %vm1951_vm1, %v1882_v40  ;;  %v1238_v16 = vmul.f32 %v6432_v5, %v1007_v37 }
  0xe0   : > { %5963 = vset.pattern.permute.xlu1 %v6179_v2  ;;  %v1883_v57 = vpack.c.bf16 %v1823_v9, %v1822_v11  ;;  %5997 = vset.pattern.permute.xlu0 %v8711_v1  ;;  %v1302_v58 = vadd.f32 %v1238_v16, %v914_v15 }
  0xe1   : > { %703 = vperm.xlu1 %5963, %v540_v23   ;;  %v6562_v13 = vpop.permute.xlu0 %1026  ;;  %1118 = vperm.xlu0 %5997, %v6559_v30  }
  0xe2   : > { %5780 = vmatmul.mubr.msk.bf16.gmra.mrb[4].mxu0 %vm1951_vm1, %v1883_v57  ;;  %v639_v41 = vpop.permute.xlu1 %638  ;;  %v1690_v29 = vadd.f32 %v1626_v19, %v1302_v58 }
  0xe3   : > { %v916_v11 = vmul.f32 %v6439_v8, %v639_v41 }
  0xe4   : > { %v1761_v35 = vadd.f32 %v6463_v24, %v1690_v29 }
  0xe5   : > { %5964 = vset.pattern.permute.xlu1 %v8711_v1  ;;  %v6574_v31 = vpop.permute.xlu0 %1042  ;;  %1122 = vperm.xlu0 %5997, %v6571_v38  }
  0xe6   : > { %1066 = vperm.xlu1 %5964, %v540_v23   ;;  %v1825_v9 = vmax.f32 %v1761_v35, 0.0 }
  0xe7   : > { %v1015_v20 = vpop.permute.xlu1 %1014 }
  0xe8   : > { %v1240_v14 = vmul.f32 %v6432_v5, %v1015_v20 }
  0xe9   : > { %v6580_v46 = vpop.permute.xlu0 %1054  ;;  %1138 = vperm.xlu0 %5997, %v6513_v22  }
  0xea   : > { %1070 = vperm.xlu1 %5964, %v6394_v50   ;;  %v1303_v50 = vadd.f32 %v1239_v25, %v915_v6  ;;  %v1304_v19 = vadd.f32 %v1240_v14, %v916_v11  ;;  %v6621_v14 = vld [vmem:[%s6278_s24 + $0x170] sm:$0xff] }
  0xec   : > { %v1391_v33 = vpop.permute.xlu1 %1390 }
  0xed   : > { %v1625_v53 = vmul.f32 %v6436_v7, %v1391_v33  ;;  %v6590_v54 = vpop.permute.xlu0 %1058 }
  0xee   : > { %5965 = vset.pattern.permute.xlu1 %v6179_v2 }
  0xef   : > { %v1689_v36 = vadd.f32 %v1625_v53, %v1301_v34  ;;  %718 = vperm.xlu1 %5965, %v543_v3  }
  0xf0   : > { %v1399_v49 = vpop.permute.xlu1 %1398 }
  0xf1   : > { %v1760_v27 = vadd.f32 %v6463_v24, %v1689_v36  ;;  %v1627_v40 = vmul.f32 %v6436_v7, %v1399_v49  ;;  %v6597_v37 = vpop.permute.xlu0 %1074  ;;  %v6615_v49 = vld [vmem:[%s6278_s24 + $0x168] sm:$0xff] }
  0xf2   : > { %1150 = vperm.xlu0 %5997, %v6615_v49  }
  0xf3   : > { %v1824_v57 = vmax.f32 %v1760_v27, 0.0  ;;  %v1691_v15 = vadd.f32 %v1627_v40, %v1303_v50  ;;  %5966 = vset.pattern.permute.xlu1 %v8711_v1 }
  0xf4   : > { %1078 = vperm.xlu1 %5966, %v543_v3   ;;  %v1403_v16 = vpop.permute.xlu1 %1402 }
  0xf5   : > { %v1628_v58 = vmul.f32 %v6436_v7, %v1403_v16  ;;  %v1884_v47 = vpack.c.bf16 %v1825_v9, %v1824_v57  ;;  %v1762_v20 = vadd.f32 %v6463_v24, %v1691_v15  ;;  %v6603_v21 = vpop.permute.xlu0 %1086  ;;  %v1242_v15 = vmul.f32 %v6432_v5, %v6553_v48 }
  0xf6   : > { %1154 = vperm.xlu0 %5997, %v6621_v14   ;;  %v1243_v48 = vmul.f32 %v6432_v5, %v6562_v13  ;;  %v6029_v13 = vld [vmem:[%s8699_s5 + $0x4] ss:$8 sps:$4 sm:$0xff]  }
  0xf7   : > { %v1692_v6 = vadd.f32 %v1628_v58, %v1304_v19  ;;  %5783 = vmatprep.mubr.msk.bf16.mxu0 %vm1951_vm1, %v1884_v47  ;;  %v1826_v29 = vmax.f32 %v1762_v20, 0.0  ;;  %2541 = vmatprep.subr.bf16.mxu1 %v6029_v13  ;;  %v922_v13 = vmul.f32 %v6439_v8, %v6488_v61 }
  0xf8   : > { %5967 = vset.pattern.permute.xlu1 %v8712_v0 }
  0xf9   : > { %v1763_v41 = vadd.f32 %v6463_v24, %v1692_v6  ;;  %1454 = vperm.xlu1 %5967, %v540_v23   ;;  %v649_v25 = vpop.permute.xlu1 %648  ;;  %v6608_v34 = vpop.permute.xlu0 %1090 }
  0xfa   : > { %1170 = vperm.xlu0 %5997, %v6549_v32  }
  0xfb   : > { %v1827_v33 = vmax.f32 %v1763_v41, 0.0 }
  0xfd   : > { %1462 = vperm.xlu1 %5967, %v6363_v42   ;;  %v1885_v53 = vpack.c.bf16 %v1827_v33, %v1826_v29  ;;  %v6612_v35 = vpop.permute.xlu0 %1106  ;;  %v6648_v29 = vld [vmem:[%s6278_s24 + $0x1b0] sm:$0xff] }
  0xfe   : > { %v1019_v50 = vpop.permute.xlu1 %1018 }
  0xff   : > { %5784 = vmatmul.mubr.msk.bf16.gmra.mrb[8].mxu0 %vm1951_vm1, %v1885_v53  ;;  %v1241_v27 = vmul.f32 %v6432_v5, %v1019_v50 }
 0x101   : > { %1466 = vperm.xlu1 %5967, %v543_v3   ;;  %v917_v3 = vmul.f32 %v6439_v8, %v6483_v52  ;;  %v918_v52 = vmul.f32 %v6439_v8, %v649_v25 }
 0x102   : > { %v1407_v42 = vpop.permute.xlu0 %1406 }
 0x103   : > { %v654_v36 = vpop.permute.xlu1 %653  ;;  %v1629_v40 = vmul.f32 %v6436_v7, %v1407_v42  ;;  %v1305_v16 = vadd.f32 %v1241_v27, %v917_v3  ;;  %v1306_v6 = vadd.f32 %v1242_v15, %v918_v52  ;;  %v6031_v27 = vld [vmem:[%s8699_s5] ss:$8 sps:$4 sm:$0xff]   ;;  %v6032_v15 = vld [vmem:[%s8699_s5 + $0x14] ss:$8 sps:$4 sm:$0xff]  }
 0x104   : > { %v919_v41 = vmul.f32 %v6439_v8, %v654_v36  ;;  %2542 = vmatpush1.bf16.msra.mxu1 %v6031_v27  ;;  %v6046_v27 = vld [vmem:[%s8699_s5 + $0x50] ss:$8 sps:$4 sm:$0xff]  }
 0x105   : > { %5968 = vset.pattern.permute.xlu1 %v6179_v2  ;;  %v1693_v58 = vadd.f32 %v1629_v40, %v1305_v16  ;;  %2543 = vmatprep.subr.bf16.mxu1 %v6032_v15 }
 0x106   : > { %728 = vperm.xlu1 %5968, %v6367_v43   ;;  %v1419_v57 = vpop.permute.xlu0 %1418  ;;  %v1307_v42 = vadd.f32 %v1243_v48, %v919_v41  ;;  %v6037_v48 = vld [vmem:[%s8699_s5 + $0x20] ss:$8 sps:$4 sm:$0xff]   ;;  %v6684_v41 = vld [vmem:[%s6278_s24 + $0x178] sm:$0xff] }
 0x107   : > { %v659_v23 = vpop.permute.xlu1 %658  ;;  %v1632_v32 = vmul.f32 %v6436_v7, %v1419_v57  ;;  %v1764_v33 = vadd.f32 %v6463_v24, %v1693_v58  ;;  %v6034_v58 = vld [vmem:[%s8699_s5 + $0x10] ss:$8 sps:$4 sm:$0xff]  }
 0x108   : > { %v920_v19 = vmul.f32 %v6439_v8, %v659_v23  ;;  %2544 = vmatpush1.bf16.msra.mxu1 %v6034_v58 }
 0x109   : > { %v1828_v40 = vmax.f32 %v1764_v33, 0.0 }
 0x10a   : > { %5969 = vset.pattern.permute.xlu1 %v8711_v1 }
 0x10b   : > { %1082 = vperm.xlu1 %5969, %v6401_v55   ;;  %v6638_v55 = vld [vmem:[%s6278_s24 + $0x1a8] sm:$0xff] }
 0x10c   : > { %v1031_v9 = vpop.permute.xlu1 %1030  ;;  %1182 = vperm.xlu0 %5997, %v6638_v55  }
 0x10d   : > { %v1244_v11 = vmul.f32 %v6432_v5, %v1031_v9 }
 0x10f   : > { %5970 = vset.pattern.permute.xlu1 %v6179_v2  ;;  %v1308_v47 = vadd.f32 %v1244_v11, %v920_v19 }
 0x110   : > { %733 = vperm.xlu1 %5970, %v6371_v44   ;;  %1186 = vperm.xlu0 %5997, %v6648_v29  }
 0x111   : > { %v1411_v20 = vpop.permute.xlu1 %1410  ;;  %v1696_v53 = vadd.f32 %v1632_v32, %v1308_v47  ;;  %v6035_v32 = vld [vmem:[%s8699_s5 + $0x24] ss:$8 sps:$4 sm:$0xff]  }
 0x112   : > { %v1630_v25 = vmul.f32 %v6436_v7, %v1411_v20  ;;  %2545 = vmatprep.subr.bf16.mxu1 %v6035_v32 }
 0x113   : > { %v1767_v9 = vadd.f32 %v6463_v24, %v1696_v53  ;;  %2546 = vmatpush1.bf16.msra.mxu1 %v6037_v48  ;;  %v6695_v53 = vld [vmem:[%s6278_s24 + $0x100] sm:$0xff] }
 0x114   : > { %v1694_v50 = vadd.f32 %v1630_v25, %v1306_v6  ;;  %738 = vperm.xlu1 %5970, %v6413_v59   ;;  %6004 = vset.pattern.permute.xlu0 %v8712_v0  ;;  %v6038_v25 = vld [vmem:[%s8699_s5 + $0x34] ss:$8 sps:$4 sm:$0xff]  }
 0x115   : > { %v1415_v23 = vpop.permute.xlu1 %1414  ;;  %1534 = vperm.xlu0 %6004, %v6526_v39   ;;  %v1831_v47 = vmax.f32 %v1767_v9, 0.0  ;;  %2547 = vmatprep.subr.bf16.mxu1 %v6038_v25 }
 0x116   : > { %v1765_v36 = vadd.f32 %v6463_v24, %v1694_v50  ;;  %v1631_v3 = vmul.f32 %v6436_v7, %v1415_v23  ;;  %v6041_v50 = vld [vmem:[%s8699_s5 + $0x44] ss:$8 sps:$4 sm:$0xff]  }
 0x118   : > { %v1829_v11 = vmax.f32 %v1765_v36, 0.0  ;;  %v1695_v57 = vadd.f32 %v1631_v3, %v1307_v42  ;;  %5971 = vset.pattern.permute.xlu1 %v8711_v1  ;;  %v6044_v36 = vld [vmem:[%s8699_s5 + $0x54] ss:$8 sps:$4 sm:$0xff]   ;;  %v1427_v3 = vpop.permute.xlu0 %1426 }
 0x119   : > { %1094 = vperm.xlu1 %5971, %v6413_v59   ;;  %1546 = vperm.xlu0 %6004, %v6684_v41   ;;  %v1634_v61 = vmul.f32 %v6436_v7, %v1427_v3 }
 0x11a   : > { %v1766_v52 = vadd.f32 %v6463_v24, %v1695_v57  ;;  %v664_v16 = vpop.permute.xlu1 %663  ;;  %v1886_v19 = vpack.c.bf16 %v1829_v11, %v1828_v40  ;;  %v6047_v11 = vld [vmem:[%s8699_s5 + $0x64] ss:$8 sps:$4 sm:$0xff]   ;;  %v6049_v57 = vld [vmem:[%s8699_s5 + $0x60] ss:$8 sps:$4 sm:$0xff]  }
 0x11b   : > { %v921_v58 = vmul.f32 %v6439_v8, %v664_v16 }
 0x11c   : > { %v1830_v59 = vmax.f32 %v1766_v52, 0.0  ;;  %5787 = vmatprep.mubr.msk.bf16.mxu0 %vm1951_vm1, %v1886_v19  ;;  %v923_v52 = vmul.f32 %v6439_v8, %v6492_v62  ;;  %v1247_v19 = vmul.f32 %v6432_v5, %v6574_v31 }
 0x11d   : > { %5972 = vset.pattern.permute.xlu1 %v8712_v0  ;;  %1554 = vperm.xlu0 %6004, %v6538_v17  }
 0x11e   : > { %1474 = vperm.xlu1 %5972, %v6367_v43   ;;  %v1887_v20 = vpack.c.bf16 %v1831_v47, %v1830_v59  ;;  %v6040_v43 = vld [vmem:[%s8699_s5 + $0x30] ss:$8 sps:$4 sm:$0xff]   ;;  %v6050_v59 = vld [vmem:[%s8699_s5 + $0x74] ss:$8 sps:$4 sm:$0xff]   ;;  %v1311_v62 = vadd.f32 %v1247_v19, %v923_v52 }
 0x11f   : > { %v1035_v6 = vpop.permute.xlu1 %1034  ;;  %2548 = vmatpush1.bf16.msra.mxu1 %v6040_v43  ;;  %v1439_v43 = vpop.permute.xlu0 %1438 }
 0x120   : > { %5788 = vmatmul.mubr.msk.bf16.gmra.mrb[12].mxu0 %vm1951_vm1, %v1887_v20  ;;  %2549 = vmatprep.subr.bf16.mxu1 %v6041_v50  ;;  %v1245_v15 = vmul.f32 %v6432_v5, %v1035_v6  ;;  %v551_v20 = vld [vmem:[%s6278_s24 + $0x118] sm:$0xff] }
 0x122   : > { %1478 = vperm.xlu1 %5972, %v6371_v44   ;;  %v6043_v44 = vld [vmem:[%s8699_s5 + $0x40] ss:$8 sps:$4 sm:$0xff]   ;;  %v1309_v48 = vadd.f32 %v1245_v15, %v921_v58 }
 0x123   : > { %v1039_v33 = vpop.permute.xlu1 %1038  ;;  %2550 = vmatpush1.bf16.msra.mxu1 %v6043_v44 }
 0x124   : > { %v1246_v42 = vmul.f32 %v6432_v5, %v1039_v33  ;;  %2551 = vmatprep.subr.bf16.mxu1 %v6044_v36 }
 0x126   : > { %5973 = vset.pattern.permute.xlu1 %v6179_v2  ;;  %v1310_v40 = vadd.f32 %v1246_v42, %v922_v13 }
 0x127   : > { %743 = vperm.xlu1 %5973, %v6695_v53   ;;  %2552 = vmatpush1.bf16.msra.mxu1 %v6046_v27 }
 0x128   : > { %v679_v23 = vpop.permute.xlu1 %678  ;;  %2553 = vmatprep.subr.bf16.mxu1 %v6047_v11  ;;  %v1698_v47 = vadd.f32 %v1634_v61, %v1310_v40 }
 0x129   : > { %v924_v42 = vmul.f32 %v6439_v8, %v679_v23 }
 0x12a   : > { %v1769_v31 = vadd.f32 %v6463_v24, %v1698_v47 }
 0x12b   : > { %5974 = vset.pattern.permute.xlu1 %v8711_v1  ;;  %2554 = vmatpush1.bf16.msra.mxu1 %v6049_v57  ;;  %v1451_v57 = vpop.permute.xlu0 %1450 }
 0x12c   : > { %1098 = vperm.xlu1 %5974, %v6695_v53   ;;  %2555 = vmatprep.subr.bf16.mxu1 %v6050_v59  ;;  %v1833_v13 = vmax.f32 %v1769_v31, 0.0  ;;  %v6766_v31 = vld [vmem:[%s6278_s24 + $0x1a0] sm:$0xff] }
 0x12d   : > { %v1047_v9 = vpop.permute.xlu1 %1046  ;;  %1566 = vperm.xlu0 %6004, %v6766_v31  }
 0x12e   : > { %v1248_v33 = vmul.f32 %v6432_v5, %v1047_v9 }
 0x12f   : > { %v6752_v47 = vpop.permute.xlu0 %1458 }
 0x130   : > { %1102 = vperm.xlu1 %5974, %v6428_v4   ;;  %v6052_v4 = vld [vmem:[%s8699_s5 + $0x70] ss:$8 sps:$4 sm:$0xff]   ;;  %v1312_v40 = vadd.f32 %v1248_v33, %v924_v42 }
 0x131   : > { %2556 = vmatpush1.bf16.msra.mxu1 %v6052_v4 }
 0x132   : > { %v1423_v32 = vpop.permute.xlu1 %1422 }
 0x133   : > { %v1633_v6 = vmul.f32 %v6436_v7, %v1423_v32  ;;  %v6756_v4 = vpop.permute.xlu0 %1470 }
 0x134   : > { %5975 = vset.pattern.permute.xlu1 %v6179_v2 }
 0x135   : > { %v1697_v16 = vadd.f32 %v1633_v6, %v1309_v48  ;;  %758 = vperm.xlu1 %5975, %v551_v20   ;;  %v925_v6 = vmul.f32 %v6439_v8, %v6498_v12  ;;  %v6774_v12 = vld [vmem:[%s6278_s24 + $0x1b8] sm:$0xff] }
 0x136   : > { %v1431_v25 = vpop.permute.xlu1 %1430  ;;  %1578 = vperm.xlu0 %6004, %v6774_v12  }
 0x137   : > { %v1768_v50 = vadd.f32 %v6463_v24, %v1697_v16  ;;  %v1635_v44 = vmul.f32 %v6436_v7, %v1431_v25  ;;  %v1637_v16 = vmul.f32 %v6436_v7, %v1439_v43  ;;  %v1640_v43 = vmul.f32 %v6436_v7, %v1451_v57 }
 0x139   : > { %v1832_v36 = vmax.f32 %v1768_v50, 0.0  ;;  %v1699_v3 = vadd.f32 %v1635_v44, %v1311_v62  ;;  %5977 = vset.pattern.permute.xlu1 %v8711_v1  ;;  %v1250_v50 = vmul.f32 %v6432_v5, %v6580_v46  ;;  %v1251_v46 = vmul.f32 %v6432_v5, %v6590_v54 }
 0x13a   : > { %1110 = vperm.xlu1 %5977, %v551_v20   ;;  %v1435_v27 = vpop.permute.xlu1 %1434 }
 0x13b   : > { %v1636_v61 = vmul.f32 %v6436_v7, %v1435_v27  ;;  %v1888_v11 = vpack.c.bf16 %v1833_v13, %v1832_v36  ;;  %v1770_v9 = vadd.f32 %v6463_v24, %v1699_v3  ;;  %v6787_v27 = vld [vmem:[%s6278_s24 + $0x1c8] sm:$0xff] }
 0x13c   : > { %1586 = vperm.xlu0 %6004, %v6787_v27  }
 0x13d   : > { %v1700_v15 = vadd.f32 %v1636_v61, %v1312_v40  ;;  %5791 = vmatprep.mubr.msk.bf16.mxu0 %vm1951_vm1, %v1888_v11  ;;  %v1834_v19 = vmax.f32 %v1770_v9, 0.0 }
 0x13e   : > { %5978 = vset.pattern.permute.xlu1 %v8712_v0 }
 0x13f   : > { %v1771_v23 = vadd.f32 %v6463_v24, %v1700_v15  ;;  %1486 = vperm.xlu1 %5978, %v6695_v53   ;;  %v689_v52 = vpop.permute.xlu1 %688 }
 0x140   : > { %v926_v44 = vmul.f32 %v6439_v8, %v689_v52  ;;  %6012 = vset.pattern.permute.xlu0 %v6179_v2 }
 0x141   : > { %v1835_v58 = vmax.f32 %v1771_v23, 0.0  ;;  %843 = vperm.xlu0 %6012, %v6766_v31  }
 0x142   : > { %v1314_v40 = vadd.f32 %v1250_v50, %v926_v44 }
 0x143   : > { %1494 = vperm.xlu1 %5978, %v6376_v45   ;;  %v1889_v59 = vpack.c.bf16 %v1835_v58, %v1834_v19  ;;  %v6763_v45 = vpop.permute.xlu0 %1482 }
 0x144   : > { %v1051_v32 = vpop.permute.xlu1 %1050 }
 0x145   : > { %5792 = vmatmul.mubr.msk.bf16.gmra.mrb[16].mxu0 %vm1951_vm1, %v1889_v59  ;;  %v1249_v62 = vmul.f32 %v6432_v5, %v1051_v32  ;;  %868 = vperm.xlu0 %6012, %v6787_v27  }
 0x147   : > { %1498 = vperm.xlu1 %5978, %v551_v20   ;;  %v1313_v20 = vadd.f32 %v1249_v62, %v925_v6  ;;  %v6780_v42 = vpop.permute.xlu0 %1490 }
 0x149   : > { %v694_v48 = vpop.permute.xlu1 %693 }
 0x14a   : > { %v927_v61 = vmul.f32 %v6439_v8, %v694_v48 }
 0x14b   : > { %5979 = vset.pattern.permute.xlu1 %v6179_v2  ;;  %v6796_v23 = vpop.permute.xlu0 %1502 }
 0x14c   : > { %768 = vperm.xlu1 %5979, %v6559_v30   ;;  %v1315_v19 = vadd.f32 %v1251_v46, %v927_v61  ;;  %v1642_v46 = vmul.f32 %v6436_v7, %v6752_v47 }
 0x14d   : > { %v699_v53 = vpop.permute.xlu1 %698 }
 0x14e   : > { %v928_v13 = vmul.f32 %v6439_v8, %v699_v53 }
 0x150   : > { %5980 = vset.pattern.permute.xlu1 %v8711_v1 }
 0x151   : > { %1114 = vperm.xlu1 %5980, %v6444_v10   ;;  %v1701_v10 = vadd.f32 %v1637_v16, %v1313_v20  ;;  %v6806_v20 = vpop.permute.xlu0 %1514 }
 0x152   : > { %v1063_v25 = vpop.permute.xlu1 %1062 }
 0x153   : > { %v1252_v33 = vmul.f32 %v6432_v5, %v1063_v25  ;;  %v1772_v9 = vadd.f32 %v6463_v24, %v1701_v10  ;;  %v556_v10 = vld [vmem:[%s6278_s24 + $0x140] sm:$0xff] }
 0x155   : > { %5981 = vset.pattern.permute.xlu1 %v6179_v2  ;;  %v1316_v36 = vadd.f32 %v1252_v33, %v928_v13  ;;  %v1836_v59 = vmax.f32 %v1772_v9, 0.0  ;;  %v1255_v9 = vmul.f32 %v6432_v5, %v6597_v37 }
 0x156   : > { %773 = vperm.xlu1 %5981, %v6571_v38  }
 0x157   : > { %v1443_v3 = vpop.permute.xlu1 %1442  ;;  %v1704_v15 = vadd.f32 %v1640_v43, %v1316_v36 }
 0x158   : > { %v1638_v11 = vmul.f32 %v6436_v7, %v1443_v3 }
 0x159   : > { %v1775_v32 = vadd.f32 %v6463_v24, %v1704_v15 }
 0x15a   : > { %v1702_v57 = vadd.f32 %v1638_v11, %v1314_v40  ;;  %778 = vperm.xlu1 %5981, %v6453_v18  }
 0x15b   : > { %v1447_v52 = vpop.permute.xlu1 %1446  ;;  %v1839_v25 = vmax.f32 %v1775_v32, 0.0 }
 0x15c   : > { %v1773_v58 = vadd.f32 %v6463_v24, %v1702_v57  ;;  %v1639_v54 = vmul.f32 %v6436_v7, %v1447_v52 }
 0x15e   : > { %v1837_v48 = vmax.f32 %v1773_v58, 0.0  ;;  %v1703_v53 = vadd.f32 %v1639_v54, %v1315_v19  ;;  %5982 = vset.pattern.permute.xlu1 %v8711_v1  ;;  %v559_v58 = vld [vmem:[%s6278_s24 + $0x158] sm:$0xff] }
 0x15f   : > { %1126 = vperm.xlu1 %5982, %v6453_v18   ;;  %v6812_v18 = vpop.permute.xlu0 %1522 }
 0x160   : > { %v1774_v6 = vadd.f32 %v6463_v24, %v1703_v53  ;;  %v704_v62 = vpop.permute.xlu1 %703  ;;  %v1890_v16 = vpack.c.bf16 %v1837_v48, %v1836_v59 }
 0x161   : > { %v929_v15 = vmul.f32 %v6439_v8, %v704_v62 }
 0x162   : > { %v1838_v33 = vmax.f32 %v1774_v6, 0.0  ;;  %5795 = vmatprep.mubr.msk.bf16.mxu0 %vm1951_vm1, %v1890_v16 }
 0x163   : > { %5983 = vset.pattern.permute.xlu1 %v8712_v0  ;;  %v709_v43 = vpop.permute.xlu0 %708 }
 0x164   : > { %1506 = vperm.xlu1 %5983, %v6559_v30   ;;  %v1891_v50 = vpack.c.bf16 %v1839_v25, %v1838_v33  ;;  %v930_v3 = vmul.f32 %v6439_v8, %v709_v43 }
 0x165   : > { %v1067_v44 = vpop.permute.xlu1 %1066 }
 0x166   : > { %5796 = vmatmul.mubr.msk.bf16.gmra.mrb[20].mxu0 %vm1951_vm1, %v1891_v50  ;;  %v1253_v11 = vmul.f32 %v6432_v5, %v1067_v44 }
 0x167   : > { %v714_v61 = vpop.permute.xlu0 %713 }
 0x168   : > { %1510 = vperm.xlu1 %5983, %v6571_v38   ;;  %v931_v52 = vmul.f32 %v6439_v8, %v714_v61  ;;  %v1317_v54 = vadd.f32 %v1253_v11, %v929_v15  ;;  %v6845_v11 = vld [vmem:[%s6278_s24 + $0x1d0] sm:$0xff]  ;;  %v6850_v15 = vld [vmem:[%s6278_s24 + $0x1e0] sm:$0xff] }
 0x169   : > { %v1071_v13 = vpop.permute.xlu1 %1070  ;;  %873 = vperm.xlu0 %6012, %v6845_v11  }
 0x16a   : > { %v1254_v30 = vmul.f32 %v6432_v5, %v1071_v13  ;;  %v1319_v48 = vadd.f32 %v1255_v9, %v931_v52 }
 0x16c   : > { %5984 = vset.pattern.permute.xlu1 %v6179_v2  ;;  %v1318_v40 = vadd.f32 %v1254_v30, %v930_v3 }
 0x16d   : > { %783 = vperm.xlu1 %5984, %v556_v10   ;;  %883 = vperm.xlu0 %6012, %v6850_v15  }
 0x16e   : > { %v719_v36 = vpop.permute.xlu1 %718  ;;  %v1706_v57 = vadd.f32 %v1642_v46, %v1318_v40 }
 0x16f   : > { %v932_v16 = vmul.f32 %v6439_v8, %v719_v36 }
 0x170   : > { %v1777_v59 = vadd.f32 %v6463_v24, %v1706_v57 }
 0x171   : > { %5985 = vset.pattern.permute.xlu1 %v8711_v1  ;;  %6013 = vset.pattern.permute.xlu0 %v8711_v1 }
 0x172   : > { %1130 = vperm.xlu1 %5985, %v556_v10   ;;  %v1841_v62 = vmax.f32 %v1777_v59, 0.0  ;;  %1202 = vperm.xlu0 %6013, %v6845_v11  }
 0x173   : > { %v1079_v38 = vpop.permute.xlu1 %1078 }
 0x174   : > { %v1256_v37 = vmul.f32 %v6432_v5, %v1079_v38 }
 0x176   : > { %1134 = vperm.xlu1 %5985, %v6467_v28   ;;  %v1320_v44 = vadd.f32 %v1256_v37, %v932_v16  ;;  %v6870_v37 = vld [vmem:[%s6278_s24 + $0x1e8] sm:$0xff] }
 0x177   : > { %1214 = vperm.xlu0 %6013, %v6870_v37  }
 0x178   : > { %v1455_v19 = vpop.permute.xlu1 %1454 }
 0x179   : > { %v1641_v47 = vmul.f32 %v6436_v7, %v1455_v19 }
 0x17a   : > { %5986 = vset.pattern.permute.xlu1 %v6179_v2 }
 0x17b   : > { %v1705_v32 = vadd.f32 %v1641_v47, %v1317_v54  ;;  %798 = vperm.xlu1 %5986, %v559_v58  }
 0x17c   : > { %v1463_v28 = vpop.permute.xlu1 %1462 }
 0x17d   : > { %v1776_v53 = vadd.f32 %v6463_v24, %v1705_v32  ;;  %v1643_v6 = vmul.f32 %v6436_v7, %v1463_v28  ;;  %v1258_v32 = vmul.f32 %v6432_v5, %v6603_v21  ;;  %v1259_v21 = vmul.f32 %v6432_v5, %v6608_v34 }
 0x17f   : > { %v1840_v25 = vmax.f32 %v1776_v53, 0.0  ;;  %v1707_v33 = vadd.f32 %v1643_v6, %v1319_v48  ;;  %5987 = vset.pattern.permute.xlu1 %v8711_v1 }
 0x180   : > { %1142 = vperm.xlu1 %5987, %v559_v58   ;;  %v1467_v50 = vpop.permute.xlu1 %1466 }
 0x181   : > { %v1644_v13 = vmul.f32 %v6436_v7, %v1467_v50  ;;  %v1892_v43 = vpack.c.bf16 %v1841_v62, %v1840_v25  ;;  %v1778_v3 = vadd.f32 %v6463_v24, %v1707_v33  ;;  %v6881_v33 = vld [vmem:[%s6278_s24 + $0x1f0] sm:$0xff] }
 0x182   : > { %1218 = vperm.xlu0 %6013, %v6881_v33  }
 0x183   : > { %v1708_v30 = vadd.f32 %v1644_v13, %v1320_v44  ;;  %5799 = vmatprep.mubr.msk.bf16.mxu0 %vm1951_vm1, %v1892_v43  ;;  %v1842_v40 = vmax.f32 %v1778_v3, 0.0 }
 0x184   : > { %5988 = vset.pattern.permute.xlu1 %v8712_v0 }
 0x185   : > { %v1779_v36 = vadd.f32 %v6463_v24, %v1708_v30  ;;  %1518 = vperm.xlu1 %5988, %v556_v10   ;;  %v729_v46 = vpop.permute.xlu1 %728  ;;  %v724_v10 = vpop.permute.xlu0 %723 }
 0x186   : > { %v933_v52 = vmul.f32 %v6439_v8, %v724_v10  ;;  %v934_v48 = vmul.f32 %v6439_v8, %v729_v46  ;;  %6018 = vset.pattern.permute.xlu0 %v8712_v0 }
 0x187   : > { %v1843_v38 = vmax.f32 %v1779_v36, 0.0  ;;  %v6891_v36 = vld [vmem:[%s8696_s2] ss:$0 sm:$0xff]  ;;  %1598 = vperm.xlu0 %6018, %v6850_v15  }
 0x188   : > { %v1322_v62 = vadd.f32 %v1258_v32, %v934_v48 }
 0x189   : > { %1526 = vperm.xlu1 %5988, %v6513_v22   ;;  %v1893_v61 = vpack.c.bf16 %v1843_v38, %v1842_v40 }
 0x18a   : > { %v1083_v9 = vpop.permute.xlu1 %1082 }
 0x18b   : > { %5800 = vmatmul.mubr.msk.bf16.gmra.mrb[24].mxu0 %vm1951_vm1, %v1893_v61  ;;  %v1257_v19 = vmul.f32 %v6432_v5, %v1083_v9 }
 0x18d   : > { %1530 = vperm.xlu1 %5988, %v559_v58   ;;  %v1645_v58 = vmul.f32 %v6436_v7, %v6756_v4  ;;  %v1321_v54 = vadd.f32 %v1257_v19, %v933_v52  ;;  %v6908_v19 = vld [vmem:[%s6278_s24 + $0x1f8] sm:$0xff] }
 0x18e   : > { %1610 = vperm.xlu0 %6018, %v6908_v19  }
 0x18f   : > { %v734_v57 = vpop.permute.xlu1 %733  ;;  %v1709_v4 = vadd.f32 %v1645_v58, %v1321_v54  ;;  %v749_v58 = vpop.permute.xlu0 %748 }
 0x190   : > { %v935_v16 = vmul.f32 %v6439_v8, %v734_v57 }
 0x191   : > { %5990 = vset.pattern.permute.xlu1 %v6179_v2  ;;  %v1780_v50 = vadd.f32 %v6463_v24, %v1709_v4  ;;  %v6917_v4 = vld [vmem:[%s6278_s24 + $0x180] sm:$0xff] }
 0x192   : > { %808 = vperm.xlu1 %5990, %v6615_v49   ;;  %v1323_v43 = vadd.f32 %v1259_v21, %v935_v16  ;;  %6021 = vset.pattern.permute.xlu0 %v6179_v2 }
 0x193   : > { %v739_v22 = vpop.permute.xlu1 %738  ;;  %v1844_v30 = vmax.f32 %v1780_v50, 0.0  ;;  %v754_v16 = vpop.permute.xlu0 %753 }
 0x194   : > { %v936_v28 = vmul.f32 %v6439_v8, %v739_v22 }
 0x196   : > { %5991 = vset.pattern.permute.xlu1 %v8711_v1 }
 0x197   : > { %1146 = vperm.xlu1 %5991, %v6526_v39   ;;  %v1648_v39 = vmul.f32 %v6436_v7, %v6763_v45 }
 0x198   : > { %v1095_v47 = vpop.permute.xlu1 %1094 }
 0x199   : > { %v1260_v59 = vmul.f32 %v6432_v5, %v1095_v47 }
 0x19b   : > { %5992 = vset.pattern.permute.xlu1 %v6179_v2  ;;  %v1324_v53 = vadd.f32 %v1260_v59, %v936_v28 }
 0x19c   : > { %813 = vperm.xlu1 %5992, %v6621_v14  }
 0x19d   : > { %v1475_v6 = vpop.permute.xlu1 %1474  ;;  %v1712_v45 = vadd.f32 %v1648_v39, %v1324_v53 }
 0x19e   : > { %v1646_v25 = vmul.f32 %v6436_v7, %v1475_v6 }
 0x19f   : > { %v1783_v46 = vadd.f32 %v6891_v36, %v1712_v45  ;;  %v938_v45 = vmul.f32 %v6439_v8, %v749_v58 }
 0x1a0   : > { %v1710_v44 = vadd.f32 %v1646_v25, %v1322_v62  ;;  %818 = vperm.xlu1 %5992, %v6684_v41  }
 0x1a1   : > { %v1479_v13 = vpop.permute.xlu1 %1478  ;;  %v1847_v57 = vmax.f32 %v1783_v46, 0.0 }
 0x1a2   : > { %v1781_v3 = vadd.f32 %v6463_v24, %v1710_v44  ;;  %v1647_v34 = vmul.f32 %v6436_v7, %v1479_v13 }
 0x1a4   : > { %v1845_v40 = vmax.f32 %v1781_v3, 0.0  ;;  %v1711_v38 = vadd.f32 %v1647_v34, %v1323_v43  ;;  %5993 = vset.pattern.permute.xlu1 %v8711_v1 }
 0x1a5   : > { %1158 = vperm.xlu1 %5993, %v6684_v41   ;;  %v6905_v41 = vld [vmem:[%s8698_s4] ss:$0 sm:$0xff] }
 0x1a6   : > { %v1782_v24 = vadd.f32 %v6891_v36, %v1711_v38  ;;  %v744_v61 = vpop.permute.xlu1 %743  ;;  %v1894_v9 = vpack.c.bf16 %v1845_v40, %v1844_v30 }
 0x1a8   : > { %v1846_v10 = vmax.f32 %v1782_v24, 0.0  ;;  %5803 = vmatprep.mubr.msk.bf16.mxu0 %vm1951_vm1, %v1894_v9  ;;  %v1650_v24 = vmul.f32 %v6436_v7, %v6780_v42 }
 0x1a9   : > { %5994 = vset.pattern.permute.xlu1 %v8712_v0 }
 0x1aa   : > { %1538 = vperm.xlu1 %5994, %v6615_v49   ;;  %v1895_v22 = vpack.c.bf16 %v1847_v57, %v1846_v10  ;;  %v6933_v57 = vpop.permute.xlu0 %763 }
 0x1ab   : > { %v1099_v52 = vpop.permute.xlu1 %1098 }
 0x1ac   : > { %5804 = vmatmul.mubr.msk.bf16.gmra.mrb[28].mxu0 %vm1951_vm1, %v1895_v22 }
 0x1ad   : > { %v5777_v54 = vpop.f32.mrb[0].mxu0 }
 0x1ae   : > { %v2091_v47 = vadd.f32 %v5777_v54, %v6905_v41  ;;  %v2082_v59 = vpop.f32.mrb[1].mxu0  ;;  %1542 = vperm.xlu1 %5994, %v6621_v14  }
 0x1af   : > { %v2083_v49 = vadd.f32 %v6905_v41, %v2082_v59  ;;  %v5778_v32 = vpop.f32.mrb[2].mxu0  ;;  %v1103_v48 = vpop.permute.xlu1 %1102 }
 0x1b0   : > { %v2094_v28 = vadd.f32 %v5778_v32, %v6905_v41  ;;  %v2085_v39 = vpop.f32.mrb[3].mxu0  ;;  %v2339_v6 = vmax.f32 %v2091_v47, 0.0  ;;  %v1262_v44 = vmul.f32 %v6432_v5, %v1103_v48  ;;  %v1261_v47 = vmul.f32 %v6432_v5, %v1099_v52 }
 0x1b1   : > { %v2086_v53 = vadd.f32 %v6905_v41, %v2085_v39  ;;  %v2337_v62 = vmax.f32 %v2083_v49, 0.0  ;;  %v937_v48 = vmul.f32 %v6439_v8, %v744_v61 }
 0x1b2   : > { %v2340_v21 = vmax.f32 %v2094_v28, 0.0  ;;  %5995 = vset.pattern.permute.xlu1 %v6179_v2  ;;  %v1326_v9 = vadd.f32 %v1262_v44, %v938_v45 }
 0x1b3   : > { %v2338_v14 = vmax.f32 %v2086_v53, 0.0  ;;  %823 = vperm.xlu1 %5995, %v6917_v4   ;;  %v567_v53 = vld [vmem:[%s6278_s24 + $0x198] sm:$0xff] }
 0x1b4   : > { %v2402_v25 = vpack.c.bf16 %v2340_v21, %v2339_v6  ;;  %v759_v50 = vpop.permute.xlu1 %758  ;;  %v1714_v28 = vadd.f32 %v1650_v24, %v1326_v9  ;;  %v1263_v6 = vmul.f32 %v6432_v5, %v6612_v35  ;;  %v1325_v21 = vadd.f32 %v1261_v47, %v937_v48 }
 0x1b5   : > { %v2401_v13 = vpack.c.bf16 %v2338_v14, %v2337_v62  ;;  %v5781_v43 = vpop.f32.mrb[4].mxu0  ;;  %v939_v62 = vmul.f32 %v6439_v8, %v754_v16  ;;  %v6943_v14 = vpop.permute.xlu0 %788 }
 0x1b6   : > { %v2107_v3 = vadd.f32 %v5781_v43, %v6905_v41  ;;  %v2098_v34 = vpop.f32.mrb[5].mxu0 }
 0x1b7   : > { %v2099_v30 = vadd.f32 %v6905_v41, %v2098_v34  ;;  %v5782_v46 = vpop.f32.mrb[6].mxu0  ;;  %2574 = vmatmul.mubr.bf16.vlgmr.msra.gmra.mrb[0].mxu1 %v2401_v13  ;;  %5996 = vset.pattern.permute.xlu1 %v8711_v1  ;;  %v1327_v44 = vadd.f32 %v1263_v6, %v939_v62 }
 0x1b8   : > { %v2110_v40 = vadd.f32 %v5782_v46, %v6905_v41  ;;  %v2101_v38 = vpop.f32.mrb[7].mxu0  ;;  %1162 = vperm.xlu1 %5996, %v6917_v4   ;;  %2583 = vmatprep.mubr.bf16.mxu1 %v6179_v2  ;;  %v2343_v58 = vmax.f32 %v2107_v3, 0.0  ;;  %v940_v3 = vmul.f32 %v6439_v8, %v759_v50 }
 0x1b9   : > { %v2102_v10 = vadd.f32 %v6905_v41, %v2101_v38  ;;  %v1111_v22 = vpop.permute.xlu1 %1110  ;;  %v2341_v59 = vmax.f32 %v2099_v30, 0.0 }
 0x1ba   : > { %v2344_v54 = vmax.f32 %v2110_v40, 0.0  ;;  %v1264_v35 = vmul.f32 %v6432_v5, %v1111_v22 }
 0x1bb   : > { %v2342_v49 = vmax.f32 %v2102_v10, 0.0 }
 0x1bc   : > { %v2404_v32 = vpack.c.bf16 %v2344_v54, %v2343_v58  ;;  %1166 = vperm.xlu1 %5996, %v6538_v17   ;;  %v1785_v17 = vadd.f32 %v6891_v36, %v1714_v28  ;;  %v1328_v40 = vadd.f32 %v1264_v35, %v940_v3 }
 0x1bd   : > { %v2403_v42 = vpack.c.bf16 %v2342_v49, %v2341_v59  ;;  %v6110_v59 = vld [vmem:[%s6278_s24 + $0x190] sm:$0xff] }
 0x1be   : > { %v1487_v39 = vpop.permute.xlu1 %1486  ;;  %v1849_v43 = vmax.f32 %v1785_v17, 0.0 }
 0x1bf   : > { %v1649_v52 = vmul.f32 %v6436_v7, %v1487_v39  ;;  %2584 = vmatmul.mubr.bf16.gmra.mrb[4].mxu1 %v2402_v25  ;;  %v6953_v25 = vpop.permute.xlu0 %793 }
 0x1c0   : > { %5998 = vset.pattern.permute.xlu1 %v6179_v2  ;;  %2593 = vmatprep.mubr.bf16.mxu1 %v6179_v2 }
 0x1c1   : > { %v1713_v61 = vadd.f32 %v1649_v52, %v1325_v21  ;;  %838 = vperm.xlu1 %5998, %v567_v53  }
 0x1c2   : > { %v1495_v45 = vpop.permute.xlu1 %1494 }
 0x1c3   : > { %v1784_v13 = vadd.f32 %v6891_v36, %v1713_v61  ;;  %v1651_v16 = vmul.f32 %v6436_v7, %v1495_v45  ;;  %v6961_v50 = vpop.permute.xlu0 %803 }
 0x1c5   : > { %v1848_v34 = vmax.f32 %v1784_v13, 0.0  ;;  %v1715_v30 = vadd.f32 %v1651_v16, %v1327_v44  ;;  %5999 = vset.pattern.permute.xlu1 %v8711_v1 }
 0x1c6   : > { %1174 = vperm.xlu1 %5999, %v567_v53   ;;  %v1499_v46 = vpop.permute.xlu1 %1498 }
 0x1c7   : > { %v1652_v38 = vmul.f32 %v6436_v7, %v1499_v46  ;;  %2594 = vmatmul.mubr.bf16.gmra.mrb[8].mxu1 %v2403_v42  ;;  %v1896_v24 = vpack.c.bf16 %v1849_v43, %v1848_v34  ;;  %v1786_v9 = vadd.f32 %v6891_v36, %v1715_v30  ;;  %v6967_v28 = vpop.permute.xlu0 %828  ;;  %v941_v43 = vmul.f32 %v6439_v8, %v6933_v57 }
 0x1c8   : > { %2603 = vmatprep.mubr.bf16.mxu1 %v6179_v2  ;;  %v1653_v46 = vmul.f32 %v6436_v7, %v6796_v23 }
 0x1c9   : > { %v1716_v10 = vadd.f32 %v1652_v38, %v1328_v40  ;;  %5807 = vmatprep.mubr.msk.bf16.mxu0 %vm1951_vm1, %v1896_v24  ;;  %v1850_v54 = vmax.f32 %v1786_v9, 0.0 }
 0x1ca   : > { %6000 = vset.pattern.permute.xlu1 %v8712_v0 }
 0x1cb   : > { %v1787_v22 = vadd.f32 %v6891_v36, %v1716_v10  ;;  %1550 = vperm.xlu1 %6000, %v6917_v4   ;;  %v769_v58 = vpop.permute.xlu1 %768  ;;  %v6974_v61 = vpop.permute.xlu0 %833 }
 0x1cc   : > { %v942_v9 = vmul.f32 %v6439_v8, %v769_v58 }
 0x1cd   : > { %v1851_v47 = vmax.f32 %v1787_v22, 0.0 }
 0x1cf   : > { %2604 = vmatmul.mubr.bf16.gmra.mrb[12].mxu1 %v2404_v32  ;;  %1558 = vperm.xlu1 %6000, %v6110_v59   ;;  %v1897_v49 = vpack.c.bf16 %v1851_v47, %v1850_v54  ;;  %v1119_v30 = vpop.permute.xlu0 %1118 }
 0x1d0   : > { %v1115_v48 = vpop.permute.xlu1 %1114  ;;  %2613 = vmatprep.mubr.bf16.mxu1 %v6179_v2  ;;  %v1266_v57 = vmul.f32 %v6432_v5, %v1119_v30 }
 0x1d1   : > { %5808 = vmatmul.mubr.msk.bf16.gmra.mrb[32].mxu0 %vm1951_vm1, %v1897_v49  ;;  %v1265_v3 = vmul.f32 %v6432_v5, %v1115_v48 }
 0x1d2   : > { %v5785_v42 = vpop.f32.mrb[8].mxu0  ;;  %v1330_v59 = vadd.f32 %v1266_v57, %v942_v9  ;;  %v7015_v9 = vld [vmem:[%s6278_s24 + $0x1c0] sm:$0xff] }
 0x1d3   : > { %v2123_v39 = vadd.f32 %v5785_v42, %v6905_v41  ;;  %v2114_v6 = vpop.f32.mrb[9].mxu0  ;;  %1562 = vperm.xlu1 %6000, %v567_v53   ;;  %v1329_v40 = vadd.f32 %v1265_v3, %v941_v43  ;;  %v1123_v22 = vpop.permute.xlu0 %1122 }
 0x1d4   : > { %v2115_v4 = vadd.f32 %v6905_v41, %v2114_v6  ;;  %v5786_v21 = vpop.f32.mrb[10].mxu0  ;;  %v1267_v49 = vmul.f32 %v6432_v5, %v1123_v22 }
 0x1d5   : > { %v2126_v32 = vadd.f32 %v5786_v21, %v6905_v41  ;;  %v2117_v62 = vpop.f32.mrb[11].mxu0  ;;  %v774_v52 = vpop.permute.xlu1 %773  ;;  %v2347_v45 = vmax.f32 %v2123_v39, 0.0  ;;  %v1717_v54 = vadd.f32 %v1653_v46, %v1329_v40 }
 0x1d6   : > { %v2118_v17 = vadd.f32 %v6905_v41, %v2117_v62  ;;  %v2345_v35 = vmax.f32 %v2115_v4, 0.0  ;;  %v943_v48 = vmul.f32 %v6439_v8, %v774_v52 }
 0x1d7   : > { %v2348_v44 = vmax.f32 %v2126_v32, 0.0  ;;  %6001 = vset.pattern.permute.xlu1 %v6179_v2  ;;  %v1788_v42 = vadd.f32 %v6891_v36, %v1717_v54 }
 0x1d8   : > { %v2346_v13 = vmax.f32 %v2118_v17, 0.0  ;;  %848 = vperm.xlu1 %6001, %v6638_v55   ;;  %v1331_v4 = vadd.f32 %v1267_v49, %v943_v48  ;;  %v1139_v48 = vpop.permute.xlu0 %1138 }
 0x1d9   : > { %v2406_v53 = vpack.c.bf16 %v2348_v44, %v2347_v45  ;;  %v779_v16 = vpop.permute.xlu1 %778  ;;  %v1852_v62 = vmax.f32 %v1788_v42, 0.0 }
 0x1da   : > { %v2405_v34 = vpack.c.bf16 %v2346_v13, %v2345_v35  ;;  %v944_v10 = vmul.f32 %v6439_v8, %v779_v16 }
 0x1dc   : > { %2614 = vmatmul.mubr.bf16.gmra.mrb[16].mxu1 %v2405_v34  ;;  %6002 = vset.pattern.permute.xlu1 %v8711_v1 }
 0x1dd   : > { %1178 = vperm.xlu1 %6002, %v6766_v31   ;;  %2623 = vmatprep.mubr.bf16.mxu1 %v6179_v2  ;;  %v1656_v31 = vmul.f32 %v6436_v7, %v6806_v20 }
 0x1de   : > { %v1127_v38 = vpop.permute.xlu1 %1126 }
 0x1df   : > { %v1268_v24 = vmul.f32 %v6432_v5, %v1127_v38 }
 0x1e1   : > { %6003 = vset.pattern.permute.xlu1 %v6179_v2  ;;  %v1332_v47 = vadd.f32 %v1268_v24, %v944_v10 }
 0x1e2   : > { %853 = vperm.xlu1 %6003, %v6648_v29  }
 0x1e3   : > { %v1507_v23 = vpop.permute.xlu1 %1506  ;;  %v1720_v39 = vadd.f32 %v1656_v31, %v1332_v47 }
 0x1e4   : > { %v1654_v58 = vmul.f32 %v6436_v7, %v1507_v23  ;;  %2624 = vmatmul.mubr.bf16.gmra.mrb[20].mxu1 %v2406_v53  ;;  %v946_v23 = vmul.f32 %v6439_v8, %v6943_v14  ;;  %v7030_v14 = vpop.permute.xlu0 %1150 }
 0x1e5   : > { %2633 = vmatprep.mubr.bf16.mxu1 %v6179_v2  ;;  %v1791_v52 = vadd.f32 %v6891_v36, %v1720_v39  ;;  %v1658_v39 = vmul.f32 %v6436_v7, %v6812_v18 }
 0x1e6   : > { %v1718_v6 = vadd.f32 %v1654_v58, %v1330_v59  ;;  %858 = vperm.xlu1 %6003, %v6774_v12  }
 0x1e7   : > { %v1511_v20 = vpop.permute.xlu1 %1510  ;;  %v1855_v53 = vmax.f32 %v1791_v52, 0.0  ;;  %v575_v52 = vld [vmem:[%s6278_s24 + $0x1d8] sm:$0xff] }
 0x1e8   : > { %v1789_v21 = vadd.f32 %v6891_v36, %v1718_v6  ;;  %v1655_v32 = vmul.f32 %v6436_v7, %v1511_v20  ;;  %v947_v20 = vmul.f32 %v6439_v8, %v6953_v25  ;;  %v7041_v25 = vpop.permute.xlu0 %1154 }
 0x1ea   : > { %v1853_v17 = vmax.f32 %v1789_v21, 0.0  ;;  %v1719_v45 = vadd.f32 %v1655_v32, %v1331_v4  ;;  %6005 = vset.pattern.permute.xlu1 %v8711_v1  ;;  %v1271_v32 = vmul.f32 %v6432_v5, %v1139_v48 }
 0x1eb   : > { %1190 = vperm.xlu1 %6005, %v6774_v12  }
 0x1ec   : > { %v1790_v44 = vadd.f32 %v6891_v36, %v1719_v45  ;;  %v784_v35 = vpop.permute.xlu1 %783  ;;  %v1898_v13 = vpack.c.bf16 %v1853_v17, %v1852_v62  ;;  %v1335_v18 = vadd.f32 %v1271_v32, %v947_v20 }
 0x1ed   : > { %v945_v4 = vmul.f32 %v6439_v8, %v784_v35 }
 0x1ee   : > { %v1854_v16 = vmax.f32 %v1790_v44, 0.0  ;;  %5811 = vmatprep.mubr.msk.bf16.mxu0 %vm1951_vm1, %v1898_v13 }
 0x1ef   : > { %6006 = vset.pattern.permute.xlu1 %v8712_v0 }
 0x1f0   : > { %1570 = vperm.xlu1 %6006, %v6638_v55   ;;  %v1899_v43 = vpack.c.bf16 %v1855_v53, %v1854_v16 }
 0x1f1   : > { %v1131_v3 = vpop.permute.xlu1 %1130 }
 0x1f2   : > { %5812 = vmatmul.mubr.msk.bf16.gmra.mrb[36].mxu0 %vm1951_vm1, %v1899_v43  ;;  %v1269_v6 = vmul.f32 %v6432_v5, %v1131_v3 }
 0x1f3   : > { %v5789_v34 = vpop.f32.mrb[12].mxu0 }
 0x1f4   : > { %v2139_v12 = vadd.f32 %v5789_v34, %v6905_v41  ;;  %v2130_v30 = vpop.f32.mrb[13].mxu0  ;;  %1574 = vperm.xlu1 %6006, %v6648_v29   ;;  %v1333_v17 = vadd.f32 %v1269_v6, %v945_v4 }
 0x1f5   : > { %v2131_v46 = vadd.f32 %v6905_v41, %v2130_v30  ;;  %v5790_v40 = vpop.f32.mrb[14].mxu0  ;;  %v1135_v38 = vpop.permute.xlu1 %1134  ;;  %v6053_v30 = vld [vmem:[%s8701_s7] sm:$0xff]  }
 0x1f6   : > { %v2142_v24 = vadd.f32 %v5790_v40, %v6905_v41  ;;  %v2133_v57 = vpop.f32.mrb[15].mxu0  ;;  %v2351_v10 = vmax.f32 %v2139_v12, 0.0  ;;  %v1270_v59 = vmul.f32 %v6432_v5, %v1135_v38  ;;  %3315 = vmatpush1.bf16.msra.mxu0 %v6053_v30 }
 0x1f7   : > { %v2134_v55 = vadd.f32 %v6905_v41, %v2133_v57  ;;  %v2349_v31 = vmax.f32 %v2131_v46, 0.0  ;;  %v7052_v57 = vpop.permute.xlu0 %1170  ;;  %3316 = vmatprep.subr.bf16.mxu0 %v6179_v2 }
 0x1f8   : > { %v2352_v22 = vmax.f32 %v2142_v24, 0.0  ;;  %6007 = vset.pattern.permute.xlu1 %v6179_v2  ;;  %v1334_v58 = vadd.f32 %v1270_v59, %v946_v23  ;;  %v6055_v23 = vld [vmem:[%s8701_s7 + $0x10] sm:$0xff]  }
 0x1f9   : > { %v2350_v54 = vmax.f32 %v2134_v55, 0.0  ;;  %863 = vperm.xlu1 %6007, %v7015_v9  }
 0x1fa   : > { %v2408_v29 = vpack.c.bf16 %v2352_v22, %v2351_v10  ;;  %v799_v47 = vpop.permute.xlu1 %798  ;;  %v1722_v21 = vadd.f32 %v1658_v39, %v1334_v58  ;;  %v6054_v22 = vld [vmem:[%s8701_s7 + $0x8] sm:$0xff]  }
 0x1fb   : > { %v2407_v49 = vpack.c.bf16 %v2350_v54, %v2349_v31  ;;  %v948_v3 = vmul.f32 %v6439_v8, %v799_v47  ;;  %3317 = vmatpush1.bf16.msra.mxu0 %v6054_v22  ;;  %v7067_v59 = vpop.permute.xlu0 %1182 }
 0x1fc   : > { %3318 = vmatprep.subr.bf16.mxu0 %v6179_v2 }
 0x1fd   : > { %2634 = vmatmul.mubr.bf16.gmra.mrb[24].mxu1 %v2407_v49  ;;  %6008 = vset.pattern.permute.xlu1 %v8711_v1 }
 0x1fe   : > { %1194 = vperm.xlu1 %6008, %v7015_v9   ;;  %2643 = vmatprep.mubr.bf16.mxu1 %v6179_v2 }
 0x1ff   : > { %v1143_v42 = vpop.permute.xlu1 %1142  ;;  %3319 = vmatpush1.bf16.msra.mxu0 %v6055_v23  ;;  %v7076_v6 = vpop.permute.xlu0 %1186 }
 0x200   : > { %v1272_v13 = vmul.f32 %v6432_v5, %v1143_v42  ;;  %3320 = vmatprep.subr.bf16.mxu0 %v6179_v2 }
 0x202   : > { %1198 = vperm.xlu1 %6008, %v6787_v27   ;;  %v1793_v27 = vadd.f32 %v6891_v36, %v1722_v21  ;;  %v1336_v40 = vadd.f32 %v1272_v13, %v948_v3  ;;  %v6058_v13 = vld [vmem:[%s8701_s7 + $0x28] sm:$0xff]  }
 0x203   : > { %v1535_v3 = vpop.permute.xlu0 %1534 }
 0x204   : > { %v1519_v62 = vpop.permute.xlu1 %1518  ;;  %v1857_v43 = vmax.f32 %v1793_v27, 0.0  ;;  %v1661_v30 = vmul.f32 %v6436_v7, %v1535_v3 }
 0x205   : > { %v1657_v45 = vmul.f32 %v6436_v7, %v1519_v62  ;;  %2644 = vmatmul.mubr.bf16.gmra.mrb[28].mxu1 %v2408_v29  ;;  %v6057_v62 = vld [vmem:[%s8701_s7 + $0x20] sm:$0xff]  }
 0x206   : > { %6009 = vset.pattern.permute.xlu1 %v6179_v2  ;;  %2653 = vmatprep.mubr.bf16.mxu1 %v6179_v2 }
 0x207   : > { %v1721_v44 = vadd.f32 %v1657_v45, %v1333_v17  ;;  %878 = vperm.xlu1 %6009, %v575_v52  }
 0x208   : > { %v1527_v35 = vpop.permute.xlu1 %1526 }
 0x209   : > { %v1792_v53 = vadd.f32 %v6891_v36, %v1721_v44  ;;  %v1659_v16 = vmul.f32 %v6436_v7, %v1527_v35 }
 0x20b   : > { %v1856_v34 = vmax.f32 %v1792_v53, 0.0  ;;  %v1723_v12 = vadd.f32 %v1659_v16, %v1335_v18  ;;  %6010 = vset.pattern.permute.xlu1 %v8711_v1  ;;  %v949_v53 = vmul.f32 %v6439_v8, %v6961_v50 }
 0x20c   : > { %1206 = vperm.xlu1 %6010, %v575_v52   ;;  %v1531_v46 = vpop.permute.xlu1 %1530 }
 0x20d   : > { %v1900_v38 = vpack.c.bf16 %v1857_v43, %v1856_v34  ;;  %v1660_v24 = vmul.f32 %v6436_v7, %v1531_v46  ;;  %v1794_v55 = vadd.f32 %v6891_v36, %v1723_v12  ;;  %v6059_v34 = vld [vmem:[%s8701_s7 + $0x30] sm:$0xff]  }
 0x20f   : > { %v1724_v10 = vadd.f32 %v1660_v24, %v1336_v40  ;;  %5815 = vmatprep.mubr.msk.bf16.mxu0 %vm1951_vm1, %v1900_v38  ;;  %v1858_v29 = vmax.f32 %v1794_v55, 0.0  ;;  %v1547_v40 = vpop.permute.xlu0 %1546  ;;  %v1274_v38 = vmul.f32 %v6432_v5, %v7030_v14  ;;  %v6060_v55 = vld [vmem:[%s8701_s7 + $0x38] sm:$0xff]   ;;  %v1275_v14 = vmul.f32 %v6432_v5, %v7041_v25 }
 0x210   : > { %6011 = vset.pattern.permute.xlu1 %v8712_v0 }
 0x211   : > { %v1795_v31 = vadd.f32 %v6891_v36, %v1724_v10  ;;  %1582 = vperm.xlu1 %6011, %v7015_v9   ;;  %v809_v54 = vpop.permute.xlu1 %808  ;;  %v6056_v9 = vld [vmem:[%s8701_s7 + $0x18] sm:$0xff]  }
 0x212   : > { %3321 = vmatpush1.bf16.msra.mxu0 %v6056_v9 }
 0x213   : > { %v1859_v47 = vmax.f32 %v1795_v31, 0.0  ;;  %3322 = vmatprep.subr.bf16.mxu0 %v6179_v2  ;;  %v1664_v31 = vmul.f32 %v6436_v7, %v1547_v40 }
 0x215   : > { %v1901_v49 = vpack.c.bf16 %v1859_v47, %v1858_v29  ;;  %1590 = vperm.xlu1 %6011, %v6845_v11  }
 0x216   : > { %v1147_v48 = vpop.permute.xlu1 %1146  ;;  %3323 = vmatpush1.bf16.msra.mxu0 %v6057_v62 }
 0x217   : > { %5816 = vmatmul.mubr.msk.bf16.gmra.mrb[40].mxu0 %vm1951_vm1, %v1901_v49  ;;  %3324 = vmatprep.subr.bf16.mxu0 %v6179_v2  ;;  %v1273_v16 = vmul.f32 %v6432_v5, %v1147_v48  ;;  %v6061_v49 = vld [vmem:[%s8701_s7 + $0x40] sm:$0xff]  }
 0x218   : > { %v5793_v58 = vpop.f32.mrb[16].mxu0 }
 0x219   : > { %v2155_v42 = vadd.f32 %v5793_v58, %v6905_v41  ;;  %v2146_v39 = vpop.f32.mrb[17].mxu0  ;;  %1594 = vperm.xlu1 %6011, %v575_v52   ;;  %v1337_v12 = vadd.f32 %v1273_v16, %v949_v53 }
 0x21a   : > { %v2147_v11 = vadd.f32 %v6905_v41, %v2146_v39  ;;  %v5794_v20 = vpop.f32.mrb[18].mxu0  ;;  %3325 = vmatpush1.bf16.msra.mxu0 %v6058_v13  ;;  %v6064_v13 = vld [vmem:[%s8701_s7 + $0x58] sm:$0xff]  }
 0x21b   : > { %v2158_v4 = vadd.f32 %v5794_v20, %v6905_v41  ;;  %v2149_v21 = vpop.f32.mrb[19].mxu0  ;;  %v814_v32 = vpop.permute.xlu1 %813  ;;  %v2355_v45 = vmax.f32 %v2155_v42, 0.0  ;;  %3326 = vmatprep.subr.bf16.mxu0 %v6179_v2  ;;  %v1725_v10 = vadd.f32 %v1661_v30, %v1337_v12  ;;  %v6062_v20 = vld [vmem:[%s8701_s7 + $0x48] sm:$0xff]   ;;  %v6065_v12 = vld [vmem:[%s8701_s7 + $0x60] sm:$0xff]  }
 0x21c   : > { %v2150_v17 = vadd.f32 %v6905_v41, %v2149_v21  ;;  %v2353_v27 = vmax.f32 %v2147_v11, 0.0  ;;  %v951_v47 = vmul.f32 %v6439_v8, %v814_v32 }
 0x21d   : > { %v2356_v52 = vmax.f32 %v2158_v4, 0.0  ;;  %6014 = vset.pattern.permute.xlu1 %v6179_v2  ;;  %v1796_v48 = vadd.f32 %v6891_v36, %v1725_v10 }
 0x21e   : > { %v2354_v18 = vmax.f32 %v2150_v17, 0.0  ;;  %888 = vperm.xlu1 %6014, %v6870_v37   ;;  %3327 = vmatpush1.bf16.msra.mxu0 %v6059_v34  ;;  %v1339_v42 = vadd.f32 %v1275_v14, %v951_v47  ;;  %v1555_v14 = vpop.permute.xlu0 %1554 }
 0x21f   : > { %v2410_v44 = vpack.c.bf16 %v2356_v52, %v2355_v45  ;;  %v819_v35 = vpop.permute.xlu1 %818  ;;  %3328 = vmatprep.subr.bf16.mxu0 %v6179_v2  ;;  %v1860_v4 = vmax.f32 %v1796_v48, 0.0 }
 0x220   : > { %v2409_v43 = vpack.c.bf16 %v2354_v18, %v2353_v27  ;;  %v952_v24 = vmul.f32 %v6439_v8, %v819_v35  ;;  %v6063_v27 = vld [vmem:[%s8701_s7 + $0x50] sm:$0xff]  }
 0x222   : > { %2654 = vmatmul.mubr.bf16.gmra.mrb[32].mxu1 %v2409_v43  ;;  %6015 = vset.pattern.permute.xlu1 %v8711_v1 }
 0x223   : > { %1210 = vperm.xlu1 %6015, %v6850_v15   ;;  %2663 = vmatprep.mubr.bf16.mxu1 %v6179_v2  ;;  %v950_v15 = vmul.f32 %v6439_v8, %v809_v54 }
 0x224   : > { %v1159_v50 = vpop.permute.xlu1 %1158  ;;  %3329 = vmatpush1.bf16.msra.mxu0 %v6060_v55 }
 0x225   : > { %v1276_v46 = vmul.f32 %v6432_v5, %v1159_v50  ;;  %v1338_v29 = vadd.f32 %v1274_v38, %v950_v15  ;;  %3330 = vmatprep.subr.bf16.mxu0 %v6179_v2 }
 0x227   : > { %6016 = vset.pattern.permute.xlu1 %v6179_v2  ;;  %v1340_v22 = vadd.f32 %v1276_v46, %v952_v24  ;;  %v6066_v24 = vld [vmem:[%s8701_s7 + $0x68] sm:$0xff]  }
 0x228   : > { %893 = vperm.xlu1 %6016, %v6881_v33   ;;  %3331 = vmatpush1.bf16.msra.mxu0 %v6061_v49 }
 0x229   : > { %v1539_v54 = vpop.permute.xlu1 %1538  ;;  %v1728_v9 = vadd.f32 %v1664_v31, %v1340_v22  ;;  %3332 = vmatprep.subr.bf16.mxu0 %v6179_v2 }
 0x22a   : > { %v1662_v23 = vmul.f32 %v6436_v7, %v1539_v54  ;;  %2664 = vmatmul.mubr.bf16.gmra.mrb[36].mxu1 %v2410_v44  ;;  %v954_v54 = vmul.f32 %v6439_v8, %v6967_v28  ;;  %v6068_v28 = vld [vmem:[%s8701_s7 + $0x78] sm:$0xff]  }
 0x22b   : > { %2673 = vmatprep.mubr.bf16.mxu1 %v6179_v2  ;;  %v1799_v21 = vadd.f32 %v6891_v36, %v1728_v9 }
 0x22c   : > { %v1726_v25 = vadd.f32 %v1662_v23, %v1338_v29  ;;  %898 = vperm.xlu1 %6016, %v6908_v19   ;;  %3333 = vmatpush1.bf16.msra.mxu0 %v6062_v20  ;;  %v6067_v29 = vld [vmem:[%s8701_s7 + $0x70] sm:$0xff]   ;;  %v1666_v23 = vmul.f32 %v6436_v7, %v1555_v14 }
 0x22d   : > { %v1543_v58 = vpop.permute.xlu1 %1542  ;;  %3334 = vmatprep.subr.bf16.mxu0 %v6179_v2  ;;  %v1863_v18 = vmax.f32 %v1799_v21, 0.0 }
 0x22e   : > { %v1797_v39 = vadd.f32 %v6891_v36, %v1726_v25  ;;  %v1663_v11 = vmul.f32 %v6436_v7, %v1543_v58 }
 0x230   : > { %v1861_v32 = vmax.f32 %v1797_v39, 0.0  ;;  %v1727_v62 = vadd.f32 %v1663_v11, %v1339_v42  ;;  %6017 = vset.pattern.permute.xlu1 %v8711_v1  ;;  %3335 = vmatpush1.bf16.msra.mxu0 %v6063_v27  ;;  %v955_v42 = vmul.f32 %v6439_v8, %v6974_v61  ;;  %v1279_v39 = vmul.f32 %v6432_v5, %v7052_v57 }
 0x231   : > { %1222 = vperm.xlu1 %6017, %v6908_v19   ;;  %3336 = vmatprep.subr.bf16.mxu0 %v6179_v2 }
 0x232   : > { %v1902_v17 = vpack.c.bf16 %v1861_v32, %v1860_v4  ;;  %v1798_v45 = vadd.f32 %v6891_v36, %v1727_v62  ;;  %v824_v52 = vpop.permute.xlu1 %823  ;;  %v1343_v62 = vadd.f32 %v1279_v39, %v955_v42 }
 0x233   : > { %v953_v9 = vmul.f32 %v6439_v8, %v824_v52 }
 0x234   : > { %v1862_v44 = vmax.f32 %v1798_v45, 0.0  ;;  %5819 = vmatprep.mubr.msk.bf16.mxu0 %vm1951_vm1, %v1902_v17  ;;  %3337 = vmatpush1.bf16.msra.mxu0 %v6064_v13 }
 0x235   : > { %6019 = vset.pattern.permute.xlu1 %v8712_v0  ;;  %3338 = vmatprep.subr.bf16.mxu0 %v6179_v2 }
 0x236   : > { %v1903_v35 = vpack.c.bf16 %v1863_v18, %v1862_v44  ;;  %1602 = vperm.xlu1 %6019, %v6870_v37   ;;  %v1567_v44 = vpop.permute.xlu0 %1566 }
 0x237   : > { %v1163_v19 = vpop.permute.xlu1 %1162  ;;  %v1669_v42 = vmul.f32 %v6436_v7, %v1567_v44 }
 0x238   : > { %5820 = vmatmul.mubr.msk.bf16.gmra.mrb[44].mxu0 %vm1951_vm1, %v1903_v35  ;;  %v1277_v48 = vmul.f32 %v6432_v5, %v1163_v19 }
 0x239   : > { %v5797_v53 = vpop.f32.mrb[20].mxu0  ;;  %3339 = vmatpush1.bf16.msra.mxu0 %v6065_v12 }
 0x23a   : > { %v2171_v16 = vadd.f32 %v5797_v53, %v6905_v41  ;;  %v2162_v43 = vpop.f32.mrb[21].mxu0  ;;  %1606 = vperm.xlu1 %6019, %v6881_v33   ;;  %3340 = vmatprep.subr.bf16.mxu0 %v6179_v2  ;;  %v1341_v11 = vadd.f32 %v1277_v48, %v953_v9 }
 0x23b   : > { %v2163_v37 = vadd.f32 %v6905_v41, %v2162_v43  ;;  %v5798_v3 = vpop.f32.mrb[22].mxu0  ;;  %v1167_v34 = vpop.permute.xlu1 %1166 }
 0x23c   : > { %v2174_v30 = vadd.f32 %v5798_v3, %v6905_v41  ;;  %v2165_v50 = vpop.f32.mrb[23].mxu0  ;;  %v2359_v40 = vmax.f32 %v2171_v16, 0.0  ;;  %v1278_v22 = vmul.f32 %v6432_v5, %v1167_v34  ;;  %v1579_v3 = vpop.permute.xlu0 %1578 }
 0x23d   : > { %v2166_v46 = vadd.f32 %v6905_v41, %v2165_v50  ;;  %v2357_v33 = vmax.f32 %v2163_v37, 0.0  ;;  %3341 = vmatpush1.bf16.msra.mxu0 %v6066_v24 }
 0x23e   : > { %v2360_v38 = vmax.f32 %v2174_v30, 0.0  ;;  %6020 = vset.pattern.permute.xlu1 %v6179_v2  ;;  %3342 = vmatprep.subr.bf16.mxu0 %v6179_v2  ;;  %v1342_v47 = vadd.f32 %v1278_v22, %v954_v54 }
 0x23f   : > { %v2358_v15 = vmax.f32 %v2166_v46, 0.0 }
 0x240   : > { %v2412_v55 = vpack.c.bf16 %v2360_v38, %v2359_v40  ;;  %v839_v10 = vpop.permute.xlu1 %838  ;;  %v1730_v25 = vadd.f32 %v1666_v23, %v1342_v47  ;;  %v7191_v40 = vpop.permute.xlu0 %1586 }
 0x241   : > { %v2411_v31 = vpack.c.bf16 %v2358_v15, %v2357_v33  ;;  %3343 = vmatpush1.bf16.msra.mxu0 %v6067_v29  ;;  %v956_v57 = vmul.f32 %v6439_v8, %v839_v10 }
 0x242   : > { %3344 = vmatprep.subr.bf16.mxu0 %v6179_v2  ;;  %v1801_v4 = vadd.f32 %v6891_v36, %v1730_v25 }
 0x243   : > { %2674 = vmatmul.mubr.bf16.gmra.mrb[40].mxu1 %v2411_v31 }
 0x244   : > { %2683 = vmatprep.mubr.bf16.mxu1 %v6179_v2  ;;  %v1865_v52 = vmax.f32 %v1801_v4, 0.0  ;;  %v844_v54 = vpop.permute.xlu0 %843 }
 0x245   : > { %v1175_v49 = vpop.permute.xlu1 %1174  ;;  %3345 = vmatpush1.bf16.msra.mxu0 %v6068_v28  ;;  %v957_v9 = vmul.f32 %v6439_v8, %v844_v54 }
 0x246   : > { %v1280_v17 = vmul.f32 %v6432_v5, %v1175_v49 }
 0x248   : > { %v1344_v19 = vadd.f32 %v1280_v17, %v956_v57 }
 0x24a   : > { %v1551_v58 = vpop.permute.xlu1 %1550 }
 0x24b   : > { %v1665_v20 = vmul.f32 %v6436_v7, %v1551_v58  ;;  %2684 = vmatmul.mubr.bf16.gmra.mrb[44].mxu1 %v2412_v55 }
 0x24c   : > { %2693 = vmatprep.mubr.bf16.mxu1 %v6179_v2 }
 0x24d   : > { %v1729_v21 = vadd.f32 %v1665_v20, %v1341_v11 }
 0x24e   : > { %v1559_v32 = vpop.permute.xlu1 %1558 }
 0x24f   : > { %v1800_v45 = vadd.f32 %v6891_v36, %v1729_v21  ;;  %v1667_v61 = vmul.f32 %v6436_v7, %v1559_v32  ;;  %v1282_v32 = vmul.f32 %v6432_v5, %v7067_v59 }
 0x251   : > { %v1864_v27 = vmax.f32 %v1800_v45, 0.0  ;;  %v1731_v18 = vadd.f32 %v1667_v61, %v1343_v62  ;;  %v1672_v62 = vmul.f32 %v6436_v7, %v1579_v3 }
 0x252   : > { %v1563_v35 = vpop.permute.xlu1 %1562 }
 0x253   : > { %v1904_v13 = vpack.c.bf16 %v1865_v52, %v1864_v27  ;;  %v1668_v53 = vmul.f32 %v6436_v7, %v1563_v35  ;;  %v1802_v16 = vadd.f32 %v6891_v36, %v1731_v18  ;;  %v1283_v18 = vmul.f32 %v6432_v5, %v7076_v6 }
 0x255   : > { %v1732_v43 = vadd.f32 %v1668_v53, %v1344_v19  ;;  %5823 = vmatprep.mubr.msk.bf16.mxu0 %vm1951_vm1, %v1904_v13  ;;  %v1866_v12 = vmax.f32 %v1802_v16, 0.0 }
 0x257   : > { %v1803_v37 = vadd.f32 %v6891_v36, %v1732_v43  ;;  %v849_v34 = vpop.permute.xlu1 %848 }
 0x258   : > { %v958_v4 = vmul.f32 %v6439_v8, %v849_v34 }
 0x259   : > { %v1867_v30 = vmax.f32 %v1803_v37, 0.0 }
 0x25a   : > { %v1346_v52 = vadd.f32 %v1282_v32, %v958_v4 }
 0x25b   : > { %v1905_v50 = vpack.c.bf16 %v1867_v30, %v1866_v12 }
 0x25c   : > { %v1179_v46 = vpop.permute.xlu1 %1178 }
 0x25d   : > { %5824 = vmatmul.mubr.msk.bf16.gmra.mrb[48].mxu0 %vm1951_vm1, %v1905_v50  ;;  %v1281_v25 = vmul.f32 %v6432_v5, %v1179_v46 }
 0x25e   : > { %v5801_v38 = vpop.f32.mrb[24].mxu0 }
 0x25f   : > { %v2187_v33 = vadd.f32 %v5801_v38, %v6905_v41  ;;  %v2178_v15 = vpop.f32.mrb[25].mxu0  ;;  %v1345_v39 = vadd.f32 %v1281_v25, %v957_v9 }
 0x260   : > { %v2179_v24 = vadd.f32 %v6905_v41, %v2178_v15  ;;  %v5802_v55 = vpop.f32.mrb[26].mxu0 }
 0x261   : > { %v2190_v10 = vadd.f32 %v5802_v55, %v6905_v41  ;;  %v2181_v22 = vpop.f32.mrb[27].mxu0  ;;  %v854_v31 = vpop.permute.xlu1 %853  ;;  %v2363_v29 = vmax.f32 %v2187_v33, 0.0  ;;  %v1733_v17 = vadd.f32 %v1669_v42, %v1345_v39 }
 0x262   : > { %v2182_v14 = vadd.f32 %v6905_v41, %v2181_v22  ;;  %v2361_v23 = vmax.f32 %v2179_v24, 0.0  ;;  %v959_v57 = vmul.f32 %v6439_v8, %v854_v31  ;;  %v869_v33 = vpop.permute.xlu0 %868 }
 0x263   : > { %v2364_v47 = vmax.f32 %v2190_v10, 0.0  ;;  %v1804_v44 = vadd.f32 %v6891_v36, %v1733_v17  ;;  %v962_v25 = vmul.f32 %v6439_v8, %v869_v33 }
 0x264   : > { %v2362_v49 = vmax.f32 %v2182_v14, 0.0  ;;  %v1347_v13 = vadd.f32 %v1283_v18, %v959_v57 }
 0x265   : > { %v2414_v48 = vpack.c.bf16 %v2364_v47, %v2363_v29  ;;  %v859_v28 = vpop.permute.xlu1 %858  ;;  %v1868_v43 = vmax.f32 %v1804_v44, 0.0 }
 0x266   : > { %v2413_v58 = vpack.c.bf16 %v2362_v49, %v2361_v23  ;;  %v960_v21 = vmul.f32 %v6439_v8, %v859_v28  ;;  %v874_v22 = vpop.permute.xlu0 %873 }
 0x268   : > { %2694 = vmatmul.mubr.bf16.gmra.mrb[48].mxu1 %v2413_v58 }
 0x269   : > { %2703 = vmatprep.mubr.bf16.mxu1 %v6179_v2 }
 0x26a   : > { %v1191_v11 = vpop.permute.xlu1 %1190 }
 0x26b   : > { %v1284_v20 = vmul.f32 %v6432_v5, %v1191_v11  ;;  %v7229_v11 = vpop.permute.xlu0 %883 }
 0x26d   : > { %v1348_v45 = vadd.f32 %v1284_v20, %v960_v21 }
 0x26f   : > { %v1571_v61 = vpop.permute.xlu1 %1570  ;;  %v1736_v35 = vadd.f32 %v1672_v62, %v1348_v45 }
 0x270   : > { %v1670_v27 = vmul.f32 %v6436_v7, %v1571_v61  ;;  %2704 = vmatmul.mubr.bf16.gmra.mrb[52].mxu1 %v2414_v48  ;;  %v2449_v48 = vld [vmem:[%s8700_s6] sm:$0x3]  ;;  %v1674_v61 = vmul.f32 %v6436_v7, %v7191_v40 }
 0x271   : > { %2713 = vmatprep.mubr.bf16.mxu1 %v6179_v2  ;;  %v1807_v37 = vadd.f32 %v6891_v36, %v1736_v35  ;;  %v7232_v4 = vrot.slane %v2449_v48, %v6421_v63 }
 0x272   : > { %v1734_v59 = vadd.f32 %v1670_v27, %v1346_v52  ;;  %v1203_v27 = vpop.permute.xlu0 %1202 }
 0x273   : > { %v1575_v19 = vpop.permute.xlu1 %1574  ;;  %v1871_v6 = vmax.f32 %v1807_v37, 0.0  ;;  %v1287_v40 = vmul.f32 %v6432_v5, %v1203_v27 }
 0x274   : > { %v1805_v53 = vadd.f32 %v6891_v36, %v1734_v59  ;;  %v1671_v16 = vmul.f32 %v6436_v7, %v1575_v19  ;;  %v963_v59 = vmul.f32 %v6439_v8, %v874_v22 }
 0x276   : > { %v1869_v3 = vmax.f32 %v1805_v53, 0.0  ;;  %v1735_v34 = vadd.f32 %v1671_v16, %v1347_v13 }
 0x278   : > { %v1906_v12 = vpack.c.bf16 %v1869_v3, %v1868_v43  ;;  %v1806_v30 = vadd.f32 %v6891_v36, %v1735_v34  ;;  %v864_v50 = vpop.permute.xlu1 %863 }
 0x279   : > { %v961_v13 = vmul.f32 %v6439_v8, %v864_v50 }
 0x27a   : > { %v1870_v46 = vmax.f32 %v1806_v30, 0.0  ;;  %5827 = vmatprep.mubr.msk.bf16.mxu0 %vm1951_vm1, %v1906_v12 }
 0x27c   : > { %v1907_v38 = vpack.c.bf16 %v1871_v6, %v1870_v46  ;;  %v7255_v6 = vld [vmem:[%s8696_s2] ss:$0 sm:$0xff] }
 0x27d   : > { %v1195_v15 = vpop.permute.xlu1 %1194 }
 0x27e   : > { %5828 = vmatmul.mubr.msk.bf16.gmra.mrb[52].mxu0 %vm1951_vm1, %v1907_v38  ;;  %v1285_v18 = vmul.f32 %v6432_v5, %v1195_v15  ;;  %v1351_v15 = vadd.f32 %v1287_v40, %v963_v59  ;;  %v7282_v59 = vpop.permute.xlu0 %1214 }
 0x27f   : > { %v5805_v24 = vpop.f32.mrb[28].mxu0 }
 0x280   : > { %v2203_v55 = vadd.f32 %v5805_v24, %v6905_v41  ;;  %v2194_v10 = vpop.f32.mrb[29].mxu0  ;;  %v1349_v34 = vadd.f32 %v1285_v18, %v961_v13 }
 0x281   : > { %v2195_v31 = vadd.f32 %v6905_v41, %v2194_v10  ;;  %v5806_v14 = vpop.f32.mrb[30].mxu0  ;;  %v1199_v54 = vpop.permute.xlu1 %1198 }
 0x282   : > { %v2206_v36 = vadd.f32 %v5806_v14, %v6905_v41  ;;  %v2197_v29 = vpop.f32.mrb[31].mxu0  ;;  %v2367_v23 = vmax.f32 %v2203_v55, 0.0  ;;  %v1286_v42 = vmul.f32 %v6432_v5, %v1199_v54 }
 0x283   : > { %v2198_v47 = vadd.f32 %v6905_v41, %v2197_v29  ;;  %v2365_v28 = vmax.f32 %v2195_v31, 0.0  ;;  %v7236_v41 = vrot.slane %v2449_v48, %v1227_v60 }
 0x284   : > { %v2368_v49 = vmax.f32 %v2206_v36, 0.0  ;;  %v1350_v21 = vadd.f32 %v1286_v42, %v962_v25 }
 0x285   : > { %v2366_v9 = vmax.f32 %v2198_v47, 0.0 }
 0x286   : > { %v2416_v58 = vpack.c.bf16 %v2368_v49, %v2367_v23  ;;  %v879_v39 = vpop.permute.xlu1 %878  ;;  %v1738_v35 = vadd.f32 %v1674_v61, %v1350_v21 }
 0x287   : > { %v2415_v20 = vpack.c.bf16 %v2366_v9, %v2365_v28  ;;  %v964_v49 = vmul.f32 %v6439_v8, %v879_v39 }
 0x288   : > { %v1809_v50 = vadd.f32 %v7255_v6, %v1738_v35 }
 0x289   : > { %2714 = vmatmul.mubr.bf16.gmra.mrb[56].mxu1 %v2415_v20 }
 0x28a   : > { %v2575_v32 = vpop.f32.mrb[0].mxu1  ;;  %2723 = vmatprep.mubr.bf16.mxu1 %v6179_v2  ;;  %v1873_v23 = vmax.f32 %v1809_v50, 0.0 }
 0x28b   : > { %v2576_v62 = vadd.f32 %v2575_v32, %v7232_v4  ;;  %v2577_v17 = vpop.f32.mrb[1].mxu1  ;;  %v1207_v45 = vpop.permute.xlu1 %1206 }
 0x28c   : > { %v2578_v52 = vadd.f32 %v2577_v17, %v7236_v41  ;;  %v2579_v57 = vpop.f32.mrb[2].mxu1  ;;  %v1288_v14 = vmul.f32 %v6432_v5, %v1207_v45 }
 0x28d   : > { %v2580_v60 = vadd.f32 %v2579_v57, %v7232_v4  ;;  %v2581_v44 = vpop.f32.mrb[3].mxu1  ;;  %v2894_v53 = vmax.f32 %v2576_v62, 0.0 }
 0x28e   : > { %v2582_v19 = vadd.f32 %v2581_v44, %v7236_v41  ;;  %v2895_v43 = vmax.f32 %v2578_v52, 0.0  ;;  %v1352_v32 = vadd.f32 %v1288_v14, %v964_v49  ;;  %v7305_v49 = vld [vmem:[%s8698_s4] ss:$0 sm:$0xff] }
 0x28f   : > { %v2896_v16 = vmax.f32 %v2580_v60, 0.0 }
 0x290   : > { %v2897_v37 = vmax.f32 %v2582_v19, 0.0  ;;  %v1583_v3 = vpop.permute.xlu1 %1582 }
 0x291   : > { %v7249_v12 = vpack.c.bf16 %v2896_v16, %v2894_v53  ;;  %v1673_v30 = vmul.f32 %v6436_v7, %v1583_v3  ;;  %2724 = vmatmul.mubr.bf16.gmra.mrb[60].mxu1 %v2416_v58 }
 0x292   : > { %v7258_v46 = vpack.c.bf16 %v2897_v37, %v2895_v43  ;;  %v2585_v38 = vpop.f32.mrb[4].mxu1  ;;  %2733 = vmatprep.mubr.bf16.mxu1 %v6179_v2 }
 0x293   : > { %v1737_v33 = vadd.f32 %v1673_v30, %v1349_v34  ;;  %v2586_v24 = vadd.f32 %v2585_v38, %v7232_v4  ;;  %v2587_v55 = vpop.f32.mrb[5].mxu1 }
 0x294   : > { %v2588_v10 = vadd.f32 %v2587_v55, %v7236_v41  ;;  %v2589_v22 = vpop.f32.mrb[6].mxu1  ;;  %v1591_v31 = vpop.permute.xlu1 %1590 }
 0x295   : > { %v1808_v54 = vadd.f32 %v7255_v6, %v1737_v33  ;;  %v2590_v36 = vadd.f32 %v2589_v22, %v7232_v4  ;;  %v1675_v29 = vmul.f32 %v6436_v7, %v1591_v31  ;;  %v2591_v47 = vpop.f32.mrb[7].mxu1  ;;  %v2898_v9 = vmax.f32 %v2586_v24, 0.0  ;;  %v1219_v31 = vpop.permute.xlu0 %1218 }
 0x296   : > { %v2592_v48 = vadd.f32 %v2591_v47, %v7236_v41  ;;  %v2899_v42 = vmax.f32 %v2588_v10, 0.0 }
 0x297   : > { %v1872_v28 = vmax.f32 %v1808_v54, 0.0  ;;  %v2900_v25 = vmax.f32 %v2590_v36, 0.0  ;;  %v1739_v58 = vadd.f32 %v1675_v29, %v1351_v15 }
 0x298   : > { %v2901_v20 = vmax.f32 %v2592_v48, 0.0  ;;  %v1595_v21 = vpop.permute.xlu1 %1594 }
 0x299   : > { %v1908_v62 = vpack.c.bf16 %v1873_v23, %v1872_v28  ;;  %v7269_v17 = vpack.c.bf16 %v2900_v25, %v2898_v9  ;;  %v1676_v45 = vmul.f32 %v6436_v7, %v1595_v21  ;;  %v1810_v57 = vadd.f32 %v7255_v6, %v1739_v58 }
 0x29a   : > { %v7272_v61 = vpack.c.bf16 %v2901_v20, %v2899_v42  ;;  %v2595_v52 = vpop.f32.mrb[8].mxu1 }
 0x29b   : > { %v3086_v39 = vmax.bf16 %v7269_v17, %v7249_v12  ;;  %v1740_v27 = vadd.f32 %v1676_v45, %v1352_v32  ;;  %v2596_v18 = vadd.f32 %v2595_v52, %v7232_v4  ;;  %5831 = vmatprep.mubr.msk.bf16.mxu0 %vm1951_vm1, %v1908_v62  ;;  %v2597_v60 = vpop.f32.mrb[9].mxu1  ;;  %v1874_v37 = vmax.f32 %v1810_v57, 0.0 }
 0x29c   : > { %v3111_v44 = vmax.bf16 %v7272_v61, %v7258_v46  ;;  %v2598_v35 = vadd.f32 %v2597_v60, %v7236_v41  ;;  %v2599_v19 = vpop.f32.mrb[10].mxu1 }
 0x29d   : > { %v1811_v13 = vadd.f32 %v7255_v6, %v1740_v27  ;;  %v2600_v53 = vadd.f32 %v2599_v19, %v7232_v4  ;;  %v2601_v16 = vpop.f32.mrb[11].mxu1  ;;  %v7286_v40 = vpop.permute.xlu1 %888  ;;  %v2902_v34 = vmax.f32 %v2596_v18, 0.0 }
 0x29e   : > { %v2602_v43 = vadd.f32 %v2601_v16, %v7236_v41  ;;  %v2903_v50 = vmax.f32 %v2598_v35, 0.0  ;;  %v1599_v16 = vpop.permute.xlu0 %1598 }
 0x29f   : > { %v1875_v3 = vmax.f32 %v1811_v13, 0.0  ;;  %v2904_v30 = vmax.f32 %v2600_v53, 0.0 }
 0x2a0   : > { %v2905_v38 = vmax.f32 %v2602_v43, 0.0 }
 0x2a1   : > { %v1909_v33 = vpack.c.bf16 %v1875_v3, %v1874_v37  ;;  %v7289_v15 = vpack.c.bf16 %v2904_v30, %v2902_v34 }
 0x2a2   : > { %v7291_v24 = vpack.c.bf16 %v2905_v38, %v2903_v50  ;;  %v2605_v55 = vpop.f32.mrb[12].mxu1  ;;  %v1211_v10 = vpop.permute.xlu1 %1210  ;;  %v965_v50 = vmul.f32 %v6439_v8, %v7229_v11  ;;  %v1290_v11 = vmul.f32 %v6432_v5, %v7282_v59 }
 0x2a3   : > { %v7294_v22 = vmax.bf16 %v3086_v39, %v7289_v15  ;;  %v2606_v14 = vadd.f32 %v2605_v55, %v7232_v4  ;;  %5832 = vmatmul.mubr.msk.bf16.gmra.mrb[56].mxu0 %vm1951_vm1, %v1909_v33  ;;  %v2607_v54 = vpop.f32.mrb[13].mxu1  ;;  %v1289_v53 = vmul.f32 %v6432_v5, %v1211_v10  ;;  %v1677_v33 = vmul.f32 %v6436_v7, %v1599_v16 }
 0x2a4   : > { %v7299_v36 = vmax.bf16 %v3111_v44, %v7291_v24  ;;  %v2608_v29 = vadd.f32 %v2607_v54, %v7236_v41  ;;  %v5809_v47 = vpop.f32.mrb[32].mxu0  ;;  %v2609_v23 = vpop.f32.mrb[14].mxu1 }
 0x2a5   : > { %v2219_v48 = vadd.f32 %v7305_v49, %v5809_v47  ;;  %v2610_v28 = vadd.f32 %v2609_v23, %v7232_v4  ;;  %v2210_v9 = vpop.f32.mrb[33].mxu0  ;;  %v2611_v25 = vpop.f32.mrb[15].mxu1  ;;  %v2906_v21 = vmax.f32 %v2606_v14, 0.0  ;;  %v1353_v38 = vadd.f32 %v1289_v53, %v965_v50 }
 0x2a6   : > { %v2211_v58 = vadd.f32 %v7305_v49, %v2210_v9  ;;  %v2612_v42 = vadd.f32 %v2611_v25, %v7236_v41  ;;  %v5810_v20 = vpop.f32.mrb[34].mxu0  ;;  %v2907_v39 = vmax.f32 %v2608_v29, 0.0  ;;  %v1611_v14 = vpop.permute.xlu0 %1610 }
 0x2a7   : > { %v2908_v32 = vmax.f32 %v2610_v28, 0.0  ;;  %v2222_v62 = vadd.f32 %v7305_v49, %v5810_v20  ;;  %v2213_v45 = vpop.f32.mrb[35].mxu0  ;;  %v894_v52 = vpop.permute.xlu1 %893  ;;  %v2371_v18 = vmax.f32 %v2219_v48, 0.0  ;;  %v966_v48 = vmul.f32 %v6439_v8, %v7286_v40 }
 0x2a8   : > { %v2909_v57 = vmax.f32 %v2612_v42, 0.0  ;;  %v2214_v27 = vadd.f32 %v7305_v49, %v2213_v45  ;;  %v2369_v35 = vmax.f32 %v2211_v58, 0.0  ;;  %v1741_v25 = vadd.f32 %v1677_v33, %v1353_v38 }
 0x2a9   : > { %v7313_v60 = vpack.c.bf16 %v2908_v32, %v2906_v21  ;;  %v2372_v44 = vmax.f32 %v2222_v62, 0.0  ;;  %v1680_v42 = vmul.f32 %v6436_v7, %v1611_v14  ;;  %v1291_v62 = vmul.f32 %v6432_v5, %v1219_v31 }
 0x2aa   : > { %v7315_v19 = vpack.c.bf16 %v2909_v57, %v2907_v39  ;;  %v2370_v13 = vmax.f32 %v2214_v27, 0.0  ;;  %v1354_v59 = vadd.f32 %v1290_v11, %v966_v48  ;;  %v967_v27 = vmul.f32 %v6439_v8, %v894_v52 }
 0x2ab   : > { %v3088_v43 = vmax.bf16 %v7294_v22, %v7313_v60  ;;  %v2418_v37 = vpack.c.bf16 %v2372_v44, %v2371_v18  ;;  %v899_v3 = vpop.permute.xlu1 %898  ;;  %v1812_v44 = vadd.f32 %v7255_v6, %v1741_v25 }
 0x2ac   : > { %v3113_v34 = vmax.bf16 %v7299_v36, %v7315_v19  ;;  %v2417_v30 = vpack.c.bf16 %v2370_v13, %v2369_v35  ;;  %v968_v29 = vmul.f32 %v6439_v8, %v899_v3  ;;  %v1355_v50 = vadd.f32 %v1291_v62, %v967_v27 }
 0x2ad   : > { %v1876_v14 = vmax.f32 %v1812_v44, 0.0 }
 0x2ae   : > { %2734 = vmatmul.mubr.bf16.gmra.mrb[64].mxu1 %v2417_v30 }
 0x2af   : > { %v2615_v55 = vpop.f32.mrb[16].mxu1  ;;  %2743 = vmatprep.mubr.bf16.mxu1 %v6179_v2 }
 0x2b0   : > { %v2616_v10 = vadd.f32 %v2615_v55, %v7232_v4  ;;  %v2617_v22 = vpop.f32.mrb[17].mxu1  ;;  %v1223_v54 = vpop.permute.xlu1 %1222 }
 0x2b1   : > { %v2618_v36 = vadd.f32 %v2617_v22, %v7236_v41  ;;  %v1292_v47 = vmul.f32 %v6432_v5, %v1223_v54  ;;  %v2619_v23 = vpop.f32.mrb[18].mxu1 }
 0x2b2   : > { %v2620_v28 = vadd.f32 %v2619_v23, %v7232_v4  ;;  %v2621_v9 = vpop.f32.mrb[19].mxu1  ;;  %v2910_v21 = vmax.f32 %v2616_v10, 0.0 }
 0x2b3   : > { %v1356_v58 = vadd.f32 %v1292_v47, %v968_v29  ;;  %v2622_v20 = vadd.f32 %v2621_v9, %v7236_v41  ;;  %v2911_v45 = vmax.f32 %v2618_v36, 0.0 }
 0x2b4   : > { %v2912_v32 = vmax.f32 %v2620_v28, 0.0 }
 0x2b5   : > { %v2913_v39 = vmax.f32 %v2622_v20, 0.0  ;;  %v1603_v57 = vpop.permute.xlu1 %1602  ;;  %v1744_v35 = vadd.f32 %v1680_v42, %v1356_v58 }
 0x2b6   : > { %v7339_v40 = vpack.c.bf16 %v2912_v32, %v2910_v21  ;;  %v1678_v18 = vmul.f32 %v6436_v7, %v1603_v57  ;;  %2744 = vmatmul.mubr.bf16.gmra.mrb[68].mxu1 %v2418_v37 }
 0x2b7   : > { %v7343_v13 = vpack.c.bf16 %v2913_v39, %v2911_v45  ;;  %v2625_v53 = vpop.f32.mrb[20].mxu1  ;;  %2753 = vmatprep.mubr.bf16.mxu1 %v6179_v2  ;;  %v1815_v10 = vadd.f32 %v7255_v6, %v1744_v35 }
 0x2b8   : > { %v7347_v5 = vmax.bf16 %v3088_v43, %v7339_v40  ;;  %v1742_v31 = vadd.f32 %v1678_v18, %v1354_v59  ;;  %v2626_v16 = vadd.f32 %v2625_v53, %v7232_v4  ;;  %v2627_v8 = vpop.f32.mrb[21].mxu1 }
 0x2b9   : > { %v7351_v52 = vmax.bf16 %v3113_v34, %v7343_v13  ;;  %v2628_v37 = vadd.f32 %v2627_v8, %v7236_v41  ;;  %v2629_v3 = vpop.f32.mrb[22].mxu1  ;;  %v1607_v30 = vpop.permute.xlu1 %1606 }
 0x2ba   : > { %v1813_v38 = vadd.f32 %v7255_v6, %v1742_v31  ;;  %v2630_v33 = vadd.f32 %v2629_v3, %v7232_v4  ;;  %v1679_v55 = vmul.f32 %v6436_v7, %v1607_v30  ;;  %v2631_v43 = vpop.f32.mrb[23].mxu1  ;;  %v2914_v34 = vmax.f32 %v2626_v16, 0.0 }
 0x2bb   : > { %v2632_v22 = vadd.f32 %v2631_v43, %v7236_v41  ;;  %v2915_v47 = vmax.f32 %v2628_v37, 0.0  ;;  %v1879_v7 = vmax.f32 %v1815_v10, 0.0 }
 0x2bc   : > { %v1877_v54 = vmax.f32 %v1813_v38, 0.0  ;;  %v2916_v29 = vmax.f32 %v2630_v33, 0.0  ;;  %v1743_v36 = vadd.f32 %v1679_v55, %v1355_v50 }
 0x2bd   : > { %v2917_v23 = vmax.f32 %v2632_v22, 0.0 }
 0x2be   : > { %v1910_v11 = vpack.c.bf16 %v1877_v54, %v1876_v14  ;;  %v7359_v48 = vpack.c.bf16 %v2916_v29, %v2914_v34  ;;  %v1814_v28 = vadd.f32 %v7255_v6, %v1743_v36 }
 0x2bf   : > { %v7362_v9 = vpack.c.bf16 %v2917_v23, %v2915_v47 }
 0x2c0   : > { %v3090_v25 = vmax.bf16 %v7347_v5, %v7359_v48  ;;  %v1878_v58 = vmax.f32 %v1814_v28, 0.0  ;;  %5835 = vmatprep.mubr.msk.bf16.mxu0 %vm1951_vm1, %v1910_v11 }
 0x2c1   : > { %v3115_v42 = vmax.bf16 %v7351_v52, %v7362_v9 }
 0x2c2   : > { %v1911_v20 = vpack.c.bf16 %v1879_v7, %v1878_v58 }
 0x2c4   : > { %5836 = vmatmul.mubr.msk.bf16.gmra.mrb[60].mxu0 %vm1951_vm1, %v1911_v20 }
 0x2c5   : > { %v5813_v21 = vpop.f32.mrb[36].mxu0  ;;  %3346 = vmatprep.mubr.bf16.mxu0 %v7258_v46 }
 0x2c6   : > { %v2235_v6 = vadd.f32 %v7305_v49, %v5813_v21  ;;  %v2226_v32 = vpop.f32.mrb[37].mxu0 }
 0x2c7   : > { %v2227_v62 = vadd.f32 %v7305_v49, %v2226_v32  ;;  %v5814_v45 = vpop.f32.mrb[38].mxu0 }
 0x2c8   : > { %v2238_v39 = vadd.f32 %v7305_v49, %v5814_v45  ;;  %v2229_v57 = vpop.f32.mrb[39].mxu0  ;;  %v2375_v27 = vmax.f32 %v2235_v6, 0.0 }
 0x2c9   : > { %v2230_v59 = vadd.f32 %v7305_v49, %v2229_v57  ;;  %v2373_v44 = vmax.f32 %v2227_v62, 0.0 }
 0x2ca   : > { %v2376_v18 = vmax.f32 %v2238_v39, 0.0 }
 0x2cb   : > { %v2374_v35 = vmax.f32 %v2230_v59, 0.0 }
 0x2cc   : > { %v2420_v53 = vpack.c.bf16 %v2376_v18, %v2375_v27  ;;  %3347 = vmatmul.mubr.bf16.vlgmr.msra.gmra.mrb[64].mxu0 %v7249_v12 }
 0x2cd   : > { %v2419_v5 = vpack.c.bf16 %v2374_v35, %v2373_v44  ;;  %3354 = vmatprep.mubr.bf16.mxu0 %v7272_v61 }
 0x2cf   : > { %2754 = vmatmul.mubr.bf16.gmra.mrb[72].mxu1 %v2419_v5 }
 0x2d0   : > { %v2635_v46 = vpop.f32.mrb[24].mxu1  ;;  %2763 = vmatprep.mubr.bf16.mxu1 %v6179_v2 }
 0x2d1   : > { %v2636_v31 = vadd.f32 %v2635_v46, %v7232_v4  ;;  %v2637_v16 = vpop.f32.mrb[25].mxu1 }
 0x2d2   : > { %v2638_v8 = vadd.f32 %v2637_v16, %v7236_v41  ;;  %v2639_v52 = vpop.f32.mrb[26].mxu1 }
 0x2d3   : > { %v2640_v37 = vadd.f32 %v2639_v52, %v7232_v4  ;;  %v2641_v3 = vpop.f32.mrb[27].mxu1  ;;  %v2918_v12 = vmax.f32 %v2636_v31, 0.0 }
 0x2d4   : > { %v2642_v30 = vadd.f32 %v2641_v3, %v7236_v41  ;;  %3355 = vmatmul.mubr.bf16.gmra.mrb[68].mxu0 %v7269_v17  ;;  %v2919_v61 = vmax.f32 %v2638_v8, 0.0 }
 0x2d5   : > { %v2920_v50 = vmax.f32 %v2640_v37, 0.0  ;;  %3362 = vmatprep.mubr.bf16.mxu0 %v7291_v24 }
 0x2d6   : > { %v2921_v38 = vmax.f32 %v2642_v30, 0.0 }
 0x2d7   : > { %v3034_v33 = vpack.c.bf16 %v2920_v50, %v2918_v12  ;;  %2764 = vmatmul.mubr.bf16.gmra.mrb[76].mxu1 %v2420_v53 }
 0x2d8   : > { %v3035_v55 = vpack.c.bf16 %v2921_v38, %v2919_v61  ;;  %v2645_v43 = vpop.f32.mrb[28].mxu1  ;;  %2773 = vmatprep.mubr.bf16.mxu1 %v6179_v2 }
 0x2d9   : > { %v3091_v14 = vmax.bf16 %v3090_v25, %v3034_v33  ;;  %v2646_v10 = vadd.f32 %v2645_v43, %v7232_v4  ;;  %v2647_v22 = vpop.f32.mrb[29].mxu1 }
 0x2da   : > { %v3116_v54 = vmax.bf16 %v3115_v42, %v3035_v55  ;;  %v2648_v34 = vadd.f32 %v2647_v22, %v7236_v41  ;;  %v2649_v17 = vpop.f32.mrb[30].mxu1 }
 0x2db   : > { %v2650_v29 = vadd.f32 %v2649_v17, %v7232_v4  ;;  %v2651_v36 = vpop.f32.mrb[31].mxu1  ;;  %v2922_v47 = vmax.f32 %v2646_v10, 0.0 }
 0x2dc   : > { %v2652_v24 = vadd.f32 %v2651_v36, %v7236_v41  ;;  %3363 = vmatmul.mubr.bf16.gmra.mrb[72].mxu0 %v7289_v15  ;;  %v2923_v11 = vmax.f32 %v2648_v34, 0.0 }
 0x2dd   : > { %v2924_v23 = vmax.f32 %v2650_v29, 0.0  ;;  %3370 = vmatprep.mubr.bf16.mxu0 %v7315_v19 }
 0x2de   : > { %v2925_v28 = vmax.f32 %v2652_v24, 0.0 }
 0x2df   : > { %v3036_v7 = vpack.c.bf16 %v2924_v23, %v2922_v47 }
 0x2e0   : > { %v3037_v25 = vpack.c.bf16 %v2925_v28, %v2923_v11 }
 0x2e1   : > { %v3092_v58 = vmax.bf16 %v3091_v14, %v3036_v7 }
 0x2e2   : > { %v3117_v42 = vmax.bf16 %v3116_v54, %v3037_v25 }
 0x2e4   : > { %3371 = vmatmul.mubr.bf16.gmra.mrb[76].mxu0 %v7313_v60 }
 0x2e5   : > { %3378 = vmatprep.mubr.bf16.mxu0 %v7343_v13 }
 0x2ea   : > { %v5817_v20 = vpop.f32.mrb[40].mxu0 }
 0x2eb   : > { %v2251_v21 = vadd.f32 %v7305_v49, %v5817_v20  ;;  %v2242_v6 = vpop.f32.mrb[41].mxu0 }
 0x2ec   : > { %v2243_v15 = vadd.f32 %v7305_v49, %v2242_v6  ;;  %v5818_v32 = vpop.f32.mrb[42].mxu0  ;;  %3379 = vmatmul.mubr.bf16.gmra.mrb[80].mxu0 %v7339_v40 }
 0x2ed   : > { %v2254_v19 = vadd.f32 %v7305_v49, %v5818_v32  ;;  %v2245_v62 = vpop.f32.mrb[43].mxu0  ;;  %3386 = vmatprep.mubr.bf16.mxu0 %v7362_v9  ;;  %v2379_v39 = vmax.f32 %v2251_v21, 0.0 }
 0x2ee   : > { %v2246_v45 = vadd.f32 %v7305_v49, %v2245_v62  ;;  %v2377_v57 = vmax.f32 %v2243_v15, 0.0 }
 0x2ef   : > { %v2380_v60 = vmax.f32 %v2254_v19, 0.0 }
 0x2f0   : > { %v2378_v13 = vmax.f32 %v2246_v45, 0.0 }
 0x2f1   : > { %v2422_v59 = vpack.c.bf16 %v2380_v60, %v2379_v39 }
 0x2f2   : > { %v2421_v27 = vpack.c.bf16 %v2378_v13, %v2377_v57 }
 0x2f4   : > { %2774 = vmatmul.mubr.bf16.gmra.mrb[80].mxu1 %v2421_v27  ;;  %3387 = vmatmul.mubr.bf16.gmra.mrb[84].mxu0 %v7359_v48 }
 0x2f5   : > { %v2655_v18 = vpop.f32.mrb[32].mxu1  ;;  %3394 = vmatprep.mubr.bf16.mxu0 %v3035_v55  ;;  %2783 = vmatprep.mubr.bf16.mxu1 %v6179_v2 }
 0x2f6   : > { %v2656_v40 = vadd.f32 %v2655_v18, %v7232_v4  ;;  %v2657_v44 = vpop.f32.mrb[33].mxu1 }
 0x2f7   : > { %v2658_v9 = vadd.f32 %v2657_v44, %v7236_v41  ;;  %v2659_v35 = vpop.f32.mrb[34].mxu1 }
 0x2f8   : > { %v2660_v53 = vadd.f32 %v2659_v35, %v7232_v4  ;;  %v2661_v5 = vpop.f32.mrb[35].mxu1  ;;  %v2926_v31 = vmax.f32 %v2656_v40, 0.0 }
 0x2f9   : > { %v2662_v46 = vadd.f32 %v2661_v5, %v7236_v41  ;;  %v2927_v8 = vmax.f32 %v2658_v9, 0.0 }
 0x2fa   : > { %v2928_v16 = vmax.f32 %v2660_v53, 0.0 }
 0x2fb   : > { %v2929_v52 = vmax.f32 %v2662_v46, 0.0 }
 0x2fc   : > { %v3038_v48 = vpack.c.bf16 %v2928_v16, %v2926_v31  ;;  %2784 = vmatmul.mubr.bf16.gmra.mrb[84].mxu1 %v2422_v59  ;;  %3395 = vmatmul.mubr.bf16.gmra.mrb[88].mxu0 %v3034_v33 }
 0x2fd   : > { %v3039_v37 = vpack.c.bf16 %v2929_v52, %v2927_v8  ;;  %v2665_v3 = vpop.f32.mrb[36].mxu1  ;;  %3402 = vmatprep.mubr.bf16.mxu0 %v3037_v25  ;;  %2793 = vmatprep.mubr.bf16.mxu1 %v6179_v2  ;;  %v6069_v8 = vld [vmem:[%s8702_s8 + $0x40] sm:$0xff]  }
 0x2fe   : > { %v3093_v30 = vmax.bf16 %v3092_v58, %v3038_v48  ;;  %v2666_v12 = vadd.f32 %v2665_v3, %v7232_v4  ;;  %v2667_v50 = vpop.f32.mrb[37].mxu1  ;;  %v6070_v3 = vld [vmem:[%s8702_s8] sm:$0xff]   ;;  %5683 = vmatprep.subr.bf16.mxu0 %v6069_v8 }
 0x2ff   : > { %v3118_v61 = vmax.bf16 %v3117_v42, %v3039_v37  ;;  %v2668_v38 = vadd.f32 %v2667_v50, %v7236_v41  ;;  %v2669_v55 = vpop.f32.mrb[38].mxu1  ;;  %5684 = vmatpush3.bf16.msra.mxu0 %v6070_v3 }
 0x300   : > { %v2670_v43 = vadd.f32 %v2669_v55, %v7232_v4  ;;  %v2671_v14 = vpop.f32.mrb[39].mxu1  ;;  %v2930_v22 = vmax.f32 %v2666_v12, 0.0 }
 0x301   : > { %v2672_v10 = vadd.f32 %v2671_v14, %v7236_v41  ;;  %v2931_v54 = vmax.f32 %v2668_v38, 0.0 }
 0x302   : > { %v2932_v33 = vmax.f32 %v2670_v43, 0.0 }
 0x303   : > { %v2933_v34 = vmax.f32 %v2672_v10, 0.0 }
 0x304   : > { %v3040_v17 = vpack.c.bf16 %v2932_v33, %v2930_v22  ;;  %3403 = vmatmul.mubr.bf16.gmra.mrb[92].mxu0 %v3036_v7 }
 0x305   : > { %v3041_v29 = vpack.c.bf16 %v2933_v34, %v2931_v54  ;;  %3410 = vmatprep.mubr.bf16.mxu0 %v3039_v37 }
 0x306   : > { %v3094_v36 = vmax.bf16 %v3093_v30, %v3040_v17 }
 0x307   : > { %v3119_v24 = vmax.bf16 %v3118_v61, %v3041_v29 }
 0x30b   : > { %v5821_v47 = vpop.f32.mrb[44].mxu0 }
 0x30c   : > { %v2267_v23 = vadd.f32 %v7305_v49, %v5821_v47  ;;  %v2258_v11 = vpop.f32.mrb[45].mxu0  ;;  %3411 = vmatmul.mubr.bf16.gmra.mrb[96].mxu0 %v3038_v48 }
 0x30d   : > { %v2259_v28 = vadd.f32 %v7305_v49, %v2258_v11  ;;  %v5822_v25 = vpop.f32.mrb[46].mxu0  ;;  %3418 = vmatprep.mubr.bf16.mxu0 %v3041_v29 }
 0x30e   : > { %v2270_v58 = vadd.f32 %v7305_v49, %v5822_v25  ;;  %v2261_v42 = vpop.f32.mrb[47].mxu0  ;;  %v2383_v21 = vmax.f32 %v2267_v23, 0.0 }
 0x30f   : > { %v2262_v20 = vadd.f32 %v7305_v49, %v2261_v42  ;;  %v2381_v6 = vmax.f32 %v2259_v28, 0.0 }
 0x310   : > { %v2384_v7 = vmax.f32 %v2270_v58, 0.0 }
 0x311   : > { %v2382_v15 = vmax.f32 %v2262_v20, 0.0 }
 0x312   : > { %v2424_v32 = vpack.c.bf16 %v2384_v7, %v2383_v21 }
 0x313   : > { %v2423_v19 = vpack.c.bf16 %v2382_v15, %v2381_v6 }
 0x314   : > { %3419 = vmatmul.mubr.bf16.gmra.mrb[100].mxu0 %v3040_v17 }
 0x315   : > { %2794 = vmatmul.mubr.bf16.gmra.mrb[88].mxu1 %v2423_v19 }
 0x316   : > { %v2675_v62 = vpop.f32.mrb[40].mxu1  ;;  %2803 = vmatprep.mubr.bf16.mxu1 %v6179_v2 }
 0x317   : > { %v2676_v45 = vadd.f32 %v2675_v62, %v7232_v4  ;;  %v2677_v39 = vpop.f32.mrb[41].mxu1 }
 0x318   : > { %v2678_v60 = vadd.f32 %v2677_v39, %v7236_v41  ;;  %v2679_v57 = vpop.f32.mrb[42].mxu1  ;;  %v6071_v39 = vld [vmem:[%s8702_s8 + $0x48] sm:$0xff]  }
 0x319   : > { %v2680_v13 = vadd.f32 %v2679_v57, %v7232_v4  ;;  %v2681_v59 = vpop.f32.mrb[43].mxu1  ;;  %v2934_v18 = vmax.f32 %v2676_v45, 0.0  ;;  %5685 = vmatprep.subr.bf16.mxu0 %v6071_v39 }
 0x31a   : > { %v2682_v27 = vadd.f32 %v2681_v59, %v7236_v41  ;;  %v2935_v44 = vmax.f32 %v2678_v60, 0.0 }
 0x31b   : > { %v2936_v40 = vmax.f32 %v2680_v13, 0.0  ;;  %v6072_v13 = vld [vmem:[%s8702_s8 + $0x8] sm:$0xff]  }
 0x31c   : > { %v2937_v9 = vmax.f32 %v2682_v27, 0.0  ;;  %5686 = vmatpush3.bf16.msra.mxu0 %v6072_v13 }
 0x31d   : > { %v3042_v35 = vpack.c.bf16 %v2936_v40, %v2934_v18  ;;  %2804 = vmatmul.mubr.bf16.gmra.mrb[92].mxu1 %v2424_v32 }
 0x31e   : > { %v3043_v53 = vpack.c.bf16 %v2937_v9, %v2935_v44  ;;  %v2685_v5 = vpop.f32.mrb[44].mxu1  ;;  %2813 = vmatprep.mubr.bf16.mxu1 %v6179_v2 }
 0x31f   : > { %v7420_v46 = vmax.bf16 %v3094_v36, %v3042_v35  ;;  %v2686_v31 = vadd.f32 %v2685_v5, %v7232_v4  ;;  %v2687_v16 = vpop.f32.mrb[45].mxu1 }
 0x320   : > { %v3120_v52 = vmax.bf16 %v3119_v24, %v3043_v53  ;;  %v2688_v48 = vadd.f32 %v2687_v16, %v7236_v41  ;;  %v2689_v37 = vpop.f32.mrb[46].mxu1  ;;  %3426 = vmatprep.mubr.bf16.mxu0 %v3043_v53 }
 0x321   : > { %v2690_v30 = vadd.f32 %v2689_v37, %v7232_v4  ;;  %v2691_v12 = vpop.f32.mrb[47].mxu1  ;;  %3427 = vmatmul.mubr.bf16.gmra.mrb[104].mxu0 %v3042_v35  ;;  %v2938_v61 = vmax.f32 %v2686_v31, 0.0 }
 0x322   : > { %v2692_v50 = vadd.f32 %v2691_v12, %v7236_v41  ;;  %v2939_v55 = vmax.f32 %v2688_v48, 0.0 }
 0x323   : > { %v2940_v38 = vmax.f32 %v2690_v30, 0.0 }
 0x324   : > { %v2941_v43 = vmax.f32 %v2692_v50, 0.0 }
 0x325   : > { %v3044_v14 = vpack.c.bf16 %v2940_v38, %v2938_v61 }
 0x326   : > { %v3045_v10 = vpack.c.bf16 %v2941_v43, %v2939_v55 }
 0x327   : > { %v3096_v22 = vmax.bf16 %v7420_v46, %v3044_v14 }
 0x328   : > { %v3121_v33 = vmax.bf16 %v3120_v52, %v3045_v10  ;;  %3434 = vmatprep.mubr.bf16.mxu0 %v3045_v10 }
 0x329   : > { %3435 = vmatmul.mubr.bf16.gmra.mrb[108].mxu0 %v3044_v14 }
 0x330   : > { %v5825_v54 = vpop.f32.mrb[48].mxu0 }
 0x331   : > { %v2283_v34 = vadd.f32 %v7305_v49, %v5825_v54  ;;  %v2274_v17 = vpop.f32.mrb[49].mxu0 }
 0x332   : > { %v2275_v29 = vadd.f32 %v7305_v49, %v2274_v17  ;;  %v5826_v36 = vpop.f32.mrb[50].mxu0 }
 0x333   : > { %v2286_v24 = vadd.f32 %v7305_v49, %v5826_v36  ;;  %v2277_v47 = vpop.f32.mrb[51].mxu0  ;;  %v2387_v11 = vmax.f32 %v2283_v34, 0.0 }
 0x334   : > { %v2278_v23 = vadd.f32 %v7305_v49, %v2277_v47  ;;  %v2385_v25 = vmax.f32 %v2275_v29, 0.0 }
 0x335   : > { %v2388_v28 = vmax.f32 %v2286_v24, 0.0 }
 0x336   : > { %v2386_v58 = vmax.f32 %v2278_v23, 0.0 }
 0x337   : > { %v2426_v42 = vpack.c.bf16 %v2388_v28, %v2387_v11 }
 0x338   : > { %v2425_v20 = vpack.c.bf16 %v2386_v58, %v2385_v25 }
 0x33a   : > { %2814 = vmatmul.mubr.bf16.gmra.mrb[96].mxu1 %v2425_v20 }
 0x33b   : > { %v2695_v21 = vpop.f32.mrb[48].mxu1  ;;  %2823 = vmatprep.mubr.bf16.mxu1 %v6179_v2 }
 0x33c   : > { %v2696_v7 = vadd.f32 %v2695_v21, %v7232_v4  ;;  %v2697_v6 = vpop.f32.mrb[49].mxu1 }
 0x33d   : > { %v2698_v15 = vadd.f32 %v2697_v6, %v7236_v41  ;;  %v2699_v32 = vpop.f32.mrb[50].mxu1 }
 0x33e   : > { %v2700_v19 = vadd.f32 %v2699_v32, %v7232_v4  ;;  %v2701_v62 = vpop.f32.mrb[51].mxu1  ;;  %v2942_v60 = vmax.f32 %v2696_v7, 0.0  ;;  %v6073_v7 = vld [vmem:[%s8702_s8 + $0x50] sm:$0xff]  }
 0x33f   : > { %v2702_v45 = vadd.f32 %v2701_v62, %v7236_v41  ;;  %v2943_v59 = vmax.f32 %v2698_v15, 0.0  ;;  %v6074_v15 = vld [vmem:[%s8702_s8 + $0x10] sm:$0xff]   ;;  %5687 = vmatprep.subr.bf16.mxu0 %v6073_v7 }
 0x340   : > { %v2944_v57 = vmax.f32 %v2700_v19, 0.0  ;;  %5688 = vmatpush3.bf16.msra.mxu0 %v6074_v15 }
 0x341   : > { %v2945_v27 = vmax.f32 %v2702_v45, 0.0 }
 0x342   : > { %v3046_v18 = vpack.c.bf16 %v2944_v57, %v2942_v60  ;;  %2824 = vmatmul.mubr.bf16.gmra.mrb[100].mxu1 %v2426_v42 }
 0x343   : > { %v3047_v40 = vpack.c.bf16 %v2945_v27, %v2943_v59  ;;  %v2705_v44 = vpop.f32.mrb[52].mxu1  ;;  %2833 = vmatprep.mubr.bf16.mxu1 %v6179_v2 }
 0x344   : > { %v3097_v9 = vmax.bf16 %v3096_v22, %v3046_v18  ;;  %v2706_v35 = vadd.f32 %v2705_v44, %v7232_v4  ;;  %v2707_v53 = vpop.f32.mrb[53].mxu1 }
 0x345   : > { %v3122_v5 = vmax.bf16 %v3121_v33, %v3047_v40  ;;  %v2708_v46 = vadd.f32 %v2707_v53, %v7236_v41  ;;  %v2709_v31 = vpop.f32.mrb[54].mxu1  ;;  %3442 = vmatprep.mubr.bf16.mxu0 %v3047_v40 }
 0x346   : > { %v2710_v16 = vadd.f32 %v2709_v31, %v7232_v4  ;;  %v2711_v8 = vpop.f32.mrb[55].mxu1  ;;  %3443 = vmatmul.mubr.bf16.gmra.mrb[112].mxu0 %v3046_v18  ;;  %v2946_v48 = vmax.f32 %v2706_v35, 0.0 }
 0x347   : > { %v2712_v52 = vadd.f32 %v2711_v8, %v7236_v41  ;;  %v2947_v3 = vmax.f32 %v2708_v46, 0.0 }
 0x348   : > { %v2948_v37 = vmax.f32 %v2710_v16, 0.0 }
 0x349   : > { %v2949_v30 = vmax.f32 %v2712_v52, 0.0 }
 0x34a   : > { %v3048_v12 = vpack.c.bf16 %v2948_v37, %v2946_v48 }
 0x34b   : > { %v3049_v50 = vpack.c.bf16 %v2949_v30, %v2947_v3 }
 0x34c   : > { %v3098_v61 = vmax.bf16 %v3097_v9, %v3048_v12 }
 0x34d   : > { %v3123_v38 = vmax.bf16 %v3122_v5, %v3049_v50  ;;  %3450 = vmatprep.mubr.bf16.mxu0 %v3049_v50 }
 0x34e   : > { %3451 = vmatmul.mubr.bf16.gmra.mrb[116].mxu0 %v3048_v12 }
 0x351   : > { %v5829_v55 = vpop.f32.mrb[52].mxu0 }
 0x352   : > { %v2299_v43 = vadd.f32 %v7305_v49, %v5829_v55  ;;  %v2290_v14 = vpop.f32.mrb[53].mxu0 }
 0x353   : > { %v2291_v10 = vadd.f32 %v7305_v49, %v2290_v14  ;;  %v5830_v22 = vpop.f32.mrb[54].mxu0 }
 0x354   : > { %v2302_v33 = vadd.f32 %v7305_v49, %v5830_v22  ;;  %v2293_v54 = vpop.f32.mrb[55].mxu0  ;;  %v2391_v17 = vmax.f32 %v2299_v43, 0.0 }
 0x355   : > { %v2294_v34 = vadd.f32 %v7305_v49, %v2293_v54  ;;  %v2389_v36 = vmax.f32 %v2291_v10, 0.0 }
 0x356   : > { %v2392_v29 = vmax.f32 %v2302_v33, 0.0 }
 0x357   : > { %v2390_v24 = vmax.f32 %v2294_v34, 0.0 }
 0x358   : > { %v2428_v47 = vpack.c.bf16 %v2392_v29, %v2391_v17  ;;  %v6075_v17 = vld [vmem:[%s8702_s8 + $0x58] sm:$0xff]  }
 0x359   : > { %v2427_v23 = vpack.c.bf16 %v2390_v24, %v2389_v36  ;;  %v6076_v29 = vld [vmem:[%s8702_s8 + $0x18] sm:$0xff]   ;;  %5689 = vmatprep.subr.bf16.mxu0 %v6075_v17 }
 0x35a   : > { %5690 = vmatpush3.bf16.msra.mxu0 %v6076_v29 }
 0x35b   : > { %2834 = vmatmul.mubr.bf16.gmra.mrb[104].mxu1 %v2427_v23 }
 0x35c   : > { %v2715_v11 = vpop.f32.mrb[56].mxu1  ;;  %2843 = vmatprep.mubr.bf16.mxu1 %v6179_v2 }
 0x35d   : > { %v2716_v28 = vadd.f32 %v2715_v11, %v7232_v4  ;;  %v2717_v25 = vpop.f32.mrb[57].mxu1 }
 0x35e   : > { %v2718_v58 = vadd.f32 %v2717_v25, %v7236_v41  ;;  %v2719_v42 = vpop.f32.mrb[58].mxu1 }
 0x35f   : > { %v2720_v20 = vadd.f32 %v2719_v42, %v7232_v4  ;;  %v2721_v21 = vpop.f32.mrb[59].mxu1  ;;  %v2950_v32 = vmax.f32 %v2716_v28, 0.0 }
 0x360   : > { %v2722_v6 = vadd.f32 %v2721_v21, %v7236_v41  ;;  %v2951_v62 = vmax.f32 %v2718_v58, 0.0 }
 0x361   : > { %v2952_v19 = vmax.f32 %v2720_v20, 0.0 }
 0x362   : > { %v2953_v45 = vmax.f32 %v2722_v6, 0.0 }
 0x363   : > { %v3050_v39 = vpack.c.bf16 %v2952_v19, %v2950_v32  ;;  %2844 = vmatmul.mubr.bf16.gmra.mrb[108].mxu1 %v2428_v47 }
 0x364   : > { %v3051_v60 = vpack.c.bf16 %v2953_v45, %v2951_v62  ;;  %v2725_v57 = vpop.f32.mrb[60].mxu1  ;;  %2853 = vmatprep.mubr.bf16.mxu1 %v6179_v2 }
 0x365   : > { %v3099_v13 = vmax.bf16 %v3098_v61, %v3050_v39  ;;  %v2726_v59 = vadd.f32 %v2725_v57, %v7232_v4  ;;  %v2727_v27 = vpop.f32.mrb[61].mxu1 }
 0x366   : > { %v3124_v18 = vmax.bf16 %v3123_v38, %v3051_v60  ;;  %v2728_v40 = vadd.f32 %v2727_v27, %v7236_v41  ;;  %v2729_v44 = vpop.f32.mrb[62].mxu1  ;;  %3458 = vmatprep.mubr.bf16.mxu0 %v3051_v60 }
 0x367   : > { %v2730_v9 = vadd.f32 %v2729_v44, %v7232_v4  ;;  %v2731_v35 = vpop.f32.mrb[63].mxu1  ;;  %3459 = vmatmul.mubr.bf16.gmra.mrb[120].mxu0 %v3050_v39  ;;  %v2954_v5 = vmax.f32 %v2726_v59, 0.0 }
 0x368   : > { %v2732_v53 = vadd.f32 %v2731_v35, %v7236_v41  ;;  %v2955_v31 = vmax.f32 %v2728_v40, 0.0 }
 0x369   : > { %v2956_v46 = vmax.f32 %v2730_v9, 0.0 }
 0x36a   : > { %v2957_v16 = vmax.f32 %v2732_v53, 0.0 }
 0x36b   : > { %v3052_v8 = vpack.c.bf16 %v2956_v46, %v2954_v5 }
 0x36c   : > { %v3053_v52 = vpack.c.bf16 %v2957_v16, %v2955_v31 }
 0x36d   : > { %v7473_v48 = vmax.bf16 %v3099_v13, %v3052_v8 }
 0x36e   : > { %v7475_v37 = vmax.bf16 %v3124_v18, %v3053_v52  ;;  %3466 = vmatprep.mubr.bf16.mxu0 %v3053_v52 }
 0x36f   : > { %3467 = vmatmul.mubr.bf16.gmra.mrb[124].mxu0 %v3052_v8 }
 0x376   : > { %v5833_v3 = vpop.f32.mrb[56].mxu0 }
 0x377   : > { %v2315_v30 = vadd.f32 %v7305_v49, %v5833_v3  ;;  %v2306_v12 = vpop.f32.mrb[57].mxu0 }
 0x378   : > { %v2307_v50 = vadd.f32 %v7305_v49, %v2306_v12  ;;  %v5834_v61 = vpop.f32.mrb[58].mxu0 }
 0x379   : > { %v2318_v38 = vadd.f32 %v7305_v49, %v5834_v61  ;;  %v2309_v55 = vpop.f32.mrb[59].mxu0  ;;  %v2395_v14 = vmax.f32 %v2315_v30, 0.0 }
 0x37a   : > { %v2310_v43 = vadd.f32 %v7305_v49, %v2309_v55  ;;  %v2393_v22 = vmax.f32 %v2307_v50, 0.0 }
 0x37b   : > { %v2396_v10 = vmax.f32 %v2318_v38, 0.0 }
 0x37c   : > { %v2394_v33 = vmax.f32 %v2310_v43, 0.0 }
 0x37d   : > { %v2430_v54 = vpack.c.bf16 %v2396_v10, %v2395_v14  ;;  %v6077_v10 = vld [vmem:[%s8702_s8 + $0x60] sm:$0xff]  }
 0x37e   : > { %v2429_v34 = vpack.c.bf16 %v2394_v33, %v2393_v22  ;;  %v6078_v33 = vld [vmem:[%s8702_s8 + $0x20] sm:$0xff]   ;;  %5691 = vmatprep.subr.bf16.mxu0 %v6077_v10 }
 0x37f   : > { %5692 = vmatpush3.bf16.msra.mxu0 %v6078_v33 }
 0x380   : > { %2854 = vmatmul.mubr.bf16.gmra.mrb[112].mxu1 %v2429_v34 }
 0x381   : > { %v2735_v36 = vpop.f32.mrb[64].mxu1  ;;  %2863 = vmatprep.mubr.bf16.mxu1 %v6179_v2 }
 0x382   : > { %v2736_v24 = vadd.f32 %v2735_v36, %v7232_v4  ;;  %v2737_v47 = vpop.f32.mrb[65].mxu1 }
 0x383   : > { %v2738_v23 = vadd.f32 %v2737_v47, %v7236_v41  ;;  %v2739_v11 = vpop.f32.mrb[66].mxu1 }
 0x384   : > { %v2740_v28 = vadd.f32 %v2739_v11, %v7232_v4  ;;  %v2741_v25 = vpop.f32.mrb[67].mxu1  ;;  %v2958_v42 = vmax.f32 %v2736_v24, 0.0 }
 0x385   : > { %v2742_v58 = vadd.f32 %v2741_v25, %v7236_v41  ;;  %v2959_v21 = vmax.f32 %v2738_v23, 0.0 }
 0x386   : > { %v2960_v20 = vmax.f32 %v2740_v28, 0.0 }
 0x387   : > { %v2961_v7 = vmax.f32 %v2742_v58, 0.0 }
 0x388   : > { %v7492_v6 = vpack.c.bf16 %v2960_v20, %v2958_v42  ;;  %2864 = vmatmul.mubr.bf16.gmra.mrb[116].mxu1 %v2430_v54 }
 0x389   : > { %v7494_v15 = vpack.c.bf16 %v2961_v7, %v2959_v21  ;;  %v2745_v32 = vpop.f32.mrb[68].mxu1  ;;  %2873 = vmatprep.mubr.bf16.mxu1 %v6179_v2 }
 0x38a   : > { %v2746_v19 = vadd.f32 %v2745_v32, %v7232_v4  ;;  %v2747_v62 = vpop.f32.mrb[69].mxu1 }
 0x38b   : > { %v2748_v45 = vadd.f32 %v2747_v62, %v7236_v41  ;;  %v2749_v39 = vpop.f32.mrb[70].mxu1  ;;  %3474 = vmatprep.mubr.bf16.mxu0 %v7494_v15 }
 0x38c   : > { %v2750_v60 = vadd.f32 %v2749_v39, %v7232_v4  ;;  %v2751_v57 = vpop.f32.mrb[71].mxu1  ;;  %3475 = vmatmul.mubr.bf16.gmra.mrb[128].mxu0 %v7492_v6  ;;  %v2962_v59 = vmax.f32 %v2746_v19, 0.0 }
 0x38d   : > { %v2752_v13 = vadd.f32 %v2751_v57, %v7236_v41  ;;  %v2963_v18 = vmax.f32 %v2748_v45, 0.0 }
 0x38e   : > { %v2964_v27 = vmax.f32 %v2750_v60, 0.0 }
 0x38f   : > { %v2965_v40 = vmax.f32 %v2752_v13, 0.0 }
 0x390   : > { %v3056_v44 = vpack.c.bf16 %v2964_v27, %v2962_v59 }
 0x391   : > { %v3057_v9 = vpack.c.bf16 %v2965_v40, %v2963_v18 }
 0x392   : > { %v3136_v35 = vmax.bf16 %v3056_v44, %v7492_v6 }
 0x393   : > { %v3161_v53 = vmax.bf16 %v3057_v9, %v7494_v15  ;;  %3482 = vmatprep.mubr.bf16.mxu0 %v3057_v9 }
 0x394   : > { %3483 = vmatmul.mubr.bf16.gmra.mrb[132].mxu0 %v3056_v44 }
 0x397   : > { %v5837_v5 = vpop.f32.mrb[60].mxu0 }
 0x398   : > { %v2331_v46 = vadd.f32 %v7305_v49, %v5837_v5  ;;  %v2322_v31 = vpop.f32.mrb[61].mxu0 }
 0x399   : > { %v2323_v16 = vadd.f32 %v7305_v49, %v2322_v31  ;;  %v5838_v8 = vpop.f32.mrb[62].mxu0 }
 0x39a   : > { %v2334_v52 = vadd.f32 %v7305_v49, %v5838_v8  ;;  %v2325_v3 = vpop.f32.mrb[63].mxu0  ;;  %v2399_v12 = vmax.f32 %v2331_v46, 0.0 }
 0x39b   : > { %v2326_v30 = vadd.f32 %v7305_v49, %v2325_v3  ;;  %v2397_v61 = vmax.f32 %v2323_v16, 0.0 }
 0x39c   : > { %v2400_v50 = vmax.f32 %v2334_v52, 0.0 }
 0x39d   : > { %v2398_v38 = vmax.f32 %v2326_v30, 0.0 }
 0x39e   : > { %v2432_v55 = vpack.c.bf16 %v2400_v50, %v2399_v12 }
 0x39f   : > { %v2431_v43 = vpack.c.bf16 %v2398_v38, %v2397_v61  ;;  %v7509_v14 = vpop.f32.mrb[64].mxu0 }
 0x3a0   : > { %v3350_v22 = vpop.f32.mrb[65].mxu0 }
 0x3a1   : > { %2874 = vmatmul.mubr.bf16.gmra.mrb[120].mxu1 %v2431_v43  ;;  %v7517_v54 = vpop.f32.mrb[66].mxu0  ;;  %v6080_v43 = vld [vmem:[%s8702_s8 + $0x28] sm:$0xff]  }
 0x3a2   : > { %v2755_v49 = vpop.f32.mrb[72].mxu1  ;;  %v3353_v34 = vpop.f32.mrb[67].mxu0  ;;  %2883 = vmatprep.mubr.bf16.mxu1 %v6179_v2 }
 0x3a3   : > { %v2756_v17 = vadd.f32 %v2755_v49, %v7232_v4  ;;  %v2757_v29 = vpop.f32.mrb[73].mxu1 }
 0x3a4   : > { %v2758_v36 = vadd.f32 %v2757_v29, %v7236_v41  ;;  %v2759_v24 = vpop.f32.mrb[74].mxu1 }
 0x3a5   : > { %v2760_v47 = vadd.f32 %v2759_v24, %v7232_v4  ;;  %v2761_v23 = vpop.f32.mrb[75].mxu1  ;;  %v2966_v28 = vmax.f32 %v2756_v17, 0.0 }
 0x3a6   : > { %v2762_v11 = vadd.f32 %v2761_v23, %v7236_v41  ;;  %v2967_v42 = vmax.f32 %v2758_v36, 0.0 }
 0x3a7   : > { %v2968_v25 = vmax.f32 %v2760_v47, 0.0  ;;  %v7524_v58 = vpop.f32.mrb[68].mxu0 }
 0x3a8   : > { %v2969_v20 = vmax.f32 %v2762_v11, 0.0  ;;  %v3358_v21 = vpop.f32.mrb[69].mxu0 }
 0x3a9   : > { %v3058_v2 = vpack.c.bf16 %v2968_v25, %v2966_v28  ;;  %2884 = vmatmul.mubr.bf16.gmra.mrb[124].mxu1 %v2432_v55  ;;  %v7526_v7 = vpop.f32.mrb[70].mxu0  ;;  %v6079_v55 = vld [vmem:[%s8702_s8 + $0x68] sm:$0xff]  }
 0x3aa   : > { %v3059_v6 = vpack.c.bf16 %v2969_v20, %v2967_v42  ;;  %v2765_v15 = vpop.f32.mrb[76].mxu1  ;;  %v3361_v32 = vpop.f32.mrb[71].mxu0  ;;  %5693 = vmatprep.subr.bf16.mxu0 %v6079_v55 }
 0x3ab   : > { %v3137_v19 = vmax.bf16 %v3136_v35, %v3058_v2  ;;  %v2766_v62 = vadd.f32 %v2765_v15, %v7232_v4  ;;  %v2767_v45 = vpop.f32.mrb[77].mxu1  ;;  %5694 = vmatpush3.bf16.msra.mxu0 %v6080_v43 }
 0x3ac   : > { %v3162_v39 = vmax.bf16 %v3161_v53, %v3059_v6  ;;  %v2768_v60 = vadd.f32 %v2767_v45, %v7236_v41  ;;  %v2769_v57 = vpop.f32.mrb[78].mxu1  ;;  %3490 = vmatprep.mubr.bf16.mxu0 %v3059_v6 }
 0x3ad   : > { %v2770_v13 = vadd.f32 %v2769_v57, %v7232_v4  ;;  %v2771_v59 = vpop.f32.mrb[79].mxu1  ;;  %3491 = vmatmul.mubr.bf16.gmra.mrb[136].mxu0 %v3058_v2  ;;  %v2970_v18 = vmax.f32 %v2766_v62, 0.0 }
 0x3ae   : > { %v2772_v27 = vadd.f32 %v2771_v59, %v7236_v41  ;;  %v2971_v9 = vmax.f32 %v2768_v60, 0.0 }
 0x3af   : > { %v2972_v40 = vmax.f32 %v2770_v13, 0.0  ;;  %v7532_v44 = vpop.f32.mrb[72].mxu0 }
 0x3b0   : > { %v2973_v35 = vmax.f32 %v2772_v27, 0.0  ;;  %v3366_v5 = vpop.f32.mrb[73].mxu0 }
 0x3b1   : > { %v3060_v46 = vpack.c.bf16 %v2972_v40, %v2970_v18  ;;  %v7534_v31 = vpop.f32.mrb[74].mxu0 }
 0x3b2   : > { %v3061_v53 = vpack.c.bf16 %v2973_v35, %v2971_v9  ;;  %v3369_v16 = vpop.f32.mrb[75].mxu0 }
 0x3b3   : > { %v3138_v8 = vmax.bf16 %v3137_v19, %v3060_v46 }
 0x3b4   : > { %v3163_v52 = vmax.bf16 %v3162_v39, %v3061_v53  ;;  %3498 = vmatprep.mubr.bf16.mxu0 %v3061_v53 }
 0x3b5   : > { %3499 = vmatmul.mubr.bf16.gmra.mrb[140].mxu0 %v3060_v46 }
 0x3b7   : > { %v7536_v3 = vpop.f32.mrb[76].mxu0 }
 0x3b8   : > { %v3374_v30 = vpop.f32.mrb[77].mxu0 }
 0x3b9   : > { %v7538_v12 = vpop.f32.mrb[78].mxu0 }
 0x3ba   : > { %v3377_v50 = vpop.f32.mrb[79].mxu0 }
 0x3bf   : > { %v7540_v61 = vpop.f32.mrb[80].mxu0 }
 0x3c0   : > { %v3382_v38 = vpop.f32.mrb[81].mxu0 }
 0x3c1   : > { %v7548_v10 = vpop.f32.mrb[82].mxu0 }
 0x3c2   : > { %v3385_v22 = vpop.f32.mrb[83].mxu0 }
 0x3c7   : > { %v2775_v33 = vpop.f32.mrb[80].mxu1  ;;  %v7550_v49 = vpop.f32.mrb[84].mxu0 }
 0x3c8   : > { %v2776_v34 = vadd.f32 %v2775_v33, %v7232_v4  ;;  %v2777_v17 = vpop.f32.mrb[81].mxu1  ;;  %v3390_v29 = vpop.f32.mrb[85].mxu0 }
 0x3c9   : > { %v2778_v36 = vadd.f32 %v2777_v17, %v7236_v41  ;;  %v2779_v24 = vpop.f32.mrb[82].mxu1  ;;  %v7554_v47 = vpop.f32.mrb[86].mxu0 }
 0x3ca   : > { %v2780_v23 = vadd.f32 %v2779_v24, %v7232_v4  ;;  %v2781_v11 = vpop.f32.mrb[83].mxu1  ;;  %v3393_v28 = vpop.f32.mrb[87].mxu0  ;;  %v2974_v42 = vmax.f32 %v2776_v34, 0.0  ;;  %v6082_v24 = vld [vmem:[%s8702_s8 + $0x30] sm:$0xff]  }
 0x3cb   : > { %v2782_v25 = vadd.f32 %v2781_v11, %v7236_v41  ;;  %v2975_v21 = vmax.f32 %v2778_v36, 0.0  ;;  %v6081_v36 = vld [vmem:[%s8702_s8 + $0x70] sm:$0xff]  }
 0x3cc   : > { %v2976_v20 = vmax.f32 %v2780_v23, 0.0  ;;  %5695 = vmatprep.subr.bf16.mxu0 %v6081_v36 }
 0x3cd   : > { %v2977_v2 = vmax.f32 %v2782_v25, 0.0  ;;  %5696 = vmatpush3.bf16.msra.mxu0 %v6082_v24 }
 0x3ce   : > { %v3062_v6 = vpack.c.bf16 %v2976_v20, %v2974_v42 }
 0x3cf   : > { %v3063_v15 = vpack.c.bf16 %v2977_v2, %v2975_v21  ;;  %v2785_v32 = vpop.f32.mrb[84].mxu1  ;;  %v7558_v19 = vpop.f32.mrb[88].mxu0 }
 0x3d0   : > { %v3139_v62 = vmax.bf16 %v3138_v8, %v3062_v6  ;;  %v2786_v45 = vadd.f32 %v2785_v32, %v7232_v4  ;;  %v2787_v39 = vpop.f32.mrb[85].mxu1  ;;  %v3398_v60 = vpop.f32.mrb[89].mxu0 }
 0x3d1   : > { %v3164_v57 = vmax.bf16 %v3163_v52, %v3063_v15  ;;  %v2788_v13 = vadd.f32 %v2787_v39, %v7236_v41  ;;  %v2789_v59 = vpop.f32.mrb[86].mxu1  ;;  %v7562_v27 = vpop.f32.mrb[90].mxu0  ;;  %3506 = vmatprep.mubr.bf16.mxu0 %v3063_v15 }
 0x3d2   : > { %v2790_v18 = vadd.f32 %v2789_v59, %v7232_v4  ;;  %v2791_v40 = vpop.f32.mrb[87].mxu1  ;;  %v3401_v9 = vpop.f32.mrb[91].mxu0  ;;  %3507 = vmatmul.mubr.bf16.gmra.mrb[144].mxu0 %v3062_v6  ;;  %v2978_v5 = vmax.f32 %v2786_v45, 0.0 }
 0x3d3   : > { %v2792_v35 = vadd.f32 %v2791_v40, %v7236_v41  ;;  %v2979_v53 = vmax.f32 %v2788_v13, 0.0 }
 0x3d4   : > { %v2980_v46 = vmax.f32 %v2790_v18, 0.0 }
 0x3d5   : > { %v2981_v16 = vmax.f32 %v2792_v35, 0.0 }
 0x3d6   : > { %v3064_v8 = vpack.c.bf16 %v2980_v46, %v2978_v5 }
 0x3d7   : > { %v3065_v30 = vpack.c.bf16 %v2981_v16, %v2979_v53  ;;  %v7566_v52 = vpop.f32.mrb[92].mxu0 }
 0x3d8   : > { %v3140_v50 = vmax.bf16 %v3139_v62, %v3064_v8  ;;  %v3406_v38 = vpop.f32.mrb[93].mxu0 }
 0x3d9   : > { %v3165_v55 = vmax.bf16 %v3164_v57, %v3065_v30  ;;  %v7568_v43 = vpop.f32.mrb[94].mxu0  ;;  %3514 = vmatprep.mubr.bf16.mxu0 %v3065_v30 }
 0x3da   : > { %v3409_v22 = vpop.f32.mrb[95].mxu0  ;;  %3515 = vmatmul.mubr.bf16.gmra.mrb[148].mxu0 %v3064_v8 }
 0x3df   : > { %v7570_v33 = vpop.f32.mrb[96].mxu0 }
 0x3e0   : > { %v3414_v34 = vpop.f32.mrb[97].mxu0 }
 0x3e1   : > { %v7572_v17 = vpop.f32.mrb[98].mxu0 }
 0x3e2   : > { %v3417_v29 = vpop.f32.mrb[99].mxu0 }
 0x3e7   : > { %v7580_v23 = vpop.f32.mrb[100].mxu0 }
 0x3e8   : > { %v2795_v11 = vpop.f32.mrb[88].mxu1  ;;  %v3422_v28 = vpop.f32.mrb[101].mxu0 }
 0x3e9   : > { %v2796_v25 = vadd.f32 %v2795_v11, %v7232_v4  ;;  %v2797_v42 = vpop.f32.mrb[89].mxu1  ;;  %v7583_v20 = vpop.f32.mrb[102].mxu0 }
 0x3ea   : > { %v2798_v21 = vadd.f32 %v2797_v42, %v7236_v41  ;;  %v2799_v2 = vpop.f32.mrb[90].mxu1  ;;  %v3425_v6 = vpop.f32.mrb[103].mxu0 }
 0x3eb   : > { %v2800_v15 = vadd.f32 %v2799_v2, %v7232_v4  ;;  %v2801_v32 = vpop.f32.mrb[91].mxu1  ;;  %v2982_v45 = vmax.f32 %v2796_v25, 0.0 }
 0x3ec   : > { %v2802_v62 = vadd.f32 %v2801_v32, %v7236_v41  ;;  %v2983_v60 = vmax.f32 %v2798_v21, 0.0 }
 0x3ed   : > { %v2984_v39 = vmax.f32 %v2800_v15, 0.0 }
 0x3ee   : > { %v2985_v57 = vmax.f32 %v2802_v62, 0.0 }
 0x3ef   : > { %v3066_v13 = vpack.c.bf16 %v2984_v39, %v2982_v45 }
 0x3f0   : > { %v3067_v59 = vpack.c.bf16 %v2985_v57, %v2983_v60  ;;  %v2805_v18 = vpop.f32.mrb[92].mxu1 }
 0x3f1   : > { %v3141_v40 = vmax.bf16 %v3140_v50, %v3066_v13  ;;  %v2806_v9 = vadd.f32 %v2805_v18, %v7232_v4  ;;  %v2807_v35 = vpop.f32.mrb[93].mxu1 }
 0x3f2   : > { %v3166_v5 = vmax.bf16 %v3165_v55, %v3067_v59  ;;  %v2808_v46 = vadd.f32 %v2807_v35, %v7236_v41  ;;  %v2809_v53 = vpop.f32.mrb[94].mxu1  ;;  %3522 = vmatprep.mubr.bf16.mxu0 %v3067_v59 }
 0x3f3   : > { %v2810_v16 = vadd.f32 %v2809_v53, %v7232_v4  ;;  %v2811_v8 = vpop.f32.mrb[95].mxu1  ;;  %3523 = vmatmul.mubr.bf16.gmra.mrb[152].mxu0 %v3066_v13  ;;  %v2986_v22 = vmax.f32 %v2806_v9, 0.0 }
 0x3f4   : > { %v2812_v30 = vadd.f32 %v2811_v8, %v7236_v41  ;;  %v7592_v38 = vpop.f32.mrb[104].mxu0  ;;  %v2987_v50 = vmax.f32 %v2808_v46, 0.0 }
 0x3f5   : > { %v2988_v34 = vmax.f32 %v2810_v16, 0.0  ;;  %v3430_v29 = vpop.f32.mrb[105].mxu0 }
 0x3f6   : > { %v2989_v36 = vmax.f32 %v2812_v30, 0.0  ;;  %v7594_v24 = vpop.f32.mrb[106].mxu0 }
 0x3f7   : > { %v3068_v55 = vpack.c.bf16 %v2988_v34, %v2986_v22  ;;  %v3433_v11 = vpop.f32.mrb[107].mxu0 }
 0x3f8   : > { %v3069_v28 = vpack.c.bf16 %v2989_v36, %v2987_v50 }
 0x3f9   : > { %v3142_v25 = vmax.bf16 %v3141_v40, %v3068_v55 }
 0x3fa   : > { %v3167_v42 = vmax.bf16 %v3166_v5, %v3069_v28  ;;  %3530 = vmatprep.mubr.bf16.mxu0 %v3069_v28  ;;  %v6083_v28 = vld [vmem:[%s8702_s8 + $0x78] sm:$0xff]  }
 0x3fb   : > { %3531 = vmatmul.mubr.bf16.gmra.mrb[156].mxu0 %v3068_v55  ;;  %5697 = vmatprep.subr.bf16.mxu0 %v6083_v28 }
 0x3fc   : > { %v7596_v21 = vpop.f32.mrb[108].mxu0 }
 0x3fd   : > { %v3438_v2 = vpop.f32.mrb[109].mxu0 }
 0x3fe   : > { %v7598_v6 = vpop.f32.mrb[110].mxu0 }
 0x3ff   : > { %v3441_v15 = vpop.f32.mrb[111].mxu0 }
 0x40d   : > { %v2815_v32 = vpop.f32.mrb[96].mxu1 }
 0x40e   : > { %v2816_v62 = vadd.f32 %v2815_v32, %v7232_v4  ;;  %v2817_v45 = vpop.f32.mrb[97].mxu1 }
 0x40f   : > { %v2818_v39 = vadd.f32 %v2817_v45, %v7236_v41  ;;  %v2819_v60 = vpop.f32.mrb[98].mxu1 }
 0x410   : > { %v2820_v57 = vadd.f32 %v2819_v60, %v7232_v4  ;;  %v2821_v13 = vpop.f32.mrb[99].mxu1  ;;  %v2990_v18 = vmax.f32 %v2816_v62, 0.0 }
 0x411   : > { %v2822_v59 = vadd.f32 %v2821_v13, %v7236_v41  ;;  %v2991_v9 = vmax.f32 %v2818_v39, 0.0 }
 0x412   : > { %v2992_v40 = vmax.f32 %v2820_v57, 0.0 }
 0x413   : > { %v2993_v35 = vmax.f32 %v2822_v59, 0.0 }
 0x414   : > { %v3070_v5 = vpack.c.bf16 %v2992_v40, %v2990_v18 }
 0x415   : > { %v3071_v46 = vpack.c.bf16 %v2993_v35, %v2991_v9  ;;  %v2825_v53 = vpop.f32.mrb[100].mxu1 }
 0x416   : > { %v3143_v16 = vmax.bf16 %v3142_v25, %v3070_v5  ;;  %v2826_v8 = vadd.f32 %v2825_v53, %v7232_v4  ;;  %v2827_v30 = vpop.f32.mrb[101].mxu1  ;;  %v6084_v25 = vld [vmem:[%s8702_s8 + $0x38] sm:$0xff]  }
 0x417   : > { %v3168_v22 = vmax.bf16 %v3167_v42, %v3071_v46  ;;  %v2828_v34 = vadd.f32 %v2827_v30, %v7236_v41  ;;  %v2829_v29 = vpop.f32.mrb[102].mxu1  ;;  %3538 = vmatprep.mubr.bf16.mxu0 %v3071_v46  ;;  %v6085_v42 = vld [vmem:[%s8704_s10] sm:$0xff]   ;;  %5698 = vmatpush3.bf16.msra.mxu0 %v6084_v25  ;;  %v6086_v46 = vld [vmem:[%s8704_s10 + $0x8] sm:$0xff]  }
 0x418   : > { %v2830_v50 = vadd.f32 %v2829_v29, %v7232_v4  ;;  %v2831_v36 = vpop.f32.mrb[103].mxu1  ;;  %3539 = vmatmul.mubr.bf16.gmra.mrb[160].mxu0 %v3070_v5  ;;  %v2994_v2 = vmax.f32 %v2826_v8, 0.0  ;;  %5839 = vmatprep.subr.bf16.mxu1 %v6085_v42 }
 0x419   : > { %v2832_v55 = vadd.f32 %v2831_v36, %v7236_v41  ;;  %v7608_v11 = vpop.f32.mrb[112].mxu0  ;;  %v2995_v62 = vmax.f32 %v2828_v34, 0.0  ;;  %5840 = vmatpush3.bf16.msra.mxu1 %v6085_v42  ;;  %v6087_v34 = vld [vmem:[%s8704_s10 + $0x10] sm:$0xff]  }
 0x41a   : > { %v2996_v15 = vmax.f32 %v2830_v50, 0.0  ;;  %v3446_v32 = vpop.f32.mrb[113].mxu0  ;;  %5841 = vmatprep.subr.bf16.mxu1 %v6086_v46 }
 0x41b   : > { %v2997_v45 = vmax.f32 %v2832_v55, 0.0  ;;  %v7619_v39 = vpop.f32.mrb[114].mxu0 }
 0x41c   : > { %v3072_v60 = vpack.c.bf16 %v2996_v15, %v2994_v2  ;;  %v3449_v57 = vpop.f32.mrb[115].mxu0 }
 0x41d   : > { %v3073_v13 = vpack.c.bf16 %v2997_v45, %v2995_v62  ;;  %5842 = vmatpush3.bf16.msra.mxu1 %v6086_v46 }
 0x41e   : > { %v3144_v59 = vmax.bf16 %v3143_v16, %v3072_v60  ;;  %5843 = vmatprep.subr.bf16.mxu1 %v6087_v34 }
 0x41f   : > { %v3169_v18 = vmax.bf16 %v3168_v22, %v3073_v13  ;;  %3546 = vmatprep.mubr.bf16.mxu0 %v3073_v13 }
 0x420   : > { %3547 = vmatmul.mubr.bf16.gmra.mrb[164].mxu0 %v3072_v60 }
 0x421   : > { %v7621_v40 = vpop.f32.mrb[116].mxu0  ;;  %5844 = vmatpush3.bf16.msra.mxu1 %v6087_v34 }
 0x422   : > { %v3454_v9 = vpop.f32.mrb[117].mxu0 }
 0x423   : > { %v7623_v35 = vpop.f32.mrb[118].mxu0 }
 0x424   : > { %v3457_v5 = vpop.f32.mrb[119].mxu0 }
 0x42e   : > { %v2835_v53 = vpop.f32.mrb[104].mxu1 }
 0x42f   : > { %v2836_v8 = vadd.f32 %v2835_v53, %v7232_v4  ;;  %v2837_v30 = vpop.f32.mrb[105].mxu1 }
 0x430   : > { %v2838_v16 = vadd.f32 %v2837_v30, %v7236_v41  ;;  %v2839_v22 = vpop.f32.mrb[106].mxu1 }
 0x431   : > { %v2840_v29 = vadd.f32 %v2839_v22, %v7232_v4  ;;  %v2841_v50 = vpop.f32.mrb[107].mxu1  ;;  %v2998_v55 = vmax.f32 %v2836_v8, 0.0 }
 0x432   : > { %v2842_v36 = vadd.f32 %v2841_v50, %v7236_v41  ;;  %v2999_v25 = vmax.f32 %v2838_v16, 0.0 }
 0x433   : > { %v3000_v28 = vmax.f32 %v2840_v29, 0.0 }
 0x434   : > { %v3001_v42 = vmax.f32 %v2842_v36, 0.0 }
 0x435   : > { %v3074_v2 = vpack.c.bf16 %v3000_v28, %v2998_v55 }
 0x436   : > { %v3075_v15 = vpack.c.bf16 %v3001_v42, %v2999_v25  ;;  %v2845_v32 = vpop.f32.mrb[108].mxu1 }
 0x437   : > { %v3145_v62 = vmax.bf16 %v3144_v59, %v3074_v2  ;;  %v2846_v45 = vadd.f32 %v2845_v32, %v7232_v4  ;;  %v2847_v60 = vpop.f32.mrb[109].mxu1  ;;  %v6088_v32 = vld [vmem:[%s8704_s10 + $0x18] sm:$0xff]  }
 0x438   : > { %v3170_v57 = vmax.bf16 %v3169_v18, %v3075_v15  ;;  %v2848_v13 = vadd.f32 %v2847_v60, %v7236_v41  ;;  %v2849_v9 = vpop.f32.mrb[110].mxu1  ;;  %3554 = vmatprep.mubr.bf16.mxu0 %v3075_v15  ;;  %5845 = vmatprep.subr.bf16.mxu1 %v6088_v32 }
 0x439   : > { %v2850_v5 = vadd.f32 %v2849_v9, %v7232_v4  ;;  %v2851_v46 = vpop.f32.mrb[111].mxu1  ;;  %3555 = vmatmul.mubr.bf16.gmra.mrb[168].mxu0 %v3074_v2  ;;  %v3002_v30 = vmax.f32 %v2846_v45, 0.0  ;;  %5846 = vmatpush3.bf16.msra.mxu1 %v6088_v32 }
 0x43a   : > { %v2852_v53 = vadd.f32 %v2851_v46, %v7236_v41  ;;  %v7639_v8 = vpop.f32.mrb[120].mxu0  ;;  %v3003_v59 = vmax.f32 %v2848_v13, 0.0 }
 0x43b   : > { %v3004_v16 = vmax.f32 %v2850_v5, 0.0  ;;  %v3462_v22 = vpop.f32.mrb[121].mxu0 }
 0x43c   : > { %v3005_v34 = vmax.f32 %v2852_v53, 0.0  ;;  %v7641_v29 = vpop.f32.mrb[122].mxu0 }
 0x43d   : > { %v3076_v18 = vpack.c.bf16 %v3004_v16, %v3002_v30  ;;  %v3465_v50 = vpop.f32.mrb[123].mxu0 }
 0x43e   : > { %v3077_v36 = vpack.c.bf16 %v3005_v34, %v3003_v59 }
 0x43f   : > { %v3146_v55 = vmax.bf16 %v3145_v62, %v3076_v18 }
 0x440   : > { %v3171_v28 = vmax.bf16 %v3170_v57, %v3077_v36  ;;  %3562 = vmatprep.mubr.bf16.mxu0 %v3077_v36 }
 0x441   : > { %3563 = vmatmul.mubr.bf16.gmra.mrb[172].mxu0 %v3076_v18 }
 0x442   : > { %v7643_v25 = vpop.f32.mrb[124].mxu0 }
 0x443   : > { %v3470_v42 = vpop.f32.mrb[125].mxu0 }
 0x444   : > { %v7645_v2 = vpop.f32.mrb[126].mxu0 }
 0x445   : > { %8722 = vst [vmem:[#allocation2_spill] sm:$0xff] %v7645_v2  ;;  %v3473_v15 = vpop.f32.mrb[127].mxu0 }
 0x453   : > { %v2855_v45 = vpop.f32.mrb[112].mxu1 }
 0x454   : > { %v2856_v60 = vadd.f32 %v2855_v45, %v7232_v4  ;;  %v2857_v13 = vpop.f32.mrb[113].mxu1 }
 0x455   : > { %v2858_v62 = vadd.f32 %v2857_v13, %v7236_v41  ;;  %v2859_v57 = vpop.f32.mrb[114].mxu1 }
 0x456   : > { %v2860_v9 = vadd.f32 %v2859_v57, %v7232_v4  ;;  %v2861_v5 = vpop.f32.mrb[115].mxu1  ;;  %v3006_v53 = vmax.f32 %v2856_v60, 0.0 }
 0x457   : > { %v2862_v46 = vadd.f32 %v2861_v5, %v7236_v41  ;;  %v3007_v16 = vmax.f32 %v2858_v62, 0.0 }
 0x458   : > { %v3008_v30 = vmax.f32 %v2860_v9, 0.0 }
 0x459   : > { %v3009_v22 = vmax.f32 %v2862_v46, 0.0 }
 0x45a   : > { %v3078_v59 = vpack.c.bf16 %v3008_v30, %v3006_v53 }
 0x45b   : > { %v3079_v34 = vpack.c.bf16 %v3009_v22, %v3007_v16  ;;  %v2865_v18 = vpop.f32.mrb[116].mxu1 }
 0x45c   : > { %v3147_v50 = vmax.bf16 %v3146_v55, %v3078_v59  ;;  %v2866_v36 = vadd.f32 %v2865_v18, %v7232_v4  ;;  %v2867_v42 = vpop.f32.mrb[117].mxu1 }
 0x45d   : > { %v3172_v15 = vmax.bf16 %v3171_v28, %v3079_v34  ;;  %v2868_v32 = vadd.f32 %v2867_v42, %v7236_v41  ;;  %v2869_v45 = vpop.f32.mrb[118].mxu1  ;;  %3570 = vmatprep.mubr.bf16.mxu0 %v3079_v34 }
 0x45e   : > { %v2870_v13 = vadd.f32 %v2869_v45, %v7232_v4  ;;  %v2871_v57 = vpop.f32.mrb[119].mxu1  ;;  %3571 = vmatmul.mubr.bf16.gmra.mrb[176].mxu0 %v3078_v59  ;;  %v3010_v9 = vmax.f32 %v2866_v36, 0.0 }
 0x45f   : > { %v2872_v60 = vadd.f32 %v2871_v57, %v7236_v41  ;;  %v7658_v62 = vpop.f32.mrb[128].mxu0  ;;  %v3011_v55 = vmax.f32 %v2868_v32, 0.0  ;;  %v3102_v32 = vunpack.i.h.bf16 %v7473_v48 }
 0x460   : > { %8723 = vst [vmem:[#allocation3_spill] sm:$0xff] %v7658_v62  ;;  %v3012_v5 = vmax.f32 %v2870_v13, 0.0  ;;  %v3478_v46 = vpop.f32.mrb[129].mxu0  ;;  %v3101_v13 = vunpack.i.l.bf16 %v7473_v48 }
 0x461   : > { %v3013_v53 = vmax.f32 %v2872_v60, 0.0  ;;  %v7660_v30 = vpop.f32.mrb[130].mxu0 }
 0x462   : > { %8724 = vst [vmem:[#allocation4_spill] sm:$0xff] %v7660_v30  ;;  %v3080_v28 = vpack.c.bf16 %v3012_v5, %v3010_v9  ;;  %v3481_v16 = vpop.f32.mrb[131].mxu0  ;;  %v3126_v5 = vunpack.i.l.bf16 %v7475_v37  ;;  %v3103_v48 = vmax.f32 %v3101_v13, %v3102_v32 }
 0x463   : > { %v3081_v22 = vpack.c.bf16 %v3013_v53, %v3011_v55  ;;  %v6089_v55 = vld [vmem:[%s8704_s10 + $0x20] sm:$0xff]  }
 0x464   : > { %v3148_v18 = vmax.bf16 %v3147_v50, %v3080_v28  ;;  %v3127_v50 = vunpack.i.h.bf16 %v7475_v37  ;;  %5847 = vmatprep.subr.bf16.mxu1 %v6089_v55  ;;  %v3104_v0 = vrot.slane %v3103_v48, 4 }
 0x465   : > { %v3173_v34 = vmax.bf16 %v3172_v15, %v3081_v22  ;;  %3578 = vmatprep.mubr.bf16.mxu0 %v3081_v22  ;;  %5848 = vmatpush3.bf16.msra.mxu1 %v6089_v55 }
 0x466   : > { %3579 = vmatmul.mubr.bf16.gmra.mrb[180].mxu0 %v3080_v28 }
 0x467   : > { %v7662_v42 = vpop.f32.mrb[132].mxu0 }
 0x468   : > { %8725 = vst [vmem:[#allocation5_spill] sm:$0xff] %v7662_v42  ;;  %v3486_v59 = vpop.f32.mrb[133].mxu0 }
 0x469   : > { %v7664_v45 = vpop.f32.mrb[134].mxu0 }
 0x46a   : > { %8726 = vst [vmem:[#allocation6_spill] sm:$0xff] %v7664_v45  ;;  %v3489_v57 = vpop.f32.mrb[135].mxu0 }
 0x46b   : > { %v3128_v57 = vmax.f32 %v3126_v5, %v3127_v50  ;;  %v3105_v50 = vmax.f32 %v3103_v48, %v3104_v0 }
 0x474   : > { %v2875_v36 = vpop.f32.mrb[120].mxu1 }
 0x475   : > { %v2876_v60 = vadd.f32 %v2875_v36, %v7232_v4  ;;  %v2877_v9 = vpop.f32.mrb[121].mxu1 }
 0x476   : > { %v2878_v15 = vadd.f32 %v2877_v9, %v7236_v41  ;;  %v2879_v46 = vpop.f32.mrb[122].mxu1 }
 0x477   : > { %v2880_v53 = vadd.f32 %v2879_v46, %v7232_v4  ;;  %v2881_v28 = vpop.f32.mrb[123].mxu1  ;;  %v3014_v22 = vmax.f32 %v2876_v60, 0.0  ;;  %v3129_v46 = vrot.slane %v3128_v57, 4 }
 0x478   : > { %v2882_v16 = vadd.f32 %v2881_v28, %v7236_v41  ;;  %v3015_v36 = vmax.f32 %v2878_v15, 0.0 }
 0x479   : > { %v3016_v59 = vmax.f32 %v2880_v53, 0.0 }
 0x47a   : > { %v3017_v37 = vmax.f32 %v2882_v16, 0.0 }
 0x47b   : > { %v3082_v51 = vpack.c.bf16 %v3016_v59, %v3014_v22 }
 0x47c   : > { %v3083_v9 = vpack.c.bf16 %v3017_v37, %v3015_v36  ;;  %v2885_v1 = vpop.f32.mrb[124].mxu1  ;;  %v3106_v36 = vrot.slane %v3105_v50, 2 }
 0x47d   : > { %v3149_v45 = vmax.bf16 %v3148_v18, %v3082_v51  ;;  %v2886_v42 = vadd.f32 %v2885_v1, %v7232_v4  ;;  %v2887_v30 = vpop.f32.mrb[125].mxu1  ;;  %v3130_v1 = vmax.f32 %v3128_v57, %v3129_v46 }
 0x47e   : > { %v3174_v62 = vmax.bf16 %v3173_v34, %v3083_v9  ;;  %v2888_v28 = vadd.f32 %v2887_v30, %v7236_v41  ;;  %v2889_v2 = vpop.f32.mrb[126].mxu1  ;;  %3586 = vmatprep.mubr.bf16.mxu0 %v3083_v9  ;;  %v3107_v57 = vmax.f32 %v3105_v50, %v3106_v36 }
 0x47f   : > { %v2890_v13 = vadd.f32 %v2889_v2, %v7232_v4  ;;  %v2891_v32 = vpop.f32.mrb[127].mxu1  ;;  %3587 = vmatmul.mubr.bf16.gmra.mrb[184].mxu0 %v3082_v51  ;;  %v3018_v15 = vmax.f32 %v2886_v42, 0.0  ;;  %v3131_v2 = vrot.slane %v3130_v1, 2 }
 0x480   : > { %v2892_v60 = vadd.f32 %v2891_v32, %v7236_v41  ;;  %v7681_v5 = vpop.f32.mrb[136].mxu0  ;;  %v3019_v53 = vmax.f32 %v2888_v28, 0.0 }
 0x481   : > { %v3020_v18 = vmax.f32 %v2890_v13, 0.0  ;;  %v3494_v55 = vpop.f32.mrb[137].mxu0  ;;  %v3132_v32 = vmax.f32 %v3130_v1, %v3131_v2  ;;  %v6090_v2 = vld [vmem:[%s8704_s10 + $0x28] sm:$0xff]  }
 0x482   : > { %v3021_v16 = vmax.f32 %v2892_v60, 0.0  ;;  %v7683_v34 = vpop.f32.mrb[138].mxu0  ;;  %5849 = vmatprep.subr.bf16.mxu1 %v6090_v2 }
 0x483   : > { %v3084_v30 = vpack.c.bf16 %v3020_v18, %v3018_v15  ;;  %v3497_v22 = vpop.f32.mrb[139].mxu0  ;;  %v3108_v18 = vrot.slane %v3107_v57, 1  ;;  %5850 = vmatpush3.bf16.msra.mxu1 %v6090_v2 }
 0x484   : > { %v3085_v59 = vpack.c.bf16 %v3021_v16, %v3019_v53  ;;  %v3133_v53 = vrot.slane %v3132_v32, 1 }
 0x485   : > { %v3150_v4 = vmax.bf16 %v3149_v45, %v3084_v30  ;;  %v3109_v22 = vmax.f32 %v3107_v57, %v3108_v18 }
 0x486   : > { %v3175_v51 = vmax.bf16 %v3174_v62, %v3085_v59  ;;  %3594 = vmatprep.mubr.bf16.mxu0 %v3085_v59 }
 0x487   : > { %v3151_v41 = vunpack.i.l.bf16 %v3150_v4  ;;  %v3152_v37 = vunpack.i.h.bf16 %v3150_v4  ;;  %3595 = vmatmul.mubr.bf16.gmra.mrb[188].mxu0 %v3084_v30  ;;  %v3134_v4 = vmax.f32 %v3132_v32, %v3133_v53 }
 0x488   : > { %v3176_v0 = vunpack.i.l.bf16 %v3175_v51  ;;  %v3177_v42 = vunpack.i.h.bf16 %v3175_v51  ;;  %v7685_v48 = vpop.f32.mrb[140].mxu0 }
 0x489   : > { %v3153_v9 = vmax.f32 %v3151_v41, %v3152_v37  ;;  %v3502_v46 = vpop.f32.mrb[141].mxu0  ;;  %v3110_v41 = vpack.i.bf16 %v3109_v22, %v3109_v22 }
 0x48a   : > { %v3178_v28 = vmax.f32 %v3176_v0, %v3177_v42  ;;  %v7687_v13 = vpop.f32.mrb[142].mxu0  ;;  %v3135_v0 = vpack.i.bf16 %v3134_v4, %v3134_v4 }
 0x48b   : > { %v3154_v60 = vrot.slane %v3153_v9, 4  ;;  %v3505_v15 = vpop.f32.mrb[143].mxu0  ;;  %v3639_v46 = vunpack.c.l.b16 %v3110_v41 }
 0x48c   : > { %v3179_v45 = vrot.slane %v3178_v28, 4  ;;  %v3640_v57 = vunpack.c.l.b16 %v3135_v0 }
 0x48d   : > { %v3155_v62 = vmax.f32 %v3153_v9, %v3154_v60 }
 0x48e   : > { %v3180_v55 = vmax.f32 %v3178_v28, %v3179_v45 }
 0x48f   : > { %v3156_v16 = vrot.slane %v3155_v62, 2 }
 0x490   : > { %v3181_v30 = vrot.slane %v3180_v55, 2 }
 0x491   : > { %v3157_v59 = vmax.f32 %v3155_v62, %v3156_v16 }
 0x492   : > { %v3182_v51 = vmax.f32 %v3180_v55, %v3181_v30 }
 0x493   : > { %v3158_v50 = vrot.slane %v3157_v59, 1 }
 0x494   : > { %v3183_v36 = vrot.slane %v3182_v51, 1 }
 0x495   : > { %v3159_v37 = vmax.f32 %v3157_v59, %v3158_v50 }
 0x496   : > { %v3184_v42 = vmax.f32 %v3182_v51, %v3183_v36  ;;  %v6091_v51 = vld [vmem:[%s8704_s10 + $0x30] sm:$0xff]  }
 0x497   : > { %v3160_v1 = vpack.i.bf16 %v3159_v37, %v3159_v37  ;;  %5851 = vmatprep.subr.bf16.mxu1 %v6091_v51 }
 0x498   : > { %v3185_v9 = vpack.i.bf16 %v3184_v42, %v3184_v42  ;;  %5852 = vmatpush3.bf16.msra.mxu1 %v6091_v51  ;;  %v6114_v51 = vld [vmem:[%s6278_s24 + $0x100] sm:$0xff] }
 0x499   : > { %v3641_v28 = vunpack.c.l.b16 %v3160_v1 }
 0x49a   : > { %v3642_v60 = vunpack.c.l.b16 %v3185_v9  ;;  %v6092_v9 = vld [vmem:[%s8704_s10 + $0x38] sm:$0xff]  }
 0x49b   : > { %v3644_v32 = vsel %vm3643_vm2, %v3641_v28, %v3639_v46  ;;  %5853 = vmatprep.subr.bf16.mxu1 %v6092_v9 }
 0x49c   : > { %v3645_v15 = vsel %vm3643_vm2, %v3642_v60, %v3640_v57  ;;  %v7696_v18 = vpack.c.b16 %v3644_v32, %v3644_v32  ;;  %5854 = vmatpush3.bf16.msra.mxu1 %v6092_v9 }
 0x49d   : > { %v7694_v45 = vpack.c.b16 %v3645_v15, %v3645_v15 }
 0x49e   : > { %8728 = vst [vmem:[#allocation8_spill] sm:$0xff] %v7696_v18 }
 0x49f   : > { %8727 = vst [vmem:[#allocation7_spill] sm:$0xff] %v7694_v45  ;;  %3778 = vmatprep.mubr.bf16.mxu0 %v7694_v45 }
 0x4a0   : > { %3779 = vmatmul.mubr.bf16.vlgmr.msra.gmra.mrb[192].mxu0 %v7696_v18  ;;  %v6117_v18 = vld [vmem:[%s6278_s24 + $0x120] sm:$0xff] }
 0x4a5   : > { %v7700_v62 = vpop.f32.mrb[144].mxu0 }
 0x4a6   : > { %v3510_v55 = vpop.f32.mrb[145].mxu0 }
 0x4a7   : > { %v7702_v53 = vpop.f32.mrb[146].mxu0 }
 0x4a8   : > { %v3513_v16 = vpop.f32.mrb[147].mxu0 }
 0x4ad   : > { %v7704_v30 = vpop.f32.mrb[148].mxu0 }
 0x4ae   : > { %v3518_v22 = vpop.f32.mrb[149].mxu0 }
 0x4af   : > { %v7706_v59 = vpop.f32.mrb[150].mxu0  ;;  %v6113_v22 = vld [vmem:[%s6278_s24 + $0x108] sm:$0xff] }
 0x4b0   : > { %v3521_v4 = vpop.f32.mrb[151].mxu0 }
 0x4b1   : > { %v4976_v4 = vsel %vm4905_vm0, %v6113_v22, 0.0  ;;  %v6118_v22 = vld [vmem:[%s6278_s24 + $0x128] sm:$0xff] }
 0x4c6   : > { %v7711_v50 = vpop.f32.mrb[152].mxu0 }
 0x4c7   : > { %v3526_v36 = vpop.f32.mrb[153].mxu0 }
 0x4c8   : > { %v7713_v41 = vpop.f32.mrb[154].mxu0  ;;  %v4975_v36 = vsel %vm4905_vm0, %v6114_v51, 0.0 }
 0x4c9   : > { %v3529_v37 = vpop.f32.mrb[155].mxu0 }
 0x4ca   : > { %v4977_v37 = vadd.f32 %v4976_v4, %v4975_v36  ;;  %v6119_v4 = vld [vmem:[%s6278_s24 + $0x130] sm:$0xff] }
 0x4cb   : > { %v4986_v36 = vsel %vm4905_vm0, %v6119_v4, 0.0 }
 0x4ce   : > { %v7715_v0 = vpop.f32.mrb[156].mxu0 }
 0x4cf   : > { %8729 = vst [vmem:[#allocation9_spill] sm:$0xff] %v7715_v0  ;;  %v3534_v42 = vpop.f32.mrb[157].mxu0 }
 0x4d0   : > { %v7717_v1 = vpop.f32.mrb[158].mxu0  ;;  %v6115_v42 = vld [vmem:[%s6278_s24 + $0x110] sm:$0xff] }
 0x4d1   : > { %8730 = vst [vmem:[#allocation10_spill] sm:$0xff] %v7717_v1  ;;  %v3537_v2 = vpop.f32.mrb[159].mxu0  ;;  %v6167_v1 = vld [vmem:[%s6278_s24 + $0xf0] sm:$0xff] }
 0x4d2   : > { %v4978_v2 = vsel %vm4905_vm0, %v6115_v42, 0.0 }
 0x4d3   : > { %v4979_v9 = vadd.f32 %v4978_v2, %v4977_v37 }
 0x4eb   : > { %v7722_v46 = vpop.f32.mrb[160].mxu0 }
 0x4ec   : > { %8731 = vst [vmem:[#allocation11_spill] sm:$0xff] %v7722_v46  ;;  %v3542_v28 = vpop.f32.mrb[161].mxu0  ;;  %v6165_v46 = vld [vmem:[%s6278_s24 + $0x1f8] sm:$0xff] }
 0x4ed   : > { %v7724_v57 = vpop.f32.mrb[162].mxu0  ;;  %v6116_v28 = vld [vmem:[%s6278_s24 + $0x118] sm:$0xff] }
 0x4ee   : > { %8732 = vst [vmem:[#allocation12_spill] sm:$0xff] %v7724_v57  ;;  %v3545_v60 = vpop.f32.mrb[163].mxu0  ;;  %v6134_v57 = vld [vmem:[%s6278_s24 + $0x68] sm:$0xff] }
 0x4ef   : > { %v4980_v60 = vsel %vm4905_vm0, %v6116_v28, 0.0  ;;  %v6120_v28 = vld [vmem:[%s6278_s24 + $0x138] sm:$0xff] }
 0x4f3   : > { %v7726_v32 = vpop.f32.mrb[164].mxu0 }
 0x4f4   : > { %8733 = vst [vmem:[#allocation13_spill] sm:$0xff] %v7726_v32  ;;  %v3550_v15 = vpop.f32.mrb[165].mxu0 }
 0x4f5   : > { %v7728_v55 = vpop.f32.mrb[166].mxu0  ;;  %v4981_v15 = vadd.f32 %v4980_v60, %v4979_v9 }
 0x4f6   : > { %8734 = vst [vmem:[#allocation14_spill] sm:$0xff] %v7728_v55  ;;  %v3553_v16 = vpop.f32.mrb[167].mxu0  ;;  %v4984_v55 = vsel %vm4905_vm0, %v6118_v22, 0.0 }
 0x4f7   : > { %v4982_v16 = vsel %vm4905_vm0, %v6117_v18, 0.0  ;;  %v4988_v18 = vsel %vm4905_vm0, %v6120_v28, 0.0  ;;  %v6123_v28 = vld [vmem:[%s6278_s24 + $0x150] sm:$0xff] }
 0x4f8   : > { %v4983_v45 = vadd.f32 %v4982_v16, %v4981_v15 }
 0x4fa   : > { %v4985_v32 = vadd.f32 %v4984_v55, %v4983_v45  ;;  %v6121_v45 = vld [vmem:[%s6278_s24 + $0x140] sm:$0xff] }
 0x4fb   : > { %v4990_v55 = vsel %vm4905_vm0, %v6121_v45, 0.0 }
 0x4fc   : > { %v4987_v9 = vadd.f32 %v4986_v36, %v4985_v32 }
 0x4fe   : > { %v4989_v60 = vadd.f32 %v4988_v18, %v4987_v9  ;;  %v4994_v9 = vsel %vm4905_vm0, %v6123_v28, 0.0 }
 0x50c   : > { %v7742_v51 = vpop.f32.mrb[168].mxu0 }
 0x50d   : > { %8735 = vst [vmem:[#allocation15_spill] sm:$0xff] %v7742_v51  ;;  %v3558_v37 = vpop.f32.mrb[169].mxu0 }
 0x50e   : > { %v7746_v42 = vpop.f32.mrb[170].mxu0  ;;  %v4991_v37 = vadd.f32 %v4990_v55, %v4989_v60  ;;  %v6126_v55 = vld [vmem:[%s6278_s24 + $0x48] sm:$0xff] }
 0x50f   : > { %8736 = vst [vmem:[#allocation16_spill] sm:$0xff] %v7746_v42  ;;  %v3561_v2 = vpop.f32.mrb[171].mxu0  ;;  %v6129_v42 = vld [vmem:[%s6278_s24 + $0x168] sm:$0xff] }
 0x510   : > { %v6122_v2 = vld [vmem:[%s6278_s24 + $0x148] sm:$0xff] }
 0x511   : > { %v4992_v32 = vsel %vm4905_vm0, %v6122_v2, 0.0  ;;  %v6127_v2 = vld [vmem:[%s6278_s24 + $0x160] sm:$0xff] }
 0x512   : > { %v4993_v36 = vadd.f32 %v4992_v32, %v4991_v37  ;;  %v4923_v37 = vsel %vm4905_vm0, %v6126_v55, 0.0  ;;  %v4998_v32 = vsel %vm4905_vm0, %v6127_v2, 0.0  ;;  %v6132_v2 = vld [vmem:[%s6278_s24 + $0x60] sm:$0xff] }
 0x514   : > { %v7750_v15 = vpop.f32.mrb[172].mxu0  ;;  %v4995_v18 = vadd.f32 %v4994_v9, %v4993_v36  ;;  %v6128_v9 = vld [vmem:[%s6278_s24 + $0x50] sm:$0xff] }
 0x515   : > { %8737 = vst [vmem:[#allocation17_spill] sm:$0xff] %v7750_v15  ;;  %v3566_v16 = vpop.f32.mrb[173].mxu0  ;;  %v6124_v15 = vld [vmem:[%s6278_s24 + $0x40] sm:$0xff] }
 0x516   : > { %v7754_v22 = vpop.f32.mrb[174].mxu0  ;;  %v4921_v45 = vsel %vm4905_vm0, %v6124_v15, 0.0  ;;  %v6125_v16 = vld [vmem:[%s6278_s24 + $0x158] sm:$0xff]  ;;  %v4925_v15 = vsel %vm4905_vm0, %v6128_v9, 0.0 }
 0x517   : > { %8738 = vst [vmem:[#allocation18_spill] sm:$0xff] %v7754_v22  ;;  %v3569_v4 = vpop.f32.mrb[175].mxu0  ;;  %v4996_v22 = vsel %vm4905_vm0, %v6125_v16, 0.0  ;;  %v5000_v16 = vsel %vm4905_vm0, %v6129_v42, 0.0  ;;  %v6133_v42 = vld [vmem:[%s6278_s24 + $0x178] sm:$0xff] }
 0x518   : > { %v4922_v4 = vadd.f32 %v4921_v45, %v6302_v26  ;;  %v4997_v60 = vadd.f32 %v4996_v22, %v4995_v18  ;;  %v6130_v45 = vld [vmem:[%s6278_s24 + $0x58] sm:$0xff]  ;;  %v6131_v18 = vld [vmem:[%s6278_s24 + $0x170] sm:$0xff] }
 0x519   : > { %v4927_v22 = vsel %vm4905_vm0, %v6130_v45, 0.0  ;;  %v5002_v55 = vsel %vm4905_vm0, %v6131_v18, 0.0 }
 0x51a   : > { %v4924_v28 = vadd.f32 %v4923_v37, %v4922_v4  ;;  %v4999_v36 = vadd.f32 %v4998_v32, %v4997_v60  ;;  %v6093_v4 = vld [vmem:[%s8706_s12 + $0x40] sm:$0xff]   ;;  %v4929_v32 = vsel %vm4905_vm0, %v6132_v2, 0.0 }
 0x51b   : > { %5745 = vmatprep.subr.bf16.mxu1 %v6093_v4 }
 0x51c   : > { %v4926_v51 = vadd.f32 %v4925_v15, %v4924_v28  ;;  %v5001_v26 = vadd.f32 %v5000_v16, %v4999_v36  ;;  %v5004_v28 = vsel %vm4905_vm0, %v6133_v42, 0.0  ;;  %v6136_v42 = vld [vmem:[%s6278_s24 + $0x70] sm:$0xff] }
 0x51d   : > { %v4933_v4 = vsel %vm4905_vm0, %v6136_v42, 0.0 }
 0x51e   : > { %v4928_v60 = vadd.f32 %v4927_v22, %v4926_v51  ;;  %v5003_v37 = vadd.f32 %v5002_v55, %v5001_v26  ;;  %v4931_v51 = vsel %vm4905_vm0, %v6134_v57, 0.0  ;;  %v6135_v26 = vld [vmem:[%s6278_s24 + $0x180] sm:$0xff] }
 0x51f   : > { %v5006_v22 = vsel %vm4905_vm0, %v6135_v26, 0.0 }
 0x520   : > { %v4930_v16 = vadd.f32 %v4929_v32, %v4928_v60  ;;  %v5005_v45 = vadd.f32 %v5004_v28, %v5003_v37 }
 0x522   : > { %v4932_v55 = vadd.f32 %v4931_v51, %v4930_v16  ;;  %v5007_v2 = vadd.f32 %v5006_v22, %v5005_v45  ;;  %v6138_v16 = vld [vmem:[%s6278_s24 + $0x78] sm:$0xff]  ;;  %v6139_v51 = vld [vmem:[%s6278_s24 + $0x190] sm:$0xff] }
 0x523   : > { %v4935_v45 = vsel %vm4905_vm0, %v6138_v16, 0.0  ;;  %v5010_v22 = vsel %vm4905_vm0, %v6139_v51, 0.0  ;;  %v6143_v16 = vld [vmem:[%s6278_s24 + $0x1a0] sm:$0xff] }
 0x524   : > { %v4934_v57 = vadd.f32 %v4933_v4, %v4932_v55  ;;  %v5014_v51 = vsel %vm4905_vm0, %v6143_v16, 0.0 }
 0x526   : > { %v4936_v42 = vadd.f32 %v4935_v45, %v4934_v57  ;;  %v6144_v45 = vld [vmem:[%s6278_s24 + $0x90] sm:$0xff] }
 0x531   : > { %v7784_v36 = vpop.f32.mrb[176].mxu0 }
 0x532   : > { %8739 = vst [vmem:[#allocation19_spill] sm:$0xff] %v7784_v36  ;;  %v3574_v9 = vpop.f32.mrb[177].mxu0  ;;  %v6152_v36 = vld [vmem:[%s6278_s24 + $0xb0] sm:$0xff] }
 0x533   : > { %v7786_v15 = vpop.f32.mrb[178].mxu0  ;;  %v6137_v9 = vld [vmem:[%s6278_s24 + $0x188] sm:$0xff] }
 0x534   : > { %8740 = vst [vmem:[#allocation20_spill] sm:$0xff] %v7786_v15  ;;  %v3577_v18 = vpop.f32.mrb[179].mxu0  ;;  %v5008_v60 = vsel %vm4905_vm0, %v6137_v9, 0.0  ;;  %v6140_v15 = vld [vmem:[%s6278_s24 + $0x80] sm:$0xff] }
 0x535   : > { %v5009_v18 = vadd.f32 %v5008_v60, %v5007_v2  ;;  %v6142_v60 = vld [vmem:[%s6278_s24 + $0x88] sm:$0xff] }
 0x537   : > { %v5011_v9 = vadd.f32 %v5010_v22, %v5009_v18  ;;  %v6145_v22 = vld [vmem:[%s6278_s24 + $0x1a8] sm:$0xff] }
 0x539   : > { %v7796_v37 = vpop.f32.mrb[180].mxu0 }
 0x53a   : > { %8741 = vst [vmem:[#allocation21_spill] sm:$0xff] %v7796_v37  ;;  %v3582_v32 = vpop.f32.mrb[181].mxu0  ;;  %v6141_v37 = vld [vmem:[%s6278_s24 + $0x198] sm:$0xff] }
 0x53b   : > { %v7798_v28 = vpop.f32.mrb[182].mxu0  ;;  %v4937_v32 = vsel %vm4905_vm0, %v6140_v15, 0.0  ;;  %v5012_v55 = vsel %vm4905_vm0, %v6141_v37, 0.0  ;;  %v4941_v15 = vsel %vm4905_vm0, %v6144_v45, 0.0 }
 0x53c   : > { %8742 = vst [vmem:[#allocation22_spill] sm:$0xff] %v7798_v28  ;;  %v3585_v26 = vpop.f32.mrb[183].mxu0  ;;  %v4938_v2 = vadd.f32 %v4937_v32, %v4936_v42  ;;  %v5013_v4 = vadd.f32 %v5012_v55, %v5011_v9  ;;  %v5016_v28 = vsel %vm4905_vm0, %v6145_v22, 0.0  ;;  %v6146_v9 = vld [vmem:[%s6278_s24 + $0x98] sm:$0xff]  ;;  %v6147_v55 = vld [vmem:[%s6278_s24 + $0x1b0] sm:$0xff] }
 0x53d   : > { %v4939_v26 = vsel %vm4905_vm0, %v6142_v60, 0.0  ;;  %v4943_v32 = vsel %vm4905_vm0, %v6146_v9, 0.0  ;;  %v5018_v60 = vsel %vm4905_vm0, %v6147_v55, 0.0  ;;  %v6150_v9 = vld [vmem:[%s6278_s24 + $0xa8] sm:$0xff] }
 0x53e   : > { %v4940_v57 = vadd.f32 %v4939_v26, %v4938_v2  ;;  %v5015_v18 = vadd.f32 %v5014_v51, %v5013_v4  ;;  %v6148_v26 = vld [vmem:[%s6278_s24 + $0xa0] sm:$0xff]  ;;  %v6149_v51 = vld [vmem:[%s6278_s24 + $0x1b8] sm:$0xff] }
 0x53f   : > { %v4945_v4 = vsel %vm4905_vm0, %v6148_v26, 0.0  ;;  %v5020_v45 = vsel %vm4905_vm0, %v6149_v51, 0.0  ;;  %v4949_v51 = vsel %vm4905_vm0, %v6152_v36, 0.0 }
 0x540   : > { %v4942_v37 = vadd.f32 %v4941_v15, %v4940_v57  ;;  %v5017_v42 = vadd.f32 %v5016_v28, %v5015_v18 }
 0x542   : > { %v4944_v16 = vadd.f32 %v4943_v32, %v4942_v37  ;;  %v5019_v2 = vadd.f32 %v5018_v60, %v5017_v42  ;;  %v4947_v37 = vsel %vm4905_vm0, %v6150_v9, 0.0  ;;  %v6151_v42 = vld [vmem:[%s6278_s24 + $0x1c0] sm:$0xff] }
 0x543   : > { %v5022_v32 = vsel %vm4905_vm0, %v6151_v42, 0.0  ;;  %v6154_v42 = vld [vmem:[%s6278_s24 + $0xb8] sm:$0xff] }
 0x544   : > { %v4946_v18 = vadd.f32 %v4945_v4, %v4944_v16  ;;  %v5021_v15 = vadd.f32 %v5020_v45, %v5019_v2 }
 0x546   : > { %v4948_v60 = vadd.f32 %v4947_v37, %v4946_v18  ;;  %v5023_v26 = vadd.f32 %v5022_v32, %v5021_v15  ;;  %v4951_v18 = vsel %vm4905_vm0, %v6154_v42, 0.0  ;;  %v6155_v15 = vld [vmem:[%s6278_s24 + $0x1d0] sm:$0xff] }
 0x547   : > { %v5026_v37 = vsel %vm4905_vm0, %v6155_v15, 0.0 }
 0x548   : > { %v4950_v45 = vadd.f32 %v4949_v51, %v4948_v60  ;;  %v6157_v60 = vld [vmem:[%s6278_s24 + $0x1d8] sm:$0xff] }
 0x54a   : > { %v4952_v32 = vadd.f32 %v4951_v18, %v4950_v45 }
 0x552   : > { %v7824_v57 = vpop.f32.mrb[184].mxu0 }
 0x553   : > { %8743 = vst [vmem:[#allocation23_spill] sm:$0xff] %v7824_v57  ;;  %v3590_v28 = vpop.f32.mrb[185].mxu0  ;;  %v6163_v57 = vld [vmem:[%s6278_s24 + $0x1f0] sm:$0xff] }
 0x554   : > { %v7826_v22 = vpop.f32.mrb[186].mxu0  ;;  %v6153_v28 = vld [vmem:[%s6278_s24 + $0x1c8] sm:$0xff] }
 0x555   : > { %8744 = vst [vmem:[#allocation24_spill] sm:$0xff] %v7826_v22  ;;  %v3593_v55 = vpop.f32.mrb[187].mxu0  ;;  %v5024_v16 = vsel %vm4905_vm0, %v6153_v28, 0.0  ;;  %v6156_v28 = vld [vmem:[%s6278_s24 + $0xc0] sm:$0xff] }
 0x556   : > { %v5025_v9 = vadd.f32 %v5024_v16, %v5023_v26  ;;  %v5028_v26 = vsel %vm4905_vm0, %v6157_v60, 0.0 }
 0x558   : > { %v5027_v55 = vadd.f32 %v5026_v37, %v5025_v9  ;;  %v6160_v9 = vld [vmem:[%s6278_s24 + $0xd0] sm:$0xff]  ;;  %v6161_v37 = vld [vmem:[%s6278_s24 + $0x1e8] sm:$0xff] }
 0x559   : > { %v4957_v18 = vsel %vm4905_vm0, %v6160_v9, 0.0 }
 0x55a   : > { %v7836_v2 = vpop.f32.mrb[188].mxu0  ;;  %v5029_v16 = vadd.f32 %v5028_v26, %v5027_v55  ;;  %v6162_v26 = vld [vmem:[%s6278_s24 + $0xd8] sm:$0xff] }
 0x55b   : > { %8745 = vst [vmem:[#allocation25_spill] sm:$0xff] %v7836_v2  ;;  %v3598_v4 = vpop.f32.mrb[189].mxu0  ;;  %v6159_v2 = vld [vmem:[%s6278_s24 + $0x1e0] sm:$0xff] }
 0x55c   : > { %v7838_v22 = vpop.f32.mrb[190].mxu0  ;;  %v4953_v4 = vsel %vm4905_vm0, %v6156_v28, 0.0  ;;  %v5030_v15 = vsel %vm4905_vm0, %v6159_v2, 0.0  ;;  %v5032_v28 = vsel %vm4905_vm0, %v6161_v37, 0.0  ;;  %v5034_v2 = vsel %vm4905_vm0, %v6163_v57, 0.0 }
 0x55d   : > { %8746 = vst [vmem:[#allocation26_spill] sm:$0xff] %v7838_v22  ;;  %v3601_v36 = vpop.f32.mrb[191].mxu0  ;;  %v4954_v51 = vadd.f32 %v4953_v4, %v4952_v32  ;;  %v6158_v22 = vld [vmem:[%s6278_s24 + $0xc8] sm:$0xff]  ;;  %v5031_v45 = vadd.f32 %v5030_v15, %v5029_v16  ;;  %v6180_v32 = vmov 1966171168   ;;  %v6164_v15 = vld [vmem:[%s6278_s24 + $0xe0] sm:$0xff] }
 0x55e   : > { %v4955_v42 = vsel %vm4905_vm0, %v6158_v22, 0.0  ;;  %v3788_v4 = vunpack.c.l.s4 %v6180_v32  ;;  %v4959_v22 = vsel %vm4905_vm0, %v6162_v26, 0.0  ;;  %v4961_v9 = vsel %vm4905_vm0, %v6164_v15, 0.0  ;;  %v6166_v26 = vld [vmem:[%s6278_s24 + $0xe8] sm:$0xff] }
 0x55f   : > { %v4956_v36 = vadd.f32 %v4955_v42, %v4954_v51  ;;  %v5033_v60 = vadd.f32 %v5032_v28, %v5031_v45  ;;  %v5036_v37 = vsel %vm4905_vm0, %v6165_v46, 0.0  ;;  %v4963_v57 = vsel %vm4905_vm0, %v6166_v26, 0.0 }
 0x560   : > { %v3789_v51 = vunpack.c.0.s8 %v3788_v4  ;;  %v4965_v46 = vsel %vm4905_vm0, %v6167_v1, 0.0 }
 0x561   : > { %v4958_v55 = vadd.f32 %v4957_v18, %v4956_v36  ;;  %v5035_v42 = vadd.f32 %v5034_v2, %v5033_v60 }
 0x562   : > { %v7865_v36 = vsub.s32 %v3789_v51, %v6404_v56 }
 0x563   : > { %v4960_v16 = vadd.f32 %v4959_v22, %v4958_v55  ;;  %v5037_v18 = vadd.f32 %v5036_v37, %v5035_v42  ;;  %v6168_v42 = vld [vmem:[%s6278_s24 + $0xf8] sm:$0xff] }
 0x564   : > { %8747 = vst [vmem:[#allocation27_spill] sm:$0xff] %v7865_v36 }
 0x565   : > { %v4962_v45 = vadd.f32 %v4961_v9, %v4960_v16  ;;  %v5038_v15 = vrot.slane %v5037_v18, 4  ;;  %v7877_v9 = vsel %vm4905_vm0, %v6168_v42, 0.0  ;;  %v8758_v42 = vld [vmem:[#allocation11_spill] sm:$0xff] }
 0x566   : > { %8748 = vst [vmem:[#allocation28_spill] sm:$0xff] %v7877_v9  ;;  %v8769_v9 = vld [vmem:[#allocation18_spill] sm:$0xff] }
 0x567   : > { %v4964_v2 = vadd.f32 %v4963_v57, %v4962_v45 }
 0x569   : > { %v7879_v37 = vadd.f32 %v4965_v46, %v4964_v2 }
 0x56b   : > { %8749 = vst [vmem:[#allocation29_spill] sm:$0xff] %v7879_v37 }
 0x573   : > { %v5699_v32 = vpop.f32.mrb[192].mxu0 }
 0x574   : > { %v5700_v28 = vpop.f32.mrb[193].mxu0 }
 0x575   : > { %v5701_v4 = vadd.f32 %v5700_v28, %v5699_v32  ;;  %v5702_v55 = vpop.f32.mrb[194].mxu0  ;;  %v7881_v32 = vadd.f32 %v5038_v15, %v5037_v18 }
 0x576   : > { %v5703_v60 = vpop.f32.mrb[195].mxu0 }
 0x577   : > { %v3793_v22 = vrot.slane %v5701_v4, %v7865_v36  ;;  %8750 = vst [vmem:[#allocation30_spill] sm:$0xff] %v7881_v32  ;;  %v8754_v60 = vld [vmem:[#allocation5_spill] sm:$0xff]  ;;  %v8771_v32 = vld [vmem:[#allocation19_spill] sm:$0xff] }
 0x579   : > { %v3794_v0 = vcombine.high %v3793_v22, %v3793_v22  ;;  %v3801_v56 = vrot.slane %v3793_v22, %v7865_v36 }
 0x57b   : > { %v3808_v51 = vrot.slane %v3794_v0, %v7865_v36  ;;  %v3812_v16 = vrot.slane %v3801_v56, %v6421_v63  ;;  %v8767_v36 = vld [vmem:[#allocation17_spill] sm:$0xff] }
 0x57d   : > { %v7884_v45 = vrot.slane %v3808_v51, %v6421_v63  ;;  %v7887_v1 = vadd.f32 %v3812_v16, %v7509_v14  ;;  %v7890_v28 = vadd.f32 %v3812_v16, %v7517_v54  ;;  %v7893_v0 = vadd.f32 %v3812_v16, %v7524_v58  ;;  %v8756_v51 = vld [vmem:[#allocation9_spill] sm:$0xff] }
 0x57e   : > { %v7896_v26 = vadd.f32 %v3812_v16, %v7526_v7  ;;  %v7899_v57 = vadd.f32 %v3812_v16, %v7532_v44  ;;  %v7902_v18 = vadd.f32 %v3812_v16, %v7534_v31  ;;  %v7905_v63 = vadd.f32 %v3812_v16, %v7536_v3 }
 0x57f   : > { %v7908_v14 = vadd.f32 %v3812_v16, %v7538_v12  ;;  %v7911_v54 = vadd.f32 %v3812_v16, %v7540_v61  ;;  %v7914_v58 = vadd.f32 %v3812_v16, %v7548_v10  ;;  %v7917_v7 = vadd.f32 %v3812_v16, %v7550_v49 }
 0x580   : > { %v7920_v44 = vadd.f32 %v3812_v16, %v7554_v47  ;;  %v7923_v31 = vadd.f32 %v3812_v16, %v7558_v19  ;;  %v7926_v3 = vadd.f32 %v3812_v16, %v7562_v27  ;;  %v7929_v12 = vadd.f32 %v3812_v16, %v7566_v52 }
 0x581   : > { %v7932_v61 = vadd.f32 %v3812_v16, %v7568_v43  ;;  %v7935_v10 = vadd.f32 %v3812_v16, %v7570_v33  ;;  %v7938_v49 = vadd.f32 %v3812_v16, %v7572_v17  ;;  %v7941_v47 = vadd.f32 %v3812_v16, %v7580_v23 }
 0x582   : > { %v7944_v19 = vadd.f32 %v3812_v16, %v7583_v20  ;;  %v7947_v27 = vadd.f32 %v3812_v16, %v7592_v38  ;;  %v7950_v52 = vadd.f32 %v3812_v16, %v7594_v24  ;;  %v7953_v43 = vadd.f32 %v3812_v16, %v7596_v21 }
 0x583   : > { %v7956_v33 = vadd.f32 %v3812_v16, %v7598_v6  ;;  %v7959_v17 = vadd.f32 %v3812_v16, %v7608_v11  ;;  %v7962_v23 = vadd.f32 %v3812_v16, %v7619_v39  ;;  %v7965_v20 = vadd.f32 %v3812_v16, %v7621_v40  ;;  %v8751_v11 = vld [vmem:[#allocation2_spill] sm:$0xff]  ;;  %v8752_v39 = vld [vmem:[#allocation3_spill] sm:$0xff]  ;;  %v8753_v40 = vld [vmem:[#allocation4_spill] sm:$0xff] }
 0x584   : > { %v7968_v38 = vadd.f32 %v3812_v16, %v7623_v35  ;;  %v7971_v24 = vadd.f32 %v3812_v16, %v7639_v8  ;;  %v7974_v21 = vadd.f32 %v3812_v16, %v7641_v29  ;;  %v7977_v6 = vadd.f32 %v3812_v16, %v7643_v25  ;;  %v8755_v29 = vld [vmem:[#allocation6_spill] sm:$0xff] }
 0x585   : > { %v7980_v4 = vadd.f32 %v3812_v16, %v8751_v11  ;;  %v7984_v55 = vadd.f32 %v7884_v45, %v8752_v39  ;;  %v7988_v35 = vadd.f32 %v7884_v45, %v8753_v40  ;;  %v7992_v8 = vadd.f32 %v7884_v45, %v8754_v60  ;;  %v8757_v16 = vld [vmem:[#allocation10_spill] sm:$0xff]  ;;  %v8759_v11 = vld [vmem:[#allocation12_spill] sm:$0xff]  ;;  %v8760_v39 = vld [vmem:[#allocation13_spill] sm:$0xff] }
 0x586   : > { %v7996_v22 = vadd.f32 %v7884_v45, %v8755_v29  ;;  %v8000_v25 = vadd.f32 %v7884_v45, %v7681_v5  ;;  %v8004_v2 = vadd.f32 %v7884_v45, %v7683_v34  ;;  %v8008_v15 = vadd.f32 %v7884_v45, %v7685_v48  ;;  %v8061_v40 = vld [vmem:[%s8703_s9] ss:$0 sm:$0xff] }
 0x587   : > { %v8012_v46 = vadd.f32 %v7884_v45, %v7687_v13  ;;  %v8016_v56 = vadd.f32 %v7884_v45, %v7700_v62  ;;  %v8020_v5 = vadd.f32 %v7884_v45, %v7702_v53  ;;  %v8024_v34 = vadd.f32 %v7884_v45, %v7704_v30  ;;  %v8761_v60 = vld [vmem:[#allocation14_spill] sm:$0xff] }
 0x588   : > { %v8028_v48 = vadd.f32 %v7884_v45, %v7706_v59  ;;  %v8032_v13 = vadd.f32 %v7884_v45, %v7711_v50  ;;  %v8036_v62 = vadd.f32 %v7884_v45, %v7713_v41  ;;  %v8040_v53 = vadd.f32 %v7884_v45, %v8756_v51  ;;  %v8763_v51 = vld [vmem:[#allocation15_spill] sm:$0xff] }
 0x589   : > { %v8044_v30 = vadd.f32 %v7884_v45, %v8757_v16  ;;  %v8048_v59 = vadd.f32 %v7884_v45, %v8758_v42  ;;  %v8052_v50 = vadd.f32 %v7884_v45, %v8759_v11  ;;  %v8056_v41 = vadd.f32 %v7884_v45, %v8760_v39  ;;  %v8765_v42 = vld [vmem:[#allocation16_spill] sm:$0xff] }
 0x58a   : > { %v8065_v29 = vadd.f32 %v7884_v45, %v8761_v60  ;;  %v8069_v16 = vadd.f32 %v7884_v45, %v8763_v51  ;;  %v8073_v11 = vadd.f32 %v7884_v45, %v8765_v42  ;;  %v8077_v39 = vadd.f32 %v7884_v45, %v8767_v36 }
 0x58b   : > { %v8081_v37 = vadd.f32 %v7884_v45, %v8769_v9  ;;  %v8085_v60 = vadd.f32 %v7884_v45, %v8771_v32 }
 0x58c   : > { %8762 = vst [vmem:[#allocation2_spill] sm:$0xff] %v8065_v29  ;;  %8764 = vst [vmem:[#allocation3_spill] sm:$0xff] %v8069_v16  ;;  %v8773_v29 = vld [vmem:[#allocation20_spill] sm:$0xff]  ;;  %v8775_v16 = vld [vmem:[#allocation21_spill] sm:$0xff] }
 0x58d   : > { %8766 = vst [vmem:[#allocation4_spill] sm:$0xff] %v8073_v11  ;;  %8768 = vst [vmem:[#allocation5_spill] sm:$0xff] %v8077_v39  ;;  %v8089_v51 = vadd.f32 %v7884_v45, %v8773_v29  ;;  %v8093_v42 = vadd.f32 %v7884_v45, %v8775_v16  ;;  %v8776_v11 = vld [vmem:[#allocation22_spill] sm:$0xff]  ;;  %v8777_v39 = vld [vmem:[#allocation23_spill] sm:$0xff] }
 0x58e   : > { %8770 = vst [vmem:[#allocation6_spill] sm:$0xff] %v8081_v37  ;;  %8772 = vst [vmem:[#allocation9_spill] sm:$0xff] %v8085_v60  ;;  %v8097_v36 = vadd.f32 %v7884_v45, %v8776_v11  ;;  %v8101_v9 = vadd.f32 %v7884_v45, %v8777_v39  ;;  %v8778_v37 = vld [vmem:[#allocation24_spill] sm:$0xff]  ;;  %v8779_v60 = vld [vmem:[#allocation25_spill] sm:$0xff]  ;;  %v8117_v11 = vadd.f32 %v8061_v40, %v7887_v1 }
 0x58f   : > { %8774 = vst [vmem:[#allocation10_spill] sm:$0xff] %v8089_v51  ;;  %v8105_v32 = vadd.f32 %v7884_v45, %v8778_v37  ;;  %v8109_v29 = vadd.f32 %v7884_v45, %v8779_v60  ;;  %v8780_v51 = vld [vmem:[#allocation26_spill] sm:$0xff]  ;;  %v8121_v39 = vadd.f32 %v8061_v40, %v7890_v28  ;;  %v8125_v37 = vadd.f32 %v8061_v40, %v7893_v0 }
 0x590   : > { %v8113_v16 = vadd.f32 %v7884_v45, %v8780_v51  ;;  %8781 = vst [vmem:[#allocation11_spill] sm:$0xff] %v8117_v11  ;;  %v8129_v60 = vadd.f32 %v8061_v40, %v7896_v26  ;;  %v8133_v45 = vadd.f32 %v8061_v40, %v7899_v57  ;;  %v8137_v1 = vadd.f32 %v8061_v40, %v7902_v18 }
 0x591   : > { %8782 = vst [vmem:[#allocation12_spill] sm:$0xff] %v8121_v39  ;;  %8783 = vst [vmem:[#allocation13_spill] sm:$0xff] %v8125_v37  ;;  %v8141_v28 = vadd.f32 %v8061_v40, %v7905_v63  ;;  %v8145_v0 = vadd.f32 %v8061_v40, %v7908_v14  ;;  %v8149_v26 = vadd.f32 %v8061_v40, %v7911_v54 }
 0x592   : > { %8784 = vst [vmem:[#allocation14_spill] sm:$0xff] %v8133_v45  ;;  %v8153_v57 = vadd.f32 %v8061_v40, %v7914_v58  ;;  %v8157_v18 = vadd.f32 %v8061_v40, %v7917_v7  ;;  %v8161_v63 = vadd.f32 %v8061_v40, %v7920_v44  ;;  %v8165_v14 = vadd.f32 %v8061_v40, %v7923_v31 }
 0x593   : > { %v8169_v54 = vadd.f32 %v8061_v40, %v7926_v3  ;;  %v8173_v58 = vadd.f32 %v8061_v40, %v7929_v12  ;;  %v8177_v7 = vadd.f32 %v8061_v40, %v7932_v61  ;;  %v8181_v44 = vadd.f32 %v8061_v40, %v7935_v10  ;;  %v8790_v51 = vld [vmem:[#allocation2_spill] sm:$0xff] }
 0x594   : > { %v8185_v31 = vadd.f32 %v8061_v40, %v7938_v49  ;;  %v8189_v3 = vadd.f32 %v8061_v40, %v7941_v47  ;;  %v8193_v12 = vadd.f32 %v8061_v40, %v7944_v19  ;;  %v8197_v61 = vadd.f32 %v8061_v40, %v7947_v27 }
 0x595   : > { %v8201_v10 = vadd.f32 %v8061_v40, %v7950_v52  ;;  %v8205_v49 = vadd.f32 %v8061_v40, %v7953_v43  ;;  %v8209_v47 = vadd.f32 %v8061_v40, %v7956_v33  ;;  %v8213_v19 = vadd.f32 %v8061_v40, %v7959_v17 }
 0x596   : > { %v8217_v27 = vadd.f32 %v8061_v40, %v7962_v23  ;;  %v8221_v52 = vadd.f32 %v8061_v40, %v7965_v20  ;;  %v8225_v43 = vadd.f32 %v8061_v40, %v7968_v38  ;;  %v8229_v33 = vadd.f32 %v8061_v40, %v7971_v24 }
 0x597   : > { %v8233_v17 = vadd.f32 %v8061_v40, %v7974_v21  ;;  %v8237_v23 = vadd.f32 %v8061_v40, %v7977_v6  ;;  %v8241_v20 = vadd.f32 %v8061_v40, %v7980_v4  ;;  %v8245_v38 = vadd.f32 %v8061_v40, %v7984_v55 }
 0x598   : > { %v8249_v24 = vadd.f32 %v8061_v40, %v7988_v35  ;;  %v8253_v21 = vadd.f32 %v8061_v40, %v7992_v8  ;;  %v8257_v6 = vadd.f32 %v8061_v40, %v7996_v22  ;;  %v8261_v4 = vadd.f32 %v8061_v40, %v8000_v25 }
 0x599   : > { %v8265_v55 = vadd.f32 %v8061_v40, %v8004_v2  ;;  %v8269_v35 = vadd.f32 %v8061_v40, %v8008_v15  ;;  %v8273_v8 = vadd.f32 %v8061_v40, %v8012_v46  ;;  %v8277_v22 = vadd.f32 %v8061_v40, %v8016_v56 }
 0x59a   : > { %v8281_v25 = vadd.f32 %v8061_v40, %v8020_v5  ;;  %v8285_v2 = vadd.f32 %v8061_v40, %v8024_v34  ;;  %v8289_v15 = vadd.f32 %v8061_v40, %v8028_v48  ;;  %v8293_v46 = vadd.f32 %v8061_v40, %v8032_v13 }
 0x59b   : > { %v8297_v56 = vadd.f32 %v8061_v40, %v8036_v62  ;;  %v8301_v5 = vadd.f32 %v8061_v40, %v8040_v53  ;;  %v8305_v34 = vadd.f32 %v8061_v40, %v8044_v30  ;;  %v8309_v48 = vadd.f32 %v8061_v40, %v8048_v59 }
 0x59c   : > { %v8313_v13 = vadd.f32 %v8061_v40, %v8052_v50  ;;  %v8317_v62 = vadd.f32 %v8061_v40, %v8056_v41  ;;  %v8321_v53 = vadd.f32 %v8061_v40, %v8790_v51 }
 0x59d   : > { %8785 = vst [vmem:[#allocation15_spill] sm:$0xff] %v8301_v5  ;;  %8786 = vst [vmem:[#allocation16_spill] sm:$0xff] %v8305_v34  ;;  %v8792_v5 = vld [vmem:[#allocation3_spill] sm:$0xff]  ;;  %v8793_v34 = vld [vmem:[#allocation4_spill] sm:$0xff] }
 0x59e   : > { %8787 = vst [vmem:[#allocation17_spill] sm:$0xff] %v8309_v48  ;;  %8788 = vst [vmem:[#allocation18_spill] sm:$0xff] %v8313_v13  ;;  %v8325_v30 = vadd.f32 %v8061_v40, %v8792_v5  ;;  %v8329_v59 = vadd.f32 %v8061_v40, %v8793_v34  ;;  %v8794_v48 = vld [vmem:[#allocation5_spill] sm:$0xff]  ;;  %v8795_v13 = vld [vmem:[#allocation6_spill] sm:$0xff]  ;;  %v8349_v34 = vadd.f32 %v8061_v40, %v8093_v42 }
 0x59f   : > { %8789 = vst [vmem:[#allocation19_spill] sm:$0xff] %v8317_v62  ;;  %8791 = vst [vmem:[#allocation20_spill] sm:$0xff] %v8321_v53  ;;  %v8333_v50 = vadd.f32 %v8061_v40, %v8794_v48  ;;  %v8337_v41 = vadd.f32 %v8061_v40, %v8795_v13  ;;  %v8796_v62 = vld [vmem:[#allocation9_spill] sm:$0xff]  ;;  %v8797_v53 = vld [vmem:[#allocation10_spill] sm:$0xff]  ;;  %v8353_v48 = vadd.f32 %v8061_v40, %v8097_v36  ;;  %v3965_v36 = vmax.f32 %v8161_v63, 0.0 }
 0x5a0   : > { %v8341_v51 = vadd.f32 %v8061_v40, %v8796_v62  ;;  %v8345_v5 = vadd.f32 %v8061_v40, %v8797_v53  ;;  %8798 = vst [vmem:[#allocation21_spill] sm:$0xff] %v8349_v34  ;;  %v8357_v13 = vadd.f32 %v8061_v40, %v8101_v9  ;;  %v8361_v62 = vadd.f32 %v8061_v40, %v8105_v32 }
 0x5a1   : > { %8799 = vst [vmem:[#allocation22_spill] sm:$0xff] %v8353_v48  ;;  %v8365_v53 = vadd.f32 %v8061_v40, %v8109_v29  ;;  %v8369_v42 = vadd.f32 %v8061_v40, %v8113_v16  ;;  %v3957_v9 = vmax.f32 %v8129_v60, 0.0  ;;  %v3959_v32 = vmax.f32 %v8137_v1, 0.0 }
 0x5a2   : > { %8800 = vst [vmem:[#allocation23_spill] sm:$0xff] %v8357_v13  ;;  %8801 = vst [vmem:[#allocation24_spill] sm:$0xff] %v8361_v62  ;;  %v3960_v62 = vmax.f32 %v8141_v28, 0.0  ;;  %v3961_v29 = vmax.f32 %v8145_v0, 0.0  ;;  %v3963_v40 = vmax.f32 %v8153_v57, 0.0  ;;  %v3964_v16 = vmax.f32 %v8157_v18, 0.0 }
 0x5a3   : > { %8802 = vst [vmem:[#allocation25_spill] sm:$0xff] %v8365_v53  ;;  %8803 = vst [vmem:[#allocation26_spill] sm:$0xff] %v8369_v42  ;;  %v3962_v53 = vmax.f32 %v8149_v26, 0.0  ;;  %v3966_v48 = vmax.f32 %v8165_v14, 0.0  ;;  %v3967_v60 = vmax.f32 %v8169_v54, 0.0  ;;  %v3968_v13 = vmax.f32 %v8173_v58, 0.0 }
 0x5a4   : > { %v3969_v1 = vmax.f32 %v8177_v7, 0.0  ;;  %v3970_v28 = vmax.f32 %v8181_v44, 0.0  ;;  %v3971_v0 = vmax.f32 %v8185_v31, 0.0  ;;  %v3972_v26 = vmax.f32 %v8189_v3, 0.0  ;;  %v8804_v34 = vld [vmem:[#allocation15_spill] sm:$0xff]  ;;  %v8805_v45 = vld [vmem:[#allocation16_spill] sm:$0xff] }
 0x5a5   : > { %v3973_v57 = vmax.f32 %v8193_v12, 0.0  ;;  %v3974_v18 = vmax.f32 %v8197_v61, 0.0  ;;  %v3975_v63 = vmax.f32 %v8201_v10, 0.0  ;;  %v3976_v14 = vmax.f32 %v8205_v49, 0.0  ;;  %v8806_v37 = vld [vmem:[#allocation17_spill] sm:$0xff]  ;;  %v8807_v39 = vld [vmem:[#allocation18_spill] sm:$0xff] }
 0x5a6   : > { %v3977_v54 = vmax.f32 %v8209_v47, 0.0  ;;  %v3978_v58 = vmax.f32 %v8213_v19, 0.0  ;;  %v3979_v7 = vmax.f32 %v8217_v27, 0.0  ;;  %v3980_v44 = vmax.f32 %v8221_v52, 0.0  ;;  %v8808_v11 = vld [vmem:[#allocation19_spill] sm:$0xff]  ;;  %v8809_v42 = vld [vmem:[#allocation20_spill] sm:$0xff] }
 0x5a7   : > { %v3981_v31 = vmax.f32 %v8225_v43, 0.0  ;;  %v3982_v3 = vmax.f32 %v8229_v33, 0.0  ;;  %v3983_v12 = vmax.f32 %v8233_v17, 0.0  ;;  %v3984_v61 = vmax.f32 %v8237_v23, 0.0 }
 0x5a8   : > { %v3985_v10 = vmax.f32 %v8241_v20, 0.0  ;;  %v3986_v49 = vmax.f32 %v8245_v38, 0.0  ;;  %v3987_v47 = vmax.f32 %v8249_v24, 0.0  ;;  %v3988_v19 = vmax.f32 %v8253_v21, 0.0 }
 0x5a9   : > { %v3989_v27 = vmax.f32 %v8257_v6, 0.0  ;;  %v3990_v52 = vmax.f32 %v8261_v4, 0.0  ;;  %v3991_v43 = vmax.f32 %v8265_v55, 0.0  ;;  %v3992_v33 = vmax.f32 %v8269_v35, 0.0 }
 0x5aa   : > { %v3993_v17 = vmax.f32 %v8273_v8, 0.0  ;;  %v3994_v23 = vmax.f32 %v8277_v22, 0.0  ;;  %v3995_v20 = vmax.f32 %v8281_v25, 0.0  ;;  %v3996_v38 = vmax.f32 %v8285_v2, 0.0 }
 0x5ab   : > { %v3997_v24 = vmax.f32 %v8289_v15, 0.0  ;;  %v3998_v21 = vmax.f32 %v8293_v46, 0.0  ;;  %v3999_v6 = vmax.f32 %v8297_v56, 0.0  ;;  %v4000_v4 = vmax.f32 %v8804_v34, 0.0 }
 0x5ac   : > { %v4001_v55 = vmax.f32 %v8805_v45, 0.0  ;;  %v4002_v35 = vmax.f32 %v8806_v37, 0.0  ;;  %v4003_v8 = vmax.f32 %v8807_v39, 0.0  ;;  %v4004_v22 = vmax.f32 %v8808_v11, 0.0  ;;  %v8810_v37 = vld [vmem:[#allocation21_spill] sm:$0xff]  ;;  %v8811_v11 = vld [vmem:[#allocation22_spill] sm:$0xff] }
 0x5ad   : > { %v4005_v25 = vmax.f32 %v8809_v42, 0.0  ;;  %v4006_v2 = vmax.f32 %v8325_v30, 0.0  ;;  %v4007_v15 = vmax.f32 %v8329_v59, 0.0  ;;  %v4008_v46 = vmax.f32 %v8333_v50, 0.0  ;;  %v8812_v30 = vld [vmem:[#allocation23_spill] sm:$0xff]  ;;  %v8813_v50 = vld [vmem:[#allocation24_spill] sm:$0xff] }
 0x5ae   : > { %v4009_v56 = vmax.f32 %v8337_v41, 0.0  ;;  %v4010_v34 = vmax.f32 %v8341_v51, 0.0  ;;  %v4011_v45 = vmax.f32 %v8345_v5, 0.0  ;;  %v4012_v39 = vmax.f32 %v8810_v37, 0.0  ;;  %v8814_v51 = vld [vmem:[#allocation25_spill] sm:$0xff]  ;;  %v8815_v37 = vld [vmem:[#allocation26_spill] sm:$0xff] }
 0x5af   : > { %v4013_v42 = vmax.f32 %v8811_v11, 0.0  ;;  %v4014_v59 = vmax.f32 %v8812_v30, 0.0  ;;  %v4015_v41 = vmax.f32 %v8813_v50, 0.0  ;;  %v4016_v5 = vmax.f32 %v8814_v51, 0.0  ;;  %v8816_v30 = vld [vmem:[#allocation11_spill] sm:$0xff]  ;;  %v8818_v51 = vld [vmem:[#allocation12_spill] sm:$0xff] }
 0x5b0   : > { %v4017_v11 = vmax.f32 %v8815_v37, 0.0  ;;  %v8817_v50 = vmax.f32 %v8816_v30, 0.0  ;;  %v8819_v37 = vmax.f32 %v8818_v51, 0.0  ;;  %v8820_v51 = vld [vmem:[#allocation13_spill] sm:$0xff] }
 0x5b2   : > { %v4018_v30 = vpack.c.bf16 %v8819_v37, %v8817_v50  ;;  %v8821_v37 = vmax.f32 %v8820_v51, 0.0  ;;  %v6094_v51 = vld [vmem:[%s8706_s12] sm:$0xff]  }
 0x5b4   : > { %v4019_v50 = vpack.c.bf16 %v3957_v9, %v8821_v37  ;;  %v8822_v9 = vld [vmem:[#allocation14_spill] sm:$0xff]  ;;  %5855 = vmatprep.mubr.bf16.mxu1 %v4018_v30  ;;  %v8459_v30 = vpack.c.bf16 %v3979_v7, %v3978_v58  ;;  %v8480_v58 = vpack.c.bf16 %v3993_v17, %v3992_v33  ;;  %v8482_v7 = vpack.c.bf16 %v3995_v20, %v3994_v23  ;;  %v8825_v33 = vld [vmem:[#allocation29_spill] sm:$0xff]  ;;  %v8826_v17 = vld [vmem:[#allocation28_spill] sm:$0xff] }
 0x5b5   : > { %v8823_v37 = vmax.f32 %v8822_v9, 0.0  ;;  %v4968_v23 = vadd.f32 %v8826_v17, %v8825_v33 }
 0x5b6   : > { %5856 = vmatmul.mubr.bf16.vlgmr.msra.gmra.mrb[128].mxu1 %v4019_v50  ;;  %v8829_v50 = vld [vmem:[#allocation7_spill] sm:$0xff] }
 0x5b7   : > { %v4020_v9 = vpack.c.bf16 %v3959_v32, %v8823_v37  ;;  %v4021_v32 = vpack.c.bf16 %v3961_v29, %v3960_v62  ;;  %v4022_v37 = vpack.c.bf16 %v3963_v40, %v3962_v53  ;;  %v6095_v29 = vld [vmem:[%s8706_s12 + $0x48] sm:$0xff]   ;;  %v4023_v62 = vpack.c.bf16 %v3965_v36, %v3964_v16  ;;  %5746 = vmatpush3.bf16.msra.mxu1 %v6094_v51  ;;  %v8830_v51 = vld [vmem:[#allocation8_spill] sm:$0xff] }
 0x5b8   : > { %v4024_v40 = vpack.c.bf16 %v3967_v60, %v3966_v48  ;;  %v8449_v53 = vpack.c.bf16 %v3969_v1, %v3968_v13  ;;  %v8451_v16 = vpack.c.bf16 %v3971_v0, %v3970_v28  ;;  %v8453_v36 = vpack.c.bf16 %v3973_v57, %v3972_v26  ;;  %v6096_v28 = vld [vmem:[%s8706_s12 + $0x8] sm:$0xff]   ;;  %5747 = vmatprep.subr.bf16.mxu1 %v6095_v29 }
 0x5b9   : > { %v8455_v48 = vpack.c.bf16 %v3975_v63, %v3974_v18  ;;  %v8457_v60 = vpack.c.bf16 %v3977_v54, %v3976_v14  ;;  %v8461_v1 = vpack.c.bf16 %v3981_v31, %v3980_v44  ;;  %v8463_v13 = vpack.c.bf16 %v3983_v12, %v3982_v3  ;;  %5859 = vmatprep.mubr.bf16.mxu1 %v4020_v9  ;;  %v8824_v18 = vld [vmem:[#allocation30_spill] sm:$0xff]  ;;  %v6097_v14 = vld [vmem:[%s8706_s12 + $0x50] sm:$0xff]  }
 0x5ba   : > { %v8468_v0 = vpack.c.bf16 %v3985_v10, %v3984_v61  ;;  %v8470_v26 = vpack.c.bf16 %v3987_v47, %v3986_v49  ;;  %v8472_v57 = vpack.c.bf16 %v3989_v27, %v3988_v19  ;;  %v5040_v63 = vrot.slane %v8824_v18, 2  ;;  %v6098_v27 = vld [vmem:[%s8706_s12 + $0x10] sm:$0xff]  }
 0x5bb   : > { %v8478_v54 = vpack.c.bf16 %v3991_v43, %v3990_v52  ;;  %v8484_v44 = vpack.c.bf16 %v3997_v24, %v3996_v38  ;;  %v8486_v31 = vpack.c.bf16 %v3999_v6, %v3998_v21  ;;  %v8488_v3 = vpack.c.bf16 %v4001_v55, %v4000_v4  ;;  %5748 = vmatpush3.bf16.msra.mxu1 %v6096_v28  ;;  %v6099_v38 = vld [vmem:[%s8706_s12 + $0x58] sm:$0xff]  }
 0x5bc   : > { %v8490_v12 = vpack.c.bf16 %v4003_v8, %v4002_v35  ;;  %v8492_v61 = vpack.c.bf16 %v4005_v25, %v4004_v22  ;;  %v8494_v10 = vpack.c.bf16 %v4007_v15, %v4006_v2  ;;  %v8496_v49 = vpack.c.bf16 %v4009_v56, %v4008_v46  ;;  %5749 = vmatprep.subr.bf16.mxu1 %v6097_v14  ;;  %v6100_v6 = vld [vmem:[%s8706_s12 + $0x18] sm:$0xff]   ;;  %v6101_v35 = vld [vmem:[%s8706_s12 + $0x60] sm:$0xff]   ;;  %v6103_v15 = vld [vmem:[%s8706_s12 + $0x68] sm:$0xff]  }
 0x5bd   : > { %v8498_v47 = vpack.c.bf16 %v4011_v45, %v4010_v34  ;;  %v8500_v19 = vpack.c.bf16 %v4013_v42, %v4012_v39  ;;  %v8505_v52 = vpack.c.bf16 %v4015_v41, %v4014_v59  ;;  %v8507_v43 = vpack.c.bf16 %v4017_v11, %v4016_v5  ;;  %v6102_v25 = vld [vmem:[%s8706_s12 + $0x20] sm:$0xff]   ;;  %v6104_v56 = vld [vmem:[%s8706_s12 + $0x28] sm:$0xff]   ;;  %v6105_v45 = vld [vmem:[%s8706_s12 + $0x70] sm:$0xff]  }
 0x5be   : > { %v5041_v20 = vadd.f32 %v5040_v63, %v8824_v18  ;;  %v4969_v24 = vrot.slane %v4968_v23, 4  ;;  %5860 = vmatmul.mubr.bf16.gmra.mrb[132].mxu1 %v4021_v32  ;;  %v8827_v39 = vmov 2   ;;  %v6106_v59 = vld [vmem:[%s8706_s12 + $0x30] sm:$0xff]   ;;  %v6107_v41 = vld [vmem:[%s8706_s12 + $0x78] sm:$0xff]   ;;  %v8828_v11 = vmov 1  }
 0x5bf   : > { %5863 = vmatprep.mubr.bf16.mxu1 %v4022_v37  ;;  %5750 = vmatpush3.bf16.msra.mxu1 %v6098_v27  ;;  %v6108_v5 = vld [vmem:[%s8706_s12 + $0x38] sm:$0xff]   ;;  %v8575_v32 = vld [vmem:[%s8705_s11] ss:$0 sm:$0xff] }
 0x5c0   : > { %v5042_v21 = vrot.slane %v5041_v20, 1  ;;  %v4970_v4 = vadd.f32 %v4969_v24, %v4968_v23  ;;  %5751 = vmatprep.subr.bf16.mxu1 %v6099_v38 }
 0x5c2   : > { %v5043_v55 = vadd.f32 %v5042_v21, %v5041_v20  ;;  %v4971_v8 = vrot.slane %v4970_v4, 2 }
 0x5c3   : > { %5752 = vmatpush3.bf16.msra.mxu1 %v6100_v6 }
 0x5c4   : > { %v5046_v22 = vmul.f32 0.00390625, %v5043_v55  ;;  %v4972_v2 = vadd.f32 %v4971_v8, %v4970_v4  ;;  %5753 = vmatprep.subr.bf16.mxu1 %v6101_v35 }
 0x5c6   : > { %5056 = vperm.xlu0 %6021, %v5046_v22   ;;  %v4973_v46 = vrot.slane %v4972_v2, 1  ;;  %5864 = vmatmul.mubr.bf16.gmra.mrb[136].mxu1 %v4023_v62 }
 0x5c7   : > { %5867 = vmatprep.mubr.bf16.mxu1 %v4024_v40  ;;  %5754 = vmatpush3.bf16.msra.mxu1 %v6102_v25 }
 0x5c8   : > { %v4974_v34 = vadd.f32 %v4973_v46, %v4972_v2  ;;  %5755 = vmatprep.subr.bf16.mxu1 %v6103_v15 }
 0x5ca   : > { %6023 = vset.pattern.permute.xlu0 %v8827_v39  ;;  %v5045_v42 = vmul.f32 0.00390625, %v4974_v34 }
 0x5cb   : > { %5756 = vmatpush3.bf16.msra.mxu1 %v6104_v56 }
 0x5cc   : > { %5052 = vperm.xlu1 %6020, %v5045_v42   ;;  %5757 = vmatprep.subr.bf16.mxu1 %v6105_v45 }
 0x5cd   : > { %5074 = vperm.xlu0 %6023, %v5045_v42  }
 0x5ce   : > { %5868 = vmatmul.mubr.bf16.gmra.mrb[140].mxu1 %v8449_v53 }
 0x5cf   : > { %5871 = vmatprep.mubr.bf16.mxu1 %v8451_v16  ;;  %5758 = vmatpush3.bf16.msra.mxu1 %v6106_v59 }
 0x5d0   : > { %5759 = vmatprep.subr.bf16.mxu1 %v6107_v41  ;;  %6022 = vset.pattern.permute.xlu1 %v8828_v11 }
 0x5d1   : > { %5063 = vperm.xlu1 %6022, %v5045_v42  }
 0x5d3   : > { %5760 = vmatpush3.bf16.msra.mxu1 %v6108_v5 }
 0x5d5   : > { %5066 = vperm.xlu1 %6022, %v5046_v22  }
 0x5d6   : > { %5872 = vmatmul.mubr.bf16.gmra.mrb[144].mxu1 %v8453_v36 }
 0x5d7   : > { %5875 = vmatprep.mubr.bf16.mxu1 %v8455_v48 }
 0x5d9   : > { %6024 = vset.pattern.permute.xlu1 %v8827_v39 }
 0x5da   : > { %5077 = vperm.xlu1 %6024, %v5046_v22  }
 0x5de   : > { %5876 = vmatmul.mubr.bf16.gmra.mrb[148].mxu1 %v8457_v60 }
 0x5df   : > { %5879 = vmatprep.mubr.bf16.mxu1 %v8459_v30 }
 0x5e6   : > { %5880 = vmatmul.mubr.bf16.gmra.mrb[152].mxu1 %v8461_v1 }
 0x5e7   : > { %5883 = vmatprep.mubr.bf16.mxu1 %v8463_v13 }
 0x5ee   : > { %5884 = vmatmul.mubr.bf16.gmra.mrb[156].mxu1 %v8468_v0 }
 0x5ef   : > { %5887 = vmatprep.mubr.bf16.mxu1 %v8470_v26 }
 0x5f6   : > { %5888 = vmatmul.mubr.bf16.gmra.mrb[160].mxu1 %v8472_v57 }
 0x5f7   : > { %5891 = vmatprep.mubr.bf16.mxu1 %v8478_v54 }
 0x5fe   : > { %5892 = vmatmul.mubr.bf16.gmra.mrb[164].mxu1 %v8480_v58 }
 0x5ff   : > { %5895 = vmatprep.mubr.bf16.mxu1 %v8482_v7 }
 0x606   : > { %5896 = vmatmul.mubr.bf16.gmra.mrb[168].mxu1 %v8484_v44 }
 0x607   : > { %5899 = vmatprep.mubr.bf16.mxu1 %v8486_v31 }
 0x60e   : > { %5900 = vmatmul.mubr.bf16.gmra.mrb[172].mxu1 %v8488_v3 }
 0x60f   : > { %5903 = vmatprep.mubr.bf16.mxu1 %v8490_v12 }
 0x616   : > { %5904 = vmatmul.mubr.bf16.gmra.mrb[176].mxu1 %v8492_v61 }
 0x617   : > { %5907 = vmatprep.mubr.bf16.mxu1 %v8494_v10 }
 0x61e   : > { %5908 = vmatmul.mubr.bf16.gmra.mrb[180].mxu1 %v8496_v49 }
 0x61f   : > { %5911 = vmatprep.mubr.bf16.mxu1 %v8498_v47 }
 0x626   : > { %5912 = vmatmul.mubr.bf16.gmra.mrb[184].mxu1 %v8500_v19 }
 0x627   : > { %5915 = vmatprep.mubr.bf16.mxu1 %v8505_v52 }
 0x62e   : > { %5916 = vmatmul.mubr.bf16.gmra.mrb[188].mxu1 %v8507_v43 }
 0x62f   : > { %4897 = vmatprep.mubr.bf16.mxu1 %v8829_v50 }
 0x636   : > { %4898 = vmatmul.mubr.bf16.vlgmr.msra.gmra.mrb[192].mxu1 %v8830_v51 }
 0x689   : > { %v5857_v9 = vpop.f32.mrb[128].mxu1 }
 0x68a   : > { %v4155_v37 = vpop.f32.mrb[129].mxu1  ;;  %v4164_v62 = vadd.f32 %v5857_v9, %v8575_v32 }
 0x68b   : > { %v5858_v29 = vpop.f32.mrb[130].mxu1  ;;  %v4156_v16 = vadd.f32 %v8575_v32, %v4155_v37 }
 0x68c   : > { %v4167_v40 = vadd.f32 %v5858_v29, %v8575_v32  ;;  %v4158_v53 = vpop.f32.mrb[131].mxu1 }
 0x68d   : > { %v4159_v36 = vadd.f32 %v8575_v32, %v4158_v53 }
 0x68e   : > { %v5464_v48 = vpack.c.bf16 %v4167_v40, %v4164_v62 }
 0x68f   : > { %v5459_v60 = vpack.c.bf16 %v4159_v36, %v4156_v16 }
 0x690   : > { %5616 = vst [vmem:[%s8584_s27 + $0x8] sm:$0xff] %v5464_v48  }
 0x691   : > { %5460 = vst [vmem:[%s8584_s27] sm:$0xff] %v5459_v60   ;;  %v5861_v30 = vpop.f32.mrb[132].mxu1 }
 0x692   : > { %v4171_v1 = vpop.f32.mrb[133].mxu1  ;;  %v4180_v28 = vadd.f32 %v5861_v30, %v8575_v32 }
 0x693   : > { %v5862_v13 = vpop.f32.mrb[134].mxu1  ;;  %v4172_v57 = vadd.f32 %v8575_v32, %v4171_v1 }
 0x694   : > { %v4183_v0 = vadd.f32 %v5862_v13, %v8575_v32  ;;  %v4174_v26 = vpop.f32.mrb[135].mxu1 }
 0x695   : > { %v4175_v18 = vadd.f32 %v8575_v32, %v4174_v26 }
 0x696   : > { %v5474_v63 = vpack.c.bf16 %v4183_v0, %v4180_v28 }
 0x697   : > { %v5469_v14 = vpack.c.bf16 %v4175_v18, %v4172_v57 }
 0x698   : > { %5618 = vst [vmem:[%s8584_s27 + $0x18] sm:$0xff] %v5474_v63  }
 0x699   : > { %5617 = vst [vmem:[%s8584_s27 + $0x10] sm:$0xff] %v5469_v14   ;;  %v5865_v54 = vpop.f32.mrb[136].mxu1 }
 0x69a   : > { %v4187_v58 = vpop.f32.mrb[137].mxu1  ;;  %v4196_v44 = vadd.f32 %v5865_v54, %v8575_v32 }
 0x69b   : > { %v5866_v7 = vpop.f32.mrb[138].mxu1  ;;  %v4188_v12 = vadd.f32 %v8575_v32, %v4187_v58 }
 0x69c   : > { %v4199_v31 = vadd.f32 %v5866_v7, %v8575_v32  ;;  %v4190_v3 = vpop.f32.mrb[139].mxu1 }
 0x69d   : > { %v4191_v61 = vadd.f32 %v8575_v32, %v4190_v3 }
 0x69e   : > { %v5484_v10 = vpack.c.bf16 %v4199_v31, %v4196_v44 }
 0x69f   : > { %v5479_v49 = vpack.c.bf16 %v4191_v61, %v4188_v12 }
 0x6a0   : > { %5620 = vst [vmem:[%s8584_s27 + $0x28] sm:$0xff] %v5484_v10  }
 0x6a1   : > { %5619 = vst [vmem:[%s8584_s27 + $0x20] sm:$0xff] %v5479_v49   ;;  %v5869_v47 = vpop.f32.mrb[140].mxu1 }
 0x6a2   : > { %v4203_v19 = vpop.f32.mrb[141].mxu1  ;;  %v4212_v52 = vadd.f32 %v5869_v47, %v8575_v32 }
 0x6a3   : > { %v5870_v27 = vpop.f32.mrb[142].mxu1  ;;  %v4204_v17 = vadd.f32 %v8575_v32, %v4203_v19 }
 0x6a4   : > { %v4215_v43 = vadd.f32 %v5870_v27, %v8575_v32  ;;  %v4206_v33 = vpop.f32.mrb[143].mxu1 }
 0x6a5   : > { %v4207_v23 = vadd.f32 %v8575_v32, %v4206_v33 }
 0x6a6   : > { %v5494_v20 = vpack.c.bf16 %v4215_v43, %v4212_v52 }
 0x6a7   : > { %v5489_v38 = vpack.c.bf16 %v4207_v23, %v4204_v17 }
 0x6a8   : > { %5622 = vst [vmem:[%s8584_s27 + $0x38] sm:$0xff] %v5494_v20  }
 0x6a9   : > { %5621 = vst [vmem:[%s8584_s27 + $0x30] sm:$0xff] %v5489_v38   ;;  %v5873_v24 = vpop.f32.mrb[144].mxu1 }
 0x6aa   : > { %v4219_v21 = vpop.f32.mrb[145].mxu1  ;;  %v4228_v4 = vadd.f32 %v5873_v24, %v8575_v32 }
 0x6ab   : > { %v5874_v6 = vpop.f32.mrb[146].mxu1  ;;  %v4220_v8 = vadd.f32 %v8575_v32, %v4219_v21 }
 0x6ac   : > { %v4231_v55 = vadd.f32 %v5874_v6, %v8575_v32  ;;  %v4222_v35 = vpop.f32.mrb[147].mxu1 }
 0x6ad   : > { %v4223_v22 = vadd.f32 %v8575_v32, %v4222_v35 }
 0x6ae   : > { %v5504_v25 = vpack.c.bf16 %v4231_v55, %v4228_v4 }
 0x6af   : > { %v5499_v2 = vpack.c.bf16 %v4223_v22, %v4220_v8 }
 0x6b0   : > { %5624 = vst [vmem:[%s8584_s27 + $0x48] sm:$0xff] %v5504_v25  }
 0x6b1   : > { %5623 = vst [vmem:[%s8584_s27 + $0x40] sm:$0xff] %v5499_v2   ;;  %v5877_v15 = vpop.f32.mrb[148].mxu1 }
 0x6b2   : > { %v4235_v46 = vpop.f32.mrb[149].mxu1  ;;  %v4244_v34 = vadd.f32 %v5877_v15, %v8575_v32 }
 0x6b3   : > { %v5878_v56 = vpop.f32.mrb[150].mxu1  ;;  %v4236_v42 = vadd.f32 %v8575_v32, %v4235_v46 }
 0x6b4   : > { %v4247_v45 = vadd.f32 %v5878_v56, %v8575_v32  ;;  %v4238_v39 = vpop.f32.mrb[151].mxu1 }
 0x6b5   : > { %v4239_v59 = vadd.f32 %v8575_v32, %v4238_v39 }
 0x6b6   : > { %v5514_v41 = vpack.c.bf16 %v4247_v45, %v4244_v34 }
 0x6b7   : > { %v5509_v5 = vpack.c.bf16 %v4239_v59, %v4236_v42 }
 0x6b8   : > { %5626 = vst [vmem:[%s8584_s27 + $0x58] sm:$0xff] %v5514_v41  }
 0x6b9   : > { %5625 = vst [vmem:[%s8584_s27 + $0x50] sm:$0xff] %v5509_v5   ;;  %v5881_v11 = vpop.f32.mrb[152].mxu1 }
 0x6ba   : > { %v4251_v50 = vpop.f32.mrb[153].mxu1  ;;  %v4260_v9 = vadd.f32 %v5881_v11, %v8575_v32 }
 0x6bb   : > { %v5882_v51 = vpop.f32.mrb[154].mxu1  ;;  %v4252_v62 = vadd.f32 %v8575_v32, %v4251_v50 }
 0x6bc   : > { %v4263_v37 = vadd.f32 %v5882_v51, %v8575_v32  ;;  %v4254_v29 = vpop.f32.mrb[155].mxu1 }
 0x6bd   : > { %v4255_v40 = vadd.f32 %v8575_v32, %v4254_v29 }
 0x6be   : > { %v5524_v53 = vpack.c.bf16 %v4263_v37, %v4260_v9 }
 0x6bf   : > { %v5519_v16 = vpack.c.bf16 %v4255_v40, %v4252_v62 }
 0x6c0   : > { %5628 = vst [vmem:[%s8584_s27 + $0x68] sm:$0xff] %v5524_v53  }
 0x6c1   : > { %5627 = vst [vmem:[%s8584_s27 + $0x60] sm:$0xff] %v5519_v16   ;;  %v5885_v36 = vpop.f32.mrb[156].mxu1  ;;  %v5053_v16 = vpop.permute.xlu1 %5052 }
 0x6c2   : > { %v4267_v48 = vpop.f32.mrb[157].mxu1  ;;  %v4276_v30 = vadd.f32 %v5885_v36, %v8575_v32 }
 0x6c3   : > { %v5886_v60 = vpop.f32.mrb[158].mxu1  ;;  %v4268_v28 = vadd.f32 %v8575_v32, %v4267_v48 }
 0x6c4   : > { %v4279_v1 = vadd.f32 %v5886_v60, %v8575_v32  ;;  %v4270_v13 = vpop.f32.mrb[159].mxu1 }
 0x6c5   : > { %v4271_v0 = vadd.f32 %v8575_v32, %v4270_v13 }
 0x6c6   : > { %v5534_v26 = vpack.c.bf16 %v4279_v1, %v4276_v30 }
 0x6c7   : > { %v5529_v57 = vpack.c.bf16 %v4271_v0, %v4268_v28 }
 0x6c8   : > { %5630 = vst [vmem:[%s8584_s27 + $0x78] sm:$0xff] %v5534_v26   ;;  %v5064_v26 = vpop.permute.xlu1 %5063 }
 0x6c9   : > { %5629 = vst [vmem:[%s8584_s27 + $0x70] sm:$0xff] %v5529_v57   ;;  %v5889_v18 = vpop.f32.mrb[160].mxu1 }
 0x6ca   : > { %v4283_v63 = vpop.f32.mrb[161].mxu1  ;;  %v4292_v54 = vadd.f32 %v5889_v18, %v8575_v32 }
 0x6cb   : > { %v5890_v14 = vpop.f32.mrb[162].mxu1  ;;  %v4284_v44 = vadd.f32 %v8575_v32, %v4283_v63 }
 0x6cc   : > { %v4295_v58 = vadd.f32 %v5890_v14, %v8575_v32  ;;  %v4286_v7 = vpop.f32.mrb[163].mxu1 }
 0x6cd   : > { %v4287_v31 = vadd.f32 %v8575_v32, %v4286_v7  ;;  %v5057_v7 = vpop.permute.xlu0 %5056 }
 0x6ce   : > { %v5544_v3 = vpack.c.bf16 %v4295_v58, %v4292_v54 }
 0x6cf   : > { %v5539_v12 = vpack.c.bf16 %v4287_v31, %v4284_v44 }
 0x6d0   : > { %5632 = vst [vmem:[%s8584_s27 + $0x88] sm:$0xff] %v5544_v3   ;;  %v5067_v3 = vpop.permute.xlu1 %5066 }
 0x6d1   : > { %5631 = vst [vmem:[%s8584_s27 + $0x80] sm:$0xff] %v5539_v12   ;;  %v5893_v61 = vpop.f32.mrb[164].mxu1 }
 0x6d2   : > { %v4299_v10 = vpop.f32.mrb[165].mxu1  ;;  %v4308_v47 = vadd.f32 %v5893_v61, %v8575_v32  ;;  %v8831_v61 = vlaneseq }
 0x6d3   : > { %v5894_v49 = vpop.f32.mrb[166].mxu1  ;;  %v4300_v52 = vadd.f32 %v8575_v32, %v4299_v10 }
 0x6d4   : > { %v4311_v19 = vadd.f32 %v5894_v49, %v8575_v32  ;;  %v4302_v27 = vpop.f32.mrb[167].mxu1  ;;  %v5048_v10 = vand.u32 127, %v8831_v61 }
 0x6d5   : > { %v4303_v43 = vadd.f32 %v8575_v32, %v4302_v27  ;;  %v5058_v27 = vsel %vm3643_vm2, %v5057_v7, %v5053_v16 }
 0x6d6   : > { %v5554_v33 = vpack.c.bf16 %v4311_v19, %v4308_v47  ;;  %vm5049_vm3 = vcmp.eq.s32.totalorder %v5048_v10, 6  ;;  %vm5061_vm4 = vcmp.eq.s32.totalorder %v5048_v10, 7  ;;  %vm5072_vm5 = vcmp.eq.s32.totalorder %v5048_v10, 8 }
 0x6d7   : > { %v5549_v17 = vpack.c.bf16 %v4303_v43, %v4300_v52  ;;  %v5068_v52 = vsel %vm3643_vm2, %v5067_v3, %v5064_v26  ;;  %v5075_v43 = vpop.permute.xlu0 %5074 }
 0x6d8   : > { %5634 = vst [vmem:[%s8584_s27 + $0x98] sm:$0xff] %v5554_v33  }
 0x6d9   : > { %5633 = vst [vmem:[%s8584_s27 + $0x90] sm:$0xff] %v5549_v17   ;;  %v5897_v23 = vpop.f32.mrb[168].mxu1  ;;  %v5078_v17 = vpop.permute.xlu1 %5077 }
 0x6da   : > { %v4315_v20 = vpop.f32.mrb[169].mxu1  ;;  %v4324_v24 = vadd.f32 %v5897_v23, %v8575_v32 }
 0x6db   : > { %v5898_v38 = vpop.f32.mrb[170].mxu1  ;;  %v4316_v4 = vadd.f32 %v8575_v32, %v4315_v20 }
 0x6dc   : > { %v4327_v21 = vadd.f32 %v5898_v38, %v8575_v32  ;;  %v4318_v6 = vpop.f32.mrb[171].mxu1 }
 0x6dd   : > { %v4319_v55 = vadd.f32 %v8575_v32, %v4318_v6  ;;  %v5060_v6 = vsel %vm5049_vm3, %v5058_v27, 0.0 }
 0x6de   : > { %v5564_v35 = vpack.c.bf16 %v4327_v21, %v4324_v24 }
 0x6df   : > { %v5559_v8 = vpack.c.bf16 %v4319_v55, %v4316_v4  ;;  %v5070_v4 = vsel %vm5061_vm4, %v5068_v52, 0.0 }
 0x6e0   : > { %5636 = vst [vmem:[%s8584_s27 + $0xa8] sm:$0xff] %v5564_v35   ;;  %v5079_v35 = vsel %vm3643_vm2, %v5078_v17, %v5075_v43 }
 0x6e1   : > { %5635 = vst [vmem:[%s8584_s27 + $0xa0] sm:$0xff] %v5559_v8   ;;  %v5901_v22 = vpop.f32.mrb[172].mxu1 }
 0x6e2   : > { %v4331_v25 = vpop.f32.mrb[173].mxu1  ;;  %v4340_v15 = vadd.f32 %v5901_v22, %v8575_v32  ;;  %v5071_v22 = vadd.f32 %v5070_v4, %v5060_v6 }
 0x6e3   : > { %v5902_v2 = vpop.f32.mrb[174].mxu1  ;;  %v4332_v34 = vadd.f32 %v8575_v32, %v4331_v25 }
 0x6e4   : > { %v4343_v46 = vadd.f32 %v5902_v2, %v8575_v32  ;;  %v4334_v56 = vpop.f32.mrb[175].mxu1  ;;  %v5081_v2 = vsel %vm5072_vm5, %v5079_v35, 0.0 }
 0x6e5   : > { %v4335_v45 = vadd.f32 %v8575_v32, %v4334_v56 }
 0x6e6   : > { %v5574_v39 = vpack.c.bf16 %v4343_v46, %v4340_v15  ;;  %v5369_v15 = vld [vmem:[%s8707_s13] ss:$0 sm:$0xff] }
 0x6e7   : > { %v5569_v42 = vpack.c.bf16 %v4335_v45, %v4332_v34  ;;  %v5082_v45 = vadd.f32 %v5081_v2, %v5071_v22 }
 0x6e8   : > { %5638 = vst [vmem:[%s8584_s27 + $0xb8] sm:$0xff] %v5574_v39  }
 0x6e9   : > { %5637 = vst [vmem:[%s8584_s27 + $0xb0] sm:$0xff] %v5569_v42   ;;  %v5905_v59 = vpop.f32.mrb[176].mxu1 }
 0x6ea   : > { %v4347_v41 = vpop.f32.mrb[177].mxu1  ;;  %v4356_v11 = vadd.f32 %v5905_v59, %v8575_v32  ;;  %v8832_v59 = vld [vmem:[#allocation27_spill] sm:$0xff] }
 0x6eb   : > { %v5906_v5 = vpop.f32.mrb[178].mxu1  ;;  %v4348_v9 = vadd.f32 %v8575_v32, %v4347_v41 }
 0x6ec   : > { %v4359_v50 = vadd.f32 %v5906_v5, %v8575_v32  ;;  %v4350_v51 = vpop.f32.mrb[179].mxu1 }
 0x6ed   : > { %v4351_v37 = vadd.f32 %v8575_v32, %v4350_v51 }
 0x6ee   : > { %v5584_v29 = vpack.c.bf16 %v4359_v50, %v4356_v11 }
 0x6ef   : > { %v5579_v62 = vpack.c.bf16 %v4351_v37, %v4348_v9 }
 0x6f0   : > { %5640 = vst [vmem:[%s8584_s27 + $0xc8] sm:$0xff] %v5584_v29  }
 0x6f1   : > { %5639 = vst [vmem:[%s8584_s27 + $0xc0] sm:$0xff] %v5579_v62   ;;  %v5909_v40 = vpop.f32.mrb[180].mxu1 }
 0x6f2   : > { %v4363_v53 = vpop.f32.mrb[181].mxu1  ;;  %v4372_v48 = vadd.f32 %v5909_v40, %v8575_v32 }
 0x6f3   : > { %v5910_v36 = vpop.f32.mrb[182].mxu1  ;;  %v4364_v1 = vadd.f32 %v8575_v32, %v4363_v53 }
 0x6f4   : > { %v4375_v60 = vadd.f32 %v5910_v36, %v8575_v32  ;;  %v4366_v30 = vpop.f32.mrb[183].mxu1 }
 0x6f5   : > { %v4367_v13 = vadd.f32 %v8575_v32, %v4366_v30 }
 0x6f6   : > { %v5594_v28 = vpack.c.bf16 %v4375_v60, %v4372_v48 }
 0x6f7   : > { %v5589_v0 = vpack.c.bf16 %v4367_v13, %v4364_v1 }
 0x6f8   : > { %5642 = vst [vmem:[%s8584_s27 + $0xd8] sm:$0xff] %v5594_v28  }
 0x6f9   : > { %5641 = vst [vmem:[%s8584_s27 + $0xd0] sm:$0xff] %v5589_v0   ;;  %v5913_v57 = vpop.f32.mrb[184].mxu1 }
 0x6fa   : > { %v4379_v18 = vpop.f32.mrb[185].mxu1  ;;  %v4388_v14 = vadd.f32 %v5913_v57, %v8575_v32 }
 0x6fb   : > { %v5914_v63 = vpop.f32.mrb[186].mxu1  ;;  %v4380_v44 = vadd.f32 %v8575_v32, %v4379_v18 }
 0x6fc   : > { %v4391_v54 = vadd.f32 %v5914_v63, %v8575_v32  ;;  %v4382_v58 = vpop.f32.mrb[187].mxu1 }
 0x6fd   : > { %v4383_v31 = vadd.f32 %v8575_v32, %v4382_v58 }
 0x6fe   : > { %v5604_v12 = vpack.c.bf16 %v4391_v54, %v4388_v14 }
 0x6ff   : > { %v5599_v49 = vpack.c.bf16 %v4383_v31, %v4380_v44 }
 0x700   : > { %5644 = vst [vmem:[%s8584_s27 + $0xe8] sm:$0xff] %v5604_v12  }
 0x701   : > { %5643 = vst [vmem:[%s8584_s27 + $0xe0] sm:$0xff] %v5599_v49   ;;  %v5917_v47 = vpop.f32.mrb[188].mxu1 }
 0x702   : > { %v4395_v19 = vpop.f32.mrb[189].mxu1  ;;  %v4404_v23 = vadd.f32 %v5917_v47, %v8575_v32 }
 0x703   : > { %v5918_v33 = vpop.f32.mrb[190].mxu1  ;;  %v4396_v24 = vadd.f32 %v8575_v32, %v4395_v19 }
 0x704   : > { %v4407_v20 = vadd.f32 %v5918_v33, %v8575_v32  ;;  %v4398_v38 = vpop.f32.mrb[191].mxu1 }
 0x705   : > { %v4399_v21 = vadd.f32 %v8575_v32, %v4398_v38 }
 0x706   : > { %v5614_v55 = vpack.c.bf16 %v4407_v20, %v4404_v23 }
 0x707   : > { %v5609_v8 = vpack.c.bf16 %v4399_v21, %v4396_v24 }
 0x708   : > { %5646 = vst [vmem:[%s8584_s27 + $0xf8] sm:$0xff] %v5614_v55  }
 0x709   : > { %5645 = vst [vmem:[%s8584_s27 + $0xf0] sm:$0xff] %v5609_v8   ;;  %v5761_v25 = vpop.f32.mrb[192].mxu1 }
 0x70a   : > { %v5762_v46 = vpop.f32.mrb[193].mxu1 }
 0x70b   : > { %v5763_v56 = vadd.f32 %v5762_v46, %v5761_v25  ;;  %v5764_v32 = vpop.f32.mrb[194].mxu1 }
 0x70c   : > { %v5765_v34 = vpop.f32.mrb[195].mxu1 }
 0x70d   : > { %v4900_v39 = vadd.f32 %v5763_v56, %v5369_v15 }
 0x70f   : > { %v5083_v42 = vadd.f32 %v5082_v45, %v4900_v39 }
 0x711   : > { %v5091_v41 = vrot.slane %v5083_v42, %v8832_v59 }
 0x713   : > { %v5092_v5 = vcombine.high %v5091_v41, %v5091_v41  ;;  %5386 = vst.sshfl [vmem:[%s513_s16] sm:$0x1 pattern:$0x73625140] %v5091_v41 }
 0x715   : > { %5387 = vst.sshfl [vmem:[%s513_s16 + $0x1] sm:$0x1 pattern:$0x73625140] %v5092_v5 }
 0x716 PF: > { %s26_s18 = sadd.s32 1, %s6175_s18  }
 0x717   : > { %p23_p4 = scmp.ge.s32.totalorder %s26_s18, 4  }
 0x719   :  { %25 = sbr.rel (!%p23_p4) target bundleno = 1 (0x1), region = 118 }

</bundles_post_ra>
